<compile_context>
chip_gen: v7x
topology: tpu7x:2x2x1
jax: 0.10.0
libtpu: 0.0.40
codegen_flags: <defaults>
</compile_context>

<pallas_src>
import functools

import jax
import jax.numpy as jnp
from jax import lax
from jax.experimental import pallas as pl
from jax.experimental.pallas import tpu as pltpu

# f32-accurate matmuls everywhere (reference + glue) so the restructured
# kernel math (folded norms, merged weights, transposed dots) matches the
# faithful reference within a tight tolerance.
jax.config.update("jax_default_matmul_precision", "highest")

EPS = 1e-12  # matches torch.nn.functional.normalize eps
_VMEM_LIMIT = 64 * 1024 * 1024


def _compiler_params():
    return pltpu.CompilerParams(dimension_semantics=("parallel",),
                                vmem_limit_bytes=_VMEM_LIMIT)


def _pick_tile(n):
    for t in (1024, 512, 256, 128):
        if n % t == 0:
            return t
    return n


# ---------------------------------------------------------------------------
# small helpers shared by kernels / reference
# ---------------------------------------------------------------------------
def _row_normalize(x):
    n = jnp.sqrt(jnp.sum(x * x, axis=1, keepdims=True))
    return x / jnp.maximum(n, EPS)


def _col_normalize(x):
    n = jnp.sqrt(jnp.sum(x * x, axis=0, keepdims=True))
    return x / jnp.maximum(n, EPS)


# ---------------------------------------------------------------------------
# Pallas kernels (transposed, nodes-on-lanes layout)
# ---------------------------------------------------------------------------
def _row_normalize_kernel(xt_ref, ht_ref):
    # per-node (= per-lane) L2 normalization: F.normalize(x, dim=1) transposed
    xt = xt_ref[...]
    n = jnp.sqrt(jnp.sum(xt * xt, axis=0, keepdims=True))
    ht_ref[...] = xt / jnp.maximum(n, EPS)


def _row_normalize_t(xt, tile_n):
    f, n = xt.shape
    return pl.pallas_call(
        _row_normalize_kernel,
        out_shape=jax.ShapeDtypeStruct((f, n), jnp.float32),
        grid=(n // tile_n,),
        in_specs=[pl.BlockSpec((f, tile_n), lambda i: (0, i))],
        out_specs=pl.BlockSpec((f, tile_n), lambda i: (0, i)),
        compiler_params=_compiler_params(),
    )(xt)


def _propagate_kernel(ht_ref, pt_ref, out_ref):
    # out[:, tile] = h^T @ P^T[:, tile]   ( == (P @ h)^T[:, tile] )
    out_ref[...] = jnp.dot(ht_ref[...], pt_ref[...],
                           preferred_element_type=jnp.float32,
                           precision=lax.Precision.HIGHEST)


def _propagate_t(ht, pt, tile_n):
    f, n = ht.shape
    return pl.pallas_call(
        _propagate_kernel,
        out_shape=jax.ShapeDtypeStruct((f, n), jnp.float32),
        grid=(n // tile_n,),
        in_specs=[pl.BlockSpec((f, n), lambda i: (0, 0)),        # h^T resident (small)
                  pl.BlockSpec((n, tile_n), lambda i: (0, i))],  # P^T column panel, pipelined
        out_specs=pl.BlockSpec((f, tile_n), lambda i: (0, i)),
        compiler_params=_compiler_params(),
    )(ht, pt)


def _project_kernel(z_ref, wb_ref, bb_ref, w2_ref, b2_ref, out_ref):
    # All K+3 basis projections + biases + ReLU in a single MXU matmul ...
    t = jnp.dot(wb_ref[...], z_ref[...],
                preferred_element_type=jnp.float32,
                precision=lax.Precision.HIGHEST) + bb_ref[...]
    t = jnp.maximum(t, 0.0)
    # ... and the group-sum + lin2 + ReLU folded into a second one.
    o = jnp.dot(w2_ref[...], t,
                preferred_element_type=jnp.float32,
                precision=lax.Precision.HIGHEST) + b2_ref[...]
    out_ref[...] = jnp.maximum(o, 0.0)


def _project_t(zt, wbt, bbt, w2t, b2t, tile_n):
    fin, n = zt.shape
    gh = wbt.shape[0]
    nh = w2t.shape[0]
    return pl.pallas_call(
        _project_kernel,
        out_shape=jax.ShapeDtypeStruct((nh, n), jnp.float32),
        grid=(n // tile_n,),
        in_specs=[pl.BlockSpec((fin, tile_n), lambda i: (0, i)),  # stacked bases, pipelined
                  pl.BlockSpec((gh, fin), lambda i: (0, 0)),      # merged weights, resident
                  pl.BlockSpec((gh, 1), lambda i: (0, 0)),
                  pl.BlockSpec((nh, gh), lambda i: (0, 0)),
                  pl.BlockSpec((nh, 1), lambda i: (0, 0))],
        out_specs=pl.BlockSpec((nh, tile_n), lambda i: (0, i)),
        compiler_params=_compiler_params(),
    )(zt, wbt, bbt, w2t, b2t)


# ---------------------------------------------------------------------------
# FEGNN forward (Pallas hot path + tiny JAX glue for weight folding)
# ---------------------------------------------------------------------------
def fegnn_forward(x, P, cp_adj, params, K, tile_n=None):
    N, F = x.shape
    NL = cp_adj.shape[1]
    NHID = params["w2"].shape[1]
    if tile_n is None:
        tile_n = _pick_tile(N)
    assert N % tile_n == 0, "tile_n must divide N"

    # Transposed, nodes-on-lanes layout (layout plumbing only).
    xt = x.T                      # (F, N)
    adjt = cp_adj.T               # (NL, N)
    pt = P.T                      # (N, N); hk^T = h_{k-1}^T @ P^T (P symmetric here)

    # h = normalize(x, dim=1): per-node normalization, node-tiled kernel.
    ht = _row_normalize_t(xt, tile_n)

    # gpr polynomial chain h_k = P^k h, k = 0..K (serial in k, tiled over nodes).
    hts = [ht]
    cur = ht
    for _ in range(K):
        cur = _propagate_t(cur, pt, tile_n)
        hts.append(cur)

    # Fold the dim=0 (over nodes) normalization of each basis into the weights:
    #   normalize(hk, dim=0) @ Wk == hk @ (Wk / max(colnorm(hk), eps)).
    inv_cn = [1.0 / jnp.maximum(jnp.sqrt(jnp.sum(h * h, axis=1)), EPS) for h in hts]

    # Merge all K+3 projections into one block-structured weight so the whole
    # dictionary build is two MXU matmuls per node tile.
    G = K + 3                       # x-group, K+1 lx-groups, l-group
    Fin = (K + 1) * F + NL
    w_big = jnp.zeros((Fin, G * NHID), jnp.float32)
    # x_basis == normalize(h0, dim=0): same input rows as lx_0, different columns.
    w_big = w_big.at[0:F, 0:NHID].set(params["wx"] * inv_cn[0][:, None])
    for k in range(K + 1):
        w_big = w_big.at[k * F:(k + 1) * F,
                         (k + 1) * NHID:(k + 2) * NHID].set(
                             params["wk"][k] * inv_cn[k][:, None])
    w_big = w_big.at[(K + 1) * F:, (K + 2) * NHID:].set(params["wl"])
    b_big = jnp.concatenate([params["bx"][0], params["bk"].reshape(-1),
                             params["bl"][0]])

    # Stacked basis slab, nodes on lanes: [h_0; h_1; ...; h_K; cp_adj^T].
    zt = jnp.concatenate(hts + [adjt], axis=0)      # (Fin, N)

    # vstack([W2]*G)^T == tile(W2^T, G) -> the group-sum is folded into lin2.
    w2_big_t = jnp.tile(params["w2"].T, (1, G))     # (NHID, G*NHID)

    out_t = _project_t(zt, w_big.T, b_big[:, None], w2_big_t,
                       params["b2"][0][:, None], tile_n)
    return out_t.T                                   # (N, NHID)


# ---------------------------------------------------------------------------
# Pure-JAX reference (faithful mirror of the PyTorch forward)
# ---------------------------------------------------------------------------
def fegnn_reference(x, P, cp_adj, params, K):
    h = _row_normalize(x)
    x_basis = _col_normalize(h)
    dict_mat = jax.nn.relu(x_basis @ params["wx"] + params["bx"][0])
    hk = h
    for k in range(K + 1):
        if k > 0:
            hk = P @ hk
        lxk = _col_normalize(hk)
        dict_mat = dict_mat + jax.nn.relu(lxk @ params["wk"][k] + params["bk"][k])
    dict_mat = dict_mat + jax.nn.relu(cp_adj @ params["wl"] + params["bl"][0])
    return jax.nn.relu(dict_mat @ params["w2"] + params["b2"][0])


# ---------------------------------------------------------------------------
# Parameter / input construction (deterministic, in-script)
# ---------------------------------------------------------------------------
def init_linear(key, fan_in, fan_out):
    kw, kb = jax.random.split(key)
    bound = 1.0 / jnp.sqrt(jnp.float32(fan_in))
    w = jax.random.uniform(kw, (fan_in, fan_out), jnp.float32, -bound, bound)
    b = jax.random.uniform(kb, (1, fan_out), jnp.float32, -bound, bound)
    return w, b


def build_propagation_matrix(edge_index, num_nodes):
    """Dense P = D^-1/2 A D^-1/2 (symmetric, no self loops) from edge_index."""
    src, dst = edge_index[0], edge_index[1]
    A = jnp.zeros((num_nodes, num_nodes), jnp.float32)
    A = A.at[src, dst].set(1.0)
    A = jnp.maximum(A, A.T)                                    # symmetrize
    A = A * (1.0 - jnp.eye(num_nodes, dtype=jnp.float32))      # drop self loops
    deg = jnp.sum(A, axis=1)
    dinv = jnp.where(deg > 0, 1.0 / jnp.sqrt(deg), 0.0)
    return dinv[:, None] * A * dinv[None, :]


if __name__ == "__main__":
    N, F_IN, NHID, NL, K = 256, 16, 32, 8, 2
    TILE_N = 128    # -> 2-tile "parallel" grid on every kernel

    key = jax.random.PRNGKey(0)
    k_x, k_adj, k_e, k_wx, k_wl, k_w2, k_wk = jax.random.split(key, 7)

    # node features and precomputed low-rank adjacency (cp_adj)
    x = jax.random.normal(k_x, (N, F_IN), jnp.float32)
    cp_adj = jax.random.normal(k_adj, (N, NL), jnp.float32)

    # deterministic graph: ring + a few random chords
    ring_src = jnp.arange(N)
    ring_dst = (ring_src + 1) % N
    extra_src = jax.random.randint(k_e, (64,), 0, N)
    extra_dst = (extra_src + jax.random.randint(jax.random.fold_in(k_e, 1),
                                                (64,), 1, N)) % N
    edge_index = jnp.stack([jnp.concatenate([ring_src, extra_src]),
                            jnp.concatenate([ring_dst, extra_dst])])
    P = build_propagation_matrix(edge_index, N)

    # parameters (nx = nlx = F_IN, nl = NL)
    wx, bx = init_linear(k_wx, F_IN, NHID)
    wl, bl = init_linear(k_wl, NL, NHID)
    w2, b2 = init_linear(k_w2, NHID, NHID)
    wks, bks = [], []
    for k in range(K + 1):
        w, b = init_linear(jax.random.fold_in(k_wk, k), F_IN, NHID)
        wks.append(w)
        bks.append(b[0])
    params = dict(wx=wx, bx=bx,
                  wk=jnp.stack(wks), bk=jnp.stack(bks),
                  wl=wl, bl=bl, w2=w2, b2=b2)

    fwd = jax.jit(functools.partial(fegnn_forward, K=K, tile_n=TILE_N))
    out = jax.block_until_ready(fwd(x, P, cp_adj, params))

    ref = fegnn_reference(x, P, cp_adj, params, K)
    assert out.shape == (N, NHID)
    max_err = float(jnp.max(jnp.abs(out - ref)))
    assert jnp.allclose(out, ref, atol=1e-4, rtol=1e-4), (
        f"mismatch vs reference (max abs err = {max_err})")

    print("KERNEL_OK")
</pallas_src>

<mosaic_0001>
module attributes {stable_mosaic.version = 11 : i64} {
  func.func @_row_normalize_kernel(%arg0: i32, %arg1: memref<16x128xf32, #tpu.memory_space<vmem>>, %arg2: memref<16x128xf32, #tpu.memory_space<vmem>>) attributes {dimension_semantics = [#tpu.dimension_semantics<parallel>], iteration_bounds = array<i64: 2>, scalar_prefetch = 0 : i64, scratch_operands = 0 : i64, tpu.core_type = #tpu.core_type<tc>, window_params = [{transform_indices = @transform_0, window_bounds = array<i64: 16, 128>}, {transform_indices = @transform_1, window_bounds = array<i64: 16, 128>}]} {
    %c0 = arith.constant 0 : index
    %c0_0 = arith.constant 0 : index
    %0 = vector.load %arg1[%c0, %c0_0] : memref<16x128xf32, #tpu.memory_space<vmem>>, vector<16x128xf32>
    %1 = arith.mulf %0, %0 : vector<16x128xf32>
    %cst = arith.constant dense<0.000000e+00> : vector<128xf32>
    %2 = vector.multi_reduction <add>, %1, %cst [0] : vector<16x128xf32> to vector<128xf32>
    %3 = vector.shape_cast %2 : vector<128xf32> to vector<1x128xf32>
    %4 = math.sqrt %3 : vector<1x128xf32>
    %cst_1 = arith.constant 9.99999996E-13 : f32
    %5 = vector.broadcast %cst_1 : f32 to vector<1x128xf32>
    %6 = arith.maximumf %4, %5 : vector<1x128xf32>
    %7 = vector.broadcast %6 : vector<1x128xf32> to vector<16x128xf32>
    %8 = arith.divf %0, %7 : vector<16x128xf32>
    %c0_2 = arith.constant 0 : index
    %c0_3 = arith.constant 0 : index
    %9 = vector.load %arg2[%c0_2, %c0_3] : memref<16x128xf32, #tpu.memory_space<vmem>>, vector<16x128xf32>
    tpu.vector_store %arg2[%c0_2, %c0_3], %8 {strides = array<i32>} : memref<16x128xf32, #tpu.memory_space<vmem>>, vector<16x128xf32>,
    return
  }
  func.func @transform_0(%arg0: i32) -> (i32, i32) {
    %c0_i32 = arith.constant 0 : i32
    %c0_i32_0 = arith.constant 0 : i32
    return %c0_i32, %arg0 : i32, i32
  }
  func.func @transform_1(%arg0: i32) -> (i32, i32) {
    %c0_i32 = arith.constant 0 : i32
    %c0_i32_0 = arith.constant 0 : i32
    return %c0_i32, %arg0 : i32, i32
  }
}

module attributes {stable_mosaic.version = 11 : i64} {
  func.func @_propagate_kernel(%arg0: i32, %arg1: memref<16x256xf32, #tpu.memory_space<vmem>>, %arg2: memref<256x128xf32, #tpu.memory_space<vmem>>, %arg3: memref<16x128xf32, #tpu.memory_space<vmem>>) attributes {dimension_semantics = [#tpu.dimension_semantics<parallel>], iteration_bounds = array<i64: 2>, scalar_prefetch = 0 : i64, scratch_operands = 0 : i64, tpu.core_type = #tpu.core_type<tc>, window_params = [{pipeline_mode = #tpu.pipeline_mode<synchronous>, transform_indices = @transform_0, window_bounds = array<i64: 16, 256>}, {transform_indices = @transform_1, window_bounds = array<i64: 256, 128>}, {transform_indices = @transform_2, window_bounds = array<i64: 16, 128>}]} {
    %c0 = arith.constant 0 : index
    %c0_0 = arith.constant 0 : index
    %0 = vector.load %arg1[%c0, %c0_0] : memref<16x256xf32, #tpu.memory_space<vmem>>, vector<16x256xf32>
    %c0_1 = arith.constant 0 : index
    %c0_2 = arith.constant 0 : index
    %1 = vector.load %arg2[%c0_1, %c0_2] : memref<256x128xf32, #tpu.memory_space<vmem>>, vector<256x128xf32>
    %cst = arith.constant dense<0.000000e+00> : vector<16x128xf32>
    %2 = tpu.matmul %0, %1, %cst {dimension_numbers = #tpu.dot_dimension_numbers<[1], [0], [0], [1], [0, 0, 1, 1], [], []>, precision = #tpu.contract_precision<fp32>} : vector<16x256xf32>, vector<256x128xf32>, vector<16x128xf32> -> vector<16x128xf32>
    %c0_3 = arith.constant 0 : index
    %c0_4 = arith.constant 0 : index
    %3 = vector.load %arg3[%c0_3, %c0_4] : memref<16x128xf32, #tpu.memory_space<vmem>>, vector<16x128xf32>
    tpu.vector_store %arg3[%c0_3, %c0_4], %2 {strides = array<i32>} : memref<16x128xf32, #tpu.memory_space<vmem>>, vector<16x128xf32>,
    return
  }
  func.func @transform_0(%arg0: i32) -> (i32, i32) {
    %c0_i32 = arith.constant 0 : i32
    %c0_i32_0 = arith.constant 0 : i32
    %c0_i32_1 = arith.constant 0 : i32
    return %c0_i32, %c0_i32_0 : i32, i32
  }
  func.func @transform_1(%arg0: i32) -> (i32, i32) {
    %c0_i32 = arith.constant 0 : i32
    %c0_i32_0 = arith.constant 0 : i32
    return %c0_i32, %arg0 : i32, i32
  }
  func.func @transform_2(%arg0: i32) -> (i32, i32) {
    %c0_i32 = arith.constant 0 : i32
    %c0_i32_0 = arith.constant 0 : i32
    return %c0_i32, %arg0 : i32, i32
  }
}

module attributes {stable_mosaic.version = 11 : i64} {
  func.func @_project_kernel(%arg0: i32, %arg1: memref<56x128xf32, #tpu.memory_space<vmem>>, %arg2: memref<160x56xf32, #tpu.memory_space<vmem>>, %arg3: memref<160x1xf32, #tpu.memory_space<vmem>>, %arg4: memref<32x160xf32, #tpu.memory_space<vmem>>, %arg5: memref<32x1xf32, #tpu.memory_space<vmem>>, %arg6: memref<32x128xf32, #tpu.memory_space<vmem>>) attributes {dimension_semantics = [#tpu.dimension_semantics<parallel>], iteration_bounds = array<i64: 2>, scalar_prefetch = 0 : i64, scratch_operands = 0 : i64, tpu.core_type = #tpu.core_type<tc>, window_params = [{transform_indices = @transform_0, window_bounds = array<i64: 56, 128>}, {pipeline_mode = #tpu.pipeline_mode<synchronous>, transform_indices = @transform_1, window_bounds = array<i64: 160, 56>}, {pipeline_mode = #tpu.pipeline_mode<synchronous>, transform_indices = @transform_2, window_bounds = array<i64: 160, 1>}, {pipeline_mode = #tpu.pipeline_mode<synchronous>, transform_indices = @transform_3, window_bounds = array<i64: 32, 160>}, {pipeline_mode = #tpu.pipeline_mode<synchronous>, transform_indices = @transform_4, window_bounds = array<i64: 32, 1>}, {transform_indices = @transform_5, window_bounds = array<i64: 32, 128>}]} {
    %c0 = arith.constant 0 : index
    %c0_0 = arith.constant 0 : index
    %0 = vector.load %arg2[%c0, %c0_0] : memref<160x56xf32, #tpu.memory_space<vmem>>, vector<160x56xf32>
    %c0_1 = arith.constant 0 : index
    %c0_2 = arith.constant 0 : index
    %1 = vector.load %arg1[%c0_1, %c0_2] : memref<56x128xf32, #tpu.memory_space<vmem>>, vector<56x128xf32>
    %cst = arith.constant dense<0.000000e+00> : vector<160x128xf32>
    %2 = tpu.matmul %0, %1, %cst {dimension_numbers = #tpu.dot_dimension_numbers<[1], [0], [0], [1], [0, 0, 1, 1], [], []>, precision = #tpu.contract_precision<fp32>} : vector<160x56xf32>, vector<56x128xf32>, vector<160x128xf32> -> vector<160x128xf32>
    %c0_3 = arith.constant 0 : index
    %c0_4 = arith.constant 0 : index
    %3 = vector.load %arg3[%c0_3, %c0_4] : memref<160x1xf32, #tpu.memory_space<vmem>>, vector<160x1xf32>
    %4 = vector.broadcast %3 : vector<160x1xf32> to vector<160x128xf32>
    %5 = arith.addf %2, %4 : vector<160x128xf32>
    %cst_5 = arith.constant 0.000000e+00 : f32
    %6 = vector.broadcast %cst_5 : f32 to vector<160x128xf32>
    %7 = arith.maximumf %5, %6 : vector<160x128xf32>
    %c0_6 = arith.constant 0 : index
    %c0_7 = arith.constant 0 : index
    %8 = vector.load %arg4[%c0_6, %c0_7] : memref<32x160xf32, #tpu.memory_space<vmem>>, vector<32x160xf32>
    %cst_8 = arith.constant dense<0.000000e+00> : vector<32x128xf32>
    %9 = tpu.matmul %8, %7, %cst_8 {dimension_numbers = #tpu.dot_dimension_numbers<[1], [0], [0], [1], [0, 0, 1, 1], [], []>, precision = #tpu.contract_precision<fp32>} : vector<32x160xf32>, vector<160x128xf32>, vector<32x128xf32> -> vector<32x128xf32>
    %c0_9 = arith.constant 0 : index
    %c0_10 = arith.constant 0 : index
    %10 = vector.load %arg5[%c0_9, %c0_10] : memref<32x1xf32, #tpu.memory_space<vmem>>, vector<32x1xf32>
    %11 = vector.broadcast %10 : vector<32x1xf32> to vector<32x128xf32>
    %12 = arith.addf %9, %11 : vector<32x128xf32>
    %cst_11 = arith.constant 0.000000e+00 : f32
    %13 = vector.broadcast %cst_11 : f32 to vector<32x128xf32>
    %14 = arith.maximumf %12, %13 : vector<32x128xf32>
    %c0_12 = arith.constant 0 : index
    %c0_13 = arith.constant 0 : index
    %15 = vector.load %arg6[%c0_12, %c0_13] : memref<32x128xf32, #tpu.memory_space<vmem>>, vector<32x128xf32>
    tpu.vector_store %arg6[%c0_12, %c0_13], %14 {strides = array<i32>} : memref<32x128xf32, #tpu.memory_space<vmem>>, vector<32x128xf32>,
    return
  }
  func.func @transform_0(%arg0: i32) -> (i32, i32) {
    %c0_i32 = arith.constant 0 : i32
    %c0_i32_0 = arith.constant 0 : i32
    return %c0_i32, %arg0 : i32, i32
  }
  func.func @transform_1(%arg0: i32) -> (i32, i32) {
    %c0_i32 = arith.constant 0 : i32
    %c0_i32_0 = arith.constant 0 : i32
    %c0_i32_1 = arith.constant 0 : i32
    return %c0_i32, %c0_i32_0 : i32, i32
  }
  func.func @transform_2(%arg0: i32) -> (i32, i32) {
    %c0_i32 = arith.constant 0 : i32
    %c0_i32_0 = arith.constant 0 : i32
    %c0_i32_1 = arith.constant 0 : i32
    return %c0_i32, %c0_i32_0 : i32, i32
  }
  func.func @transform_3(%arg0: i32) -> (i32, i32) {
    %c0_i32 = arith.constant 0 : i32
    %c0_i32_0 = arith.constant 0 : i32
    %c0_i32_1 = arith.constant 0 : i32
    return %c0_i32, %c0_i32_0 : i32, i32
  }
  func.func @transform_4(%arg0: i32) -> (i32, i32) {
    %c0_i32 = arith.constant 0 : i32
    %c0_i32_0 = arith.constant 0 : i32
    %c0_i32_1 = arith.constant 0 : i32
    return %c0_i32, %c0_i32_0 : i32, i32
  }
  func.func @transform_5(%arg0: i32) -> (i32, i32) {
    %c0_i32 = arith.constant 0 : i32
    %c0_i32_0 = arith.constant 0 : i32
    return %c0_i32, %arg0 : i32, i32
  }
}

</mosaic_0001>

<bundles_post_ra>
// kernel: fegnn_forward.4
= control target key start
LH: loop header
LB: loop body
LE: loop exit
PB: predicated region body
PF: predicated region fallthrough
CT: control target
= control target key end

     0   :  { %6 = vsyncpa [#allocation3], 0  ;;  %s592_s0 = inlined_call_operand.hbm [shape: f32[16,256], index: 0, kind: input, shape index: {}]   ;;  %s593_s1 = inlined_call_operand.hbm [shape: f32[16,256], index: 1, kind: output, shape index: {}]  }
   0x1   :  { %8 = vsyncpa [#allocation3 + $0x1], 0 }
   0x2   :  { %9 = vsyncpa [#allocation4], 0 }
   0x3   :  { %11 = vsyncpa [#allocation4 + $0x1], 0  ;;  %s428_s6 = smov 0   ;;  %s430_s7 = smov 0  }
   0x4   :  { %s432_s8 = smov 0   ;;  %s434_s9 = smov 0  }
   0x5 LB: > { %s449_s10 = sadd.s32 4294967295, %s408_s9   ;;  %s244_s11 = sadd.s32 4294967294, %s408_s9   ;;  %s408_s9 = sphi %s434_s9, %s607_s9   ;;  %s404_s8 = sphi %s432_s8, %s606_s8   ;;  %s400_s7 = sphi %s430_s7, %s605_s7   ;;  %s396_s6 = sphi %s428_s6, %s604_s6  }
   0x6   : > { %s453_s12 = sadd.s32 1, %s408_s9   ;;  %s24_s13 = sadd.s32 1, %s404_s8 }
   0x7   : > { %s21_s14 = ssub.s32 %s408_s9, %s453_s12  ;;  %p31_p0 = scmp.ne.s32.totalorder %s404_s8, %s400_s7 }
   0x8   : > { %p22_p1 = scmp.eq.s32.totalorder %s21_s14, 0  ;;  %p32_p2 = scmp.eq.s32.totalorder %s408_s9, 0 }
   0x9   : > { %p37_p3 = scmp.ne.s32.totalorder %s400_s7, %s396_s6  ;;  %p38_p4 = scmp.eq.s32.totalorder %s449_s10, 0 }
   0xa   : > { %s465_s15 = scalar_select %p22_p1, %s404_s8, %s24_s13  }
   0xb   : > { %p467_p5 = por %p32_p2, %p31_p0  ;;  %p471_p6 = por %p38_p4, %p37_p3 }
   0xc   : > { %p61_p7 = scmp.eq.s32.totalorder %s449_s10, 1  ;;  %p67_p8 = scmp.eq.s32.totalorder %s244_s11, 1 }
   0xd   : > { %p268_p10 = scmp.lt.s32.totalorder %s408_s9, 2  ;;  %s87_s20 = sand.u32 1, %s404_s8  }
   0xe   : > { %p478_p11 = por %p61_p7, %p31_p0  ;;  %p482_p12 = por %p67_p8, %p37_p3 }
   0xf   : > { %s248_s21 = sshll.u32 %s408_s9, 7  ;;  %s247_s22 = sshll.u32 %s87_s20, 4 }
  0x10   : > { %s597_s18 = scalar_select %p478_p11, 1, 0 }
  0x11   : > { %s598_s19 = scalar_select %p482_p12, 1, 0 }
  0x12   : > { %s491_s25 = scalar_lea.hbm %s592_s0, %s248_s21  ;;  %s91_s26 = scalar_lea.vmem [#allocation2], %s247_s22 }
  0x13   : > { %s97_s27 = sshll.u32 %s91_s26, 4  ;;  %p495_p13 = pnand %p268_p10, %p467_p5  ;;  %s499_s27 = int_to_ptr.vmem [resolvable:$true] %s97_s27 }
  0x14   : > { %s502_s29 = scalar_lea.sflag [#allocation3], %s87_s20  ;;  %s312_s30 = scalar_lea.hbm %s491_s25, 256 }
  0x15   : > { %p313_p1 = scmp.ne.s32.totalorder %s491_s25, %s312_s30  ;;  %p314_p2 = pneg %p495_p13 }
  0x16   : > { %s317_s4 = scalar_lea.hbm %s592_s0, 512  ;;  %p318_p5 = scmp.lt.u32.totalorder %s491_s25, %s592_s0 }
  0x17   : > { %p315_p3 = pnand %p314_p2, %p313_p1  ;;  %p319_p7 = scmp.lt.u32.totalorder %s317_s4, %s312_s30 }
  0x18   : > { %p321_p10 = scmp.lt.u32.totalorder %s312_s30, %s491_s25 }
  0x19   : > { %p316_p4 = pneg %p315_p3  ;;  %p320_p8 = por %p319_p7, %p318_p5 }
  0x1b   : > { %p322_p9 = por %p321_p10, %p320_p8 }
  0x1d   : > { %p323_p0 = pnand %p322_p9, %p316_p4 }
  0x1f   : > { %326 = shalt.err (!%p323_p0)
}
  0x20   : > { %s327_s13 = scalar_lea.vmem %s499_s27, 256  ;;  %s410_s14 = smov [#allocation2]  }
  0x21   : > { %p328_p1 = scmp.ne.s32.totalorder %s499_s27, %s327_s13  ;;  %s332_s16 = sshll.u32 %s410_s14, 4  ;;  %s333_s16 = int_to_ptr.vmem [resolvable:$false] %s332_s16 }
  0x22   : > { %s334_s20 = scalar_lea.vmem %s333_s16, 512  ;;  %p335_p11 = scmp.lt.s32.totalorder %s499_s27, %s333_s16 }
  0x23   : > { %p330_p3 = pnand %p328_p1, %p314_p2  ;;  %p336_p5 = scmp.lt.s32.totalorder %s334_s20, %s327_s13 }
  0x25   : > { %p331_p12 = pneg %p330_p3  ;;  %p337_p7 = por %p336_p5, %p335_p11 }
  0x27   : > { %p338_p8 = pnand %p337_p7, %p331_p12 }
  0x29   : > { %341 = shalt.err (!%p338_p8)
}
  0x2a   : > { %s411_s21 = smov 256   ;;  %s412_s22 = smov 128  }
  0x2b   : > { %s413_s23 = smov 8   ;;  %p105_p9 = scmp.lt.s32.totalorder %s408_s9, 3 }
  0x2c   : > { %263 = dma.hbm_to_vmem [thread:$0]  (!%p495_p13), %s491_s25, 256, %s499_s27, %s502_s29, %s411_s21, %s412_s22, %s413_s23  }
  0x2d   : > { %p600_p0 = scmp.ge.s32.totalorder %s408_s9, 1 }
  0x2f   : > { %p106_p2 = pnand %p600_p0, %p105_p9 }
  0x30   : > { %s534_s24 = sand.u32 (!%p106_p2), 1, %s400_s7  }
  0x31   : > { %109 = sbr.rel (%p106_p2) target bundleno = 120 (0x78), region = 24  ;;  %s250_s26 = sshll.u32 (!%p106_p2), %s534_s24, 4 }
  0x32   : > { %s112_s30 = scalar_lea.sflag (!%p106_p2), [#allocation3], %s534_s24  ;;  %s115_s2 = scalar_lea.vmem (!%p106_p2), [#allocation2], %s250_s26 }
  0x38   : > { %387 = dma.done.wait (%p471_p6), %s112_s30, 256  }
  0x39   : > { %389 = vsyncadd (%p471_p6), %s112_s30, 4294967040  ;;  %v134_v0 = vld [vmem:[%s115_s2] sm:$0xff]  ;;  %v135_v1 = vld [vmem:[%s115_s2 + $0x8] sm:$0xff]  ;;  %s133_s17 = scalar_lea.vmem [#allocation5], %s250_s26  ;;  %s253_s27 = sshll.u32 %s449_s10, 7 }
  0x3a   : > { %v136_v2 = vmul.f32 %v134_v0, %v134_v0  ;;  %v137_v3 = vmul.f32 %v135_v1, %v135_v1  ;;  %s171_s25 = sshll.u32 %s133_s17, 4  ;;  %s548_s3 = scalar_lea.hbm %s593_s1, %s253_s27  ;;  %s543_s25 = int_to_ptr.vmem [resolvable:$true] %s171_s25 }
  0x3b   : > { %s159_s4 = scalar_lea.sflag [#allocation4], %s534_s24  ;;  %s342_s5 = scalar_lea.vmem %s543_s25, 256 }
  0x3c   : > { %v138_v4 = vadd.f32 %v137_v3, %v136_v2  ;;  %p343_p6 = scmp.ne.s32.totalorder %s543_s25, %s342_s5  ;;  %p601_p11 = scmp.ne.s32.totalorder %s597_s18, 0 }
  0x3d   : > { %s414_s10 = smov [#allocation5]  }
  0x3e   : > { %v139_v5 = vrot.slane %v138_v4, 4  ;;  %p344_p12 = pnand %p343_p6, %p601_p11  ;;  %s346_s11 = sshll.u32 %s414_s10, 4  ;;  %s347_s11 = int_to_ptr.vmem [resolvable:$false] %s346_s11 }
  0x3f   : > { %s348_s13 = scalar_lea.vmem %s347_s11, 512  ;;  %p349_p4 = scmp.lt.s32.totalorder %s543_s25, %s347_s11 }
  0x40   : > { %v140_v6 = vadd.f32 %v139_v5, %v138_v4  ;;  %p345_p13 = pneg %p344_p12  ;;  %p350_p10 = scmp.lt.s32.totalorder %s348_s13, %s342_s5 }
  0x42   : > { %v141_v7 = vrot.slane %v140_v6, 2  ;;  %p351_p1 = por %p350_p10, %p349_p4 }
  0x44   : > { %v142_v8 = vadd.f32 %v141_v7, %v140_v6  ;;  %p352_p3 = pnand %p351_p1, %p345_p13 }
  0x46   : > { %v143_v9 = vrot.slane %v142_v8, 1 }
  0x48   : > { %v144_v10 = vadd.f32 %v143_v9, %v142_v8 }
  0x4a   : > { %308 = vrsqrt.f32 %v144_v10  ;;  %vm147_vm0 = vcmp.eq.f32.partialorder %v144_v10, inf  ;;  %v150_v12 = vand.u32 2147483648, %v144_v10  ;;  %vm149_vm1 = vcmp.eq.f32.partialorder %v144_v10, 0.0 }
  0x54   : > { %v309_v11 = vpop.eup %308 }
  0x55   : > { %v146_v13 = vmul.f32 %v309_v11, %v144_v10 }
  0x57   : > { %v148_v14 = vsel %vm147_vm0, %v144_v10, %v146_v13 }
  0x58   : > { %v151_v15 = vsel %vm149_vm1, %v150_v12, %v148_v14 }
  0x59   : > { %v152_v16 = vmax.f32 %v151_v15, 1e-12 }
  0x5b   : > { %310 = vrcp.f32 %v152_v16 }
  0x65   : > { %v311_v17 = vpop.eup %310 }
  0x66   : > { %v154_v18 = vmul.f32 %v311_v17, %v134_v0  ;;  %v155_v19 = vmul.f32 %v311_v17, %v135_v1 }
  0x68   : > { %156 = vst [vmem:[%s133_s17] sm:$0xff] %v154_v18  ;;  %157 = vst [vmem:[%s133_s17 + $0x8] sm:$0xff] %v155_v19 }
  0x69   : > { %355 = shalt.err (!%p352_p3)
}
  0x6a   : > { %s356_s14 = scalar_lea.hbm %s548_s3, 256  ;;  %s360_s21 = scalar_lea.hbm %s593_s1, 512 }
  0x6b   : > { %p357_p5 = scmp.ne.s32.totalorder %s548_s3, %s356_s14  ;;  %p361_p9 = scmp.lt.u32.totalorder %s548_s3, %s593_s1 }
  0x6c   : > { %p362_p0 = scmp.lt.u32.totalorder %s360_s21, %s356_s14  ;;  %p364_p6 = scmp.lt.u32.totalorder %s356_s14, %s548_s3 }
  0x6d   : > { %p358_p7 = pnand %p357_p5, %p601_p11 }
  0x6e   : > { %p363_p2 = por %p362_p0, %p361_p9 }
  0x6f   : > { %p359_p8 = pneg %p358_p7 }
  0x70   : > { %p365_p12 = por %p364_p6, %p363_p2 }
  0x72   : > { %p366_p13 = pnand %p365_p12, %p359_p8 }
  0x74   : > { %369 = shalt.err (!%p366_p13)
}
  0x75   : > { %s415_s26 = smov 128   ;;  %s416_s30 = smov 256  }
  0x76   : > { %s417_s2 = smov 8  }
  0x77   : > { %258 = dma.vmem_to_hbm [thread:$0]  (%p601_p11), %s543_s25, 256, %s548_s3, %s159_s4, %s415_s26, %s416_s30, %s417_s2  }
  0x78 PF: > { %s186_s17 = sand.u32 1, %s396_s6   ;;  %p602_p4 = scmp.ne.s32.totalorder %s598_s19, 0 }
  0x79   : > { %p603_p10 = scmp.ge.s32.totalorder %s408_s9, 2  ;;  %s187_s27 = scalar_lea.sflag [#allocation4], %s186_s17 }
  0x7b   : > { %p265_p1 = pnand %p603_p10, %p602_p4 }
  0x7d   : > { %391 = dma.done.wait (!%p265_p1), %s187_s27, 256  }
  0x7e   : > { %393 = vsyncadd (!%p265_p1), %s187_s27, 4294967040  ;;  %p14_p3 = scmp.ge.s32.totalorder %s453_s12, 4   ;;  %s604_s6 = smov %s400_s7 }
  0x7f   : > { %s605_s7 = smov %s404_s8  ;;  %s606_s8 = smov %s465_s15 }
  0x80   : > { %s607_s9 = smov %s453_s12  ;;  %16 = sbr.rel (!%p14_p3) target bundleno = 5 (0x5), region = 69 }
  0x87   :  { %192 = vsyncpa [#allocation3], 1 }
  0x88   :  { %194 = vsyncpa [#allocation3 + $0x1], 1 }
  0x89   :  { %195 = vsyncpa [#allocation4], 1 }
  0x8a   :  { %197 = vsyncpa [#allocation4 + $0x1], 1 }

// kernel: fegnn_forward.5
= control target key start
LH: loop header
LB: loop body
LE: loop exit
PB: predicated region body
PF: predicated region fallthrough
CT: control target
= control target key end

     0   :  { %7 = vsyncpa [#allocation3], 0  ;;  %s2561_s0 = inlined_call_operand.hbm [shape: f32[16,256], index: 0, kind: input, shape index: {}]   ;;  %s2562_s1 = inlined_call_operand.hbm [shape: f32[256,256], index: 1, kind: input, shape index: {}]   ;;  %s2563_s2 = inlined_call_operand.hbm [shape: f32[16,256], index: 2, kind: output, shape index: {}]  }
   0x1   :  { %8 = vsyncpa [#allocation6], 0 }
   0x2   :  { %10 = vsyncpa [#allocation6 + $0x1], 0 }
   0x3   :  { %11 = vsyncpa [#allocation4], 0 }
   0x4   :  { %13 = vsyncpa [#allocation4 + $0x1], 0  ;;  %s1883_s9 = smov 0   ;;  %s1885_s10 = smov 0  }
   0x5   :  { %s1887_s11 = smov 0   ;;  %s1889_s12 = smov 0  }
   0x6 LB: > { %s1904_s13 = sadd.s32 4294967295, %s1856_s12   ;;  %s1230_s14 = sadd.s32 4294967294, %s1856_s12   ;;  %s1856_s12 = sphi %s1889_s12, %s2687_s12   ;;  %s1852_s11 = sphi %s1887_s11, %s2686_s11   ;;  %s1848_s10 = sphi %s1885_s10, %s2685_s10   ;;  %s1844_s9 = sphi %s1883_s9, %s2684_s9  }
   0x7   : > { %s1908_s15 = sadd.s32 1, %s1856_s12   ;;  %s47_s16 = sadd.s32 1, %s1852_s11 }
   0x8   : > { %s44_s17 = ssub.s32 %s1856_s12, %s1908_s15  ;;  %p54_p0 = scmp.ne.s32.totalorder %s1852_s11, %s1848_s10 }
   0x9   : > { %p45_p1 = scmp.eq.s32.totalorder %s44_s17, 0  ;;  %p55_p2 = scmp.eq.s32.totalorder %s1856_s12, 0 }
   0xa   : > { %p60_p3 = scmp.ne.s32.totalorder %s1848_s10, %s1844_s9  ;;  %p2564_p4 = scmp.eq.s32.totalorder %s1904_s13, 0 }
   0xb   : > { %s1920_s18 = scalar_select %p45_p1, %s1852_s11, %s47_s16  }
   0xc   : > { %p1922_p5 = por %p55_p2, %p54_p0  ;;  %p1928_p6 = por %p2564_p4, %p60_p3 }
   0xd   : > { %p84_p7 = scmp.eq.s32.totalorder %s1904_s13, 1  ;;  %p90_p8 = scmp.eq.s32.totalorder %s1230_s14, 1 }
   0xe   : > { %s2618_s19 = scalar_select %p1922_p5, 1, 0 }
   0xf   : > { %s2619_s20 = scalar_select %p1928_p6, 1, 0 }
  0x10   : > { %p1231_p9 = scmp.ge.s32.totalorder %s1856_s12, 1  ;;  %p97_p10 = scmp.lt.s32.totalorder %s1856_s12, 3 }
  0x11   : > { %p1935_p11 = por %p84_p7, %p54_p0  ;;  %p1939_p12 = por %p90_p8, %p60_p3 }
  0x12   : > { %p1943_p13 = pnand %p1231_p9, %p97_p10  ;;  %s1858_s24 = smov [#allocation2]  }
  0x13   : > { %s2620_s21 = scalar_select %p1935_p11, 1, 0 }
  0x14   : > { %s2621_s22 = scalar_select %p1939_p12, 1, 0 }
  0x15   : > { %s2622_s23 = scalar_select %p1943_p13, 1, 0 }
  0x16   : > { %p1672_p1 = pneg %p1943_p13  ;;  %s109_s25 = sshll.u32 %s1858_s24, 4  ;;  %s110_s25 = int_to_ptr.vmem [resolvable:$true] %s109_s25 }
  0x17   : > { %s123_s27 = sand.u32 1, %s1852_s11   ;;  %s1728_s30 = scalar_lea.hbm %s2561_s0, 512 }
  0x18   : > { %p1951_p2 = pnand %p1672_p1, %p2564_p4  ;;  %p1729_p7 = scmp.ne.s32.totalorder %s2561_s0, %s1728_s30 }
  0x19   : > { %p1735_p1 = scmp.lt.u32.totalorder %s1728_s30, %s2561_s0 }
  0x1a   : > { %p1730_p8 = pneg %p1951_p2 }
  0x1c   : > { %p1731_p9 = pnand %p1730_p8, %p1729_p7 }
  0x1e   : > { %p1732_p10 = pneg %p1731_p9 }
  0x20   : > { %p1737_p4 = pnand %p1735_p1, %p1732_p10 }
  0x22   : > { %1740 = shalt.err (!%p1737_p4)
}
  0x23   : > { %s1741_s7 = scalar_lea.vmem %s110_s25, 512  ;;  %p1749_p11 = scmp.lt.s32.totalorder %s110_s25, %s110_s25 }
  0x24   : > { %p1742_p0 = scmp.ne.s32.totalorder %s110_s25, %s1741_s7  ;;  %p1750_p6 = scmp.lt.s32.totalorder %s1741_s7, %s1741_s7 }
  0x26   : > { %p1744_p3 = pnand %p1742_p0, %p1730_p8  ;;  %p1751_p13 = por %p1750_p6, %p1749_p11 }
  0x28   : > { %p1745_p12 = pneg %p1744_p3 }
  0x2a   : > { %p1752_p5 = pnand %p1751_p13, %p1745_p12 }
  0x2c   : > { %1755 = shalt.err (!%p1752_p5)
}
  0x2d   : > { %s1859_s8 = smov 256   ;;  %s1860_s14 = smov 16  }
  0x2e   : > { %1675 = dma.hbm_to_vmem [thread:$0]  (!%p1951_p2), %s2561_s0, 512, %s110_s25, [#allocation3], %s1859_s8, %s1859_s8, %s1860_s14  }
  0x2f   : > { %p2624_p4 = scmp.ne.s32.totalorder %s2618_s19, 0  ;;  %p2625_p0 = scmp.lt.s32.totalorder %s1856_s12, 2 }
  0x30   : > { %s1234_s28 = sshll.u32 %s123_s27, 8  ;;  %s1235_s29 = sshll.u32 %s1856_s12, 7 }
  0x31   : > { %p1980_p3 = pnand %p2625_p0, %p2624_p4  ;;  %s1988_s26 = scalar_lea.hbm %s2562_s1, %s1235_s29 }
  0x32   : > { %s127_s25 = scalar_lea.vmem [#allocation5], %s1234_s28  ;;  %s1992_s4 = scalar_lea.sflag [#allocation6], %s123_s27 }
  0x33   : > { %s133_s19 = sshll.u32 %s127_s25, 4  ;;  %s1756_s5 = scalar_lea.hbm %s1988_s26, 4096  ;;  %s1990_s19 = int_to_ptr.vmem [resolvable:$true] %s133_s19 }
  0x34   : > { %p1757_p5 = scmp.ne.s32.totalorder %s1988_s26, %s1756_s5  ;;  %p1758_p6 = pneg %p1980_p3 }
  0x35   : > { %s1761_s14 = scalar_lea.hbm %s2562_s1, 8192  ;;  %p1762_p13 = scmp.lt.u32.totalorder %s1988_s26, %s2562_s1 }
  0x36   : > { %p1759_p11 = pnand %p1758_p6, %p1757_p5  ;;  %p1763_p2 = scmp.lt.u32.totalorder %s1761_s14, %s1756_s5 }
  0x37   : > { %p1765_p8 = scmp.lt.u32.totalorder %s1756_s5, %s1988_s26 }
  0x38   : > { %p1760_p12 = pneg %p1759_p11  ;;  %p1764_p7 = por %p1763_p2, %p1762_p13 }
  0x3a   : > { %p1766_p9 = por %p1765_p8, %p1764_p7 }
  0x3c   : > { %p1767_p10 = pnand %p1766_p9, %p1760_p12 }
  0x3e   : > { %1770 = shalt.err (!%p1767_p10)
}
  0x3f   : > { %s1771_s27 = scalar_lea.vmem %s1990_s19, 4096  ;;  %s1861_s28 = smov [#allocation5]  }
  0x40   : > { %p1772_p1 = scmp.ne.s32.totalorder %s1990_s19, %s1771_s27  ;;  %s1776_s29 = sshll.u32 %s1861_s28, 4  ;;  %s1777_s29 = int_to_ptr.vmem [resolvable:$false] %s1776_s29 }
  0x41   : > { %s1778_s30 = scalar_lea.vmem %s1777_s29, 8192  ;;  %p1779_p5 = scmp.lt.s32.totalorder %s1990_s19, %s1777_s29 }
  0x42   : > { %p1774_p4 = pnand %p1772_p1, %p1758_p6  ;;  %p1780_p11 = scmp.lt.s32.totalorder %s1778_s30, %s1771_s27 }
  0x44   : > { %p1775_p0 = pneg %p1774_p4  ;;  %p1781_p13 = por %p1780_p11, %p1779_p5 }
  0x46   : > { %p1782_p2 = pnand %p1781_p13, %p1775_p0 }
  0x48   : > { %1785 = shalt.err (!%p1782_p2)
}
  0x49   : > { %s1862_s3 = smov 128   ;;  %s1863_s25 = smov 8  }
  0x4a   : > { %1679 = dma.hbm_to_vmem [thread:$0]  (!%p1980_p3), %s1988_s26, 4096, %s1990_s19, %s1992_s4, %s1859_s8, %s1862_s3, %s1863_s25  }
  0x4b   : > { %p2627_p6 = scmp.ne.s32.totalorder %s2622_s23, 0 }
  0x4d   : > { %145 = sbr.rel (%p2627_p6) target bundleno = 453 (0x1c5), region = 28 }
  0x54   : > { %p2628_p12 = scmp.eq.s32.totalorder %s1904_s13, 0 }
  0x56   : > { %1831 = dma.done.wait (%p2628_p12), [#allocation3], 512   ;;  %p2629_p7 = pmov %p2628_p12 }
  0x57   : > { %s2028_s5 = sand.u32 1, %s1848_s10   ;;  %p2630_p3 = scmp.ne.s32.totalorder %s2619_s20, 0 }
  0x58   : > { %1833 = vsyncadd (%p2629_p7), [#allocation3], 4294966784  ;;  %s1238_s6 = sshll.u32 %s2028_s5, 8  ;;  %s152_s7 = scalar_lea.sflag [#allocation6], %s2028_s5 }
  0x59   : > { %s2032_s24 = scalar_lea.vmem [#allocation5], %s1238_s6 }
  0x5a   : > { %1835 = dma.done.wait (%p2630_p3), %s152_s7, 4096  }
  0x5b   : > { %1837 = vsyncadd (%p2630_p3), %s152_s7, 4294963200  ;;  %v196_v0 = vld [vmem:[%s2032_s24 + $0x80] sm:$0xff]  ;;  %v197_v1 = vld [vmem:[%s2032_s24 + $0x88] sm:$0xff]  ;;  %s1239_s20 = sshll.u32 %s2028_s5, 4  ;;  %s1241_s26 = sshll.u32 %s1904_s13, 7 }
  0x5c   : > { %v180_v2 = vld [vmem:[%s2032_s24] sm:$0xff]  ;;  %v261_v3 = vand.u32 4294901760, %v196_v0  ;;  %v264_v4 = vand.u32 4294901760, %v197_v1  ;;  %v181_v5 = vld [vmem:[%s2032_s24 + $0x8] sm:$0xff]  ;;  %v198_v7 = vld [vmem:[%s2032_s24 + $0x90] sm:$0xff]  ;;  %s175_s23 = scalar_lea.vmem [#allocation7], %s1239_s20  ;;  %s2517_s14 = scalar_lea.hbm %s2563_s2, %s1241_s26 }
  0x5d   : > { %v213_v6 = vand.u32 4294901760, %v180_v2  ;;  %v199_v8 = vld [vmem:[%s2032_s24 + $0x98] sm:$0xff]  ;;  %v216_v9 = vand.u32 4294901760, %v181_v5  ;;  %v267_v10 = vand.u32 4294901760, %v198_v7  ;;  %v182_v12 = vld [vmem:[%s2032_s24 + $0x10] sm:$0xff]  ;;  %v200_v18 = vld [vmem:[%s2032_s24 + $0xa0] sm:$0xff] }
  0x5e   : > { %v270_v11 = vand.u32 4294901760, %v199_v8  ;;  %v183_v13 = vld [vmem:[%s2032_s24 + $0x18] sm:$0xff]  ;;  %v2046_v14 = vpack.c.bf16 %v264_v4, %v261_v3  ;;  %v219_v16 = vand.u32 4294901760, %v182_v12  ;;  %v201_v19 = vld [vmem:[%s2032_s24 + $0xa8] sm:$0xff]  ;;  %v184_v23 = vld [vmem:[%s2032_s24 + $0x20] sm:$0xff]  ;;  %v273_v29 = vand.u32 4294901760, %v200_v18 }
  0x5f   : > { %v2048_v15 = vsub.f32 %v180_v2, %v213_v6  ;;  %v222_v17 = vand.u32 4294901760, %v183_v13  ;;  %v2052_v20 = vpack.c.bf16 %v216_v9, %v213_v6  ;;  %v2054_v21 = vsub.f32 %v181_v5, %v216_v9  ;;  %v185_v24 = vld [vmem:[%s2032_s24 + $0x28] sm:$0xff]  ;;  %v202_v37 = vld [vmem:[%s2032_s24 + $0xb0] sm:$0xff]  ;;  %v203_v42 = vld [vmem:[%s2032_s24 + $0xb8] sm:$0xff]  ;;  %s1145_s8 = sshll.u32 %s175_s23, 4  ;;  %s1133_s16 = scalar_lea.sflag [#allocation4], %s2028_s5  ;;  %s2512_s8 = int_to_ptr.vmem [resolvable:$true] %s1145_s8 }
  0x60   : > { %v2056_v22 = vpack.c.bf16 %v270_v11, %v267_v10  ;;  %1473 = vmatprep.subr.bf16.mxu0 %v2046_v14  ;;  %v2061_v25 = vsub.f32 %v198_v7, %v267_v10  ;;  %v2063_v26 = vsub.f32 %v199_v8, %v270_v11  ;;  %v2067_v28 = vsub.f32 %v182_v12, %v219_v16  ;;  %v186_v55 = vld [vmem:[%s2032_s24 + $0x30] sm:$0xff]  ;;  %v187_v56 = vld [vmem:[%s2032_s24 + $0x38] sm:$0xff]  ;;  %v204_v5 = vld [vmem:[%s2032_s24 + $0xc0] sm:$0xff]  ;;  %s1786_s17 = scalar_lea.vmem %s2512_s8, 256  ;;  %p2681_p9 = scmp.ne.s32.totalorder %s2620_s21, 0 }
  0x61   : > { %v2065_v27 = vpack.c.bf16 %v222_v17, %v219_v16  ;;  %1475 = vmatpush3.bf16.msra.mxu0 %v2052_v20  ;;  %v276_v30 = vand.u32 4294901760, %v201_v19  ;;  %v2070_v31 = vsub.f32 %v196_v0, %v261_v3  ;;  %v2072_v32 = vsub.f32 %v197_v1, %v264_v4  ;;  %v205_v6 = vld [vmem:[%s2032_s24 + $0xc8] sm:$0xff]  ;;  %v188_v11 = vld [vmem:[%s2032_s24 + $0x40] sm:$0xff]  ;;  %p1787_p8 = scmp.ne.s32.totalorder %s2512_s8, %s1786_s17  ;;  %s1864_s13 = smov [#allocation7]  }
  0x62   : > { %1477 = vmatprep.subr.bf16.mxu0 %v2056_v22  ;;  %v225_v33 = vand.u32 4294901760, %v184_v23  ;;  %v228_v34 = vand.u32 4294901760, %v185_v24  ;;  %v2583_v35 = vand.u32 4294901760, %v2048_v15  ;;  %v2582_v36 = vand.u32 4294901760, %v2054_v21  ;;  %s1790_s27 = sshll.u32 %s1864_s13, 4  ;;  %s1791_s27 = int_to_ptr.vmem [resolvable:$false] %s1790_s27 }
  0x63   : > { %v2078_v38 = vsub.f32 %v183_v13, %v222_v17  ;;  %v2080_v39 = vpack.c.bf16 %v276_v30, %v273_v29  ;;  %v2082_v40 = vsub.f32 %v200_v18, %v273_v29  ;;  %v2587_v41 = vand.u32 4294901760, %v2070_v31  ;;  %v189_v29 = vld [vmem:[%s2032_s24 + $0x48] sm:$0xff]  ;;  %p1788_p10 = pnand %p1787_p8, %p2681_p9  ;;  %s1792_s28 = scalar_lea.vmem %s1791_s27, 512 }
  0x64   : > { %v2086_v43 = vsub.f32 %v201_v19, %v276_v30  ;;  %v2585_v44 = vand.u32 4294901760, %v2072_v32  ;;  %v2089_v45 = vpack.c.bf16 %v228_v34, %v225_v33  ;;  %v2091_v46 = vsub.f32 %v184_v23, %v225_v33  ;;  %p1793_p4 = scmp.lt.s32.totalorder %s2512_s8, %s1791_s27  ;;  %p1794_p0 = scmp.lt.s32.totalorder %s1792_s28, %s1786_s17 }
  0x65   : > { %1479 = vmatpush3.bf16.msra.mxu0 %v2065_v27  ;;  %v455_v47 = vsub.f32 %v2070_v31, %v2587_v41  ;;  %v343_v48 = vsub.f32 %v2048_v15, %v2583_v35  ;;  %v350_v49 = vsub.f32 %v2054_v21, %v2582_v36  ;;  %v279_v50 = vand.u32 4294901760, %v202_v37  ;;  %v177_v41 = vld [vmem:[#allocation2 + $0x8] sm:$0xff]  ;;  %p1789_p1 = pneg %p1788_p10 }
  0x66   : > { %1481 = vmatprep.subr.bf16.mxu0 %v2080_v39  ;;  %v462_v51 = vsub.f32 %v2072_v32, %v2585_v44  ;;  %v282_v52 = vand.u32 4294901760, %v203_v42  ;;  %v2580_v53 = vand.u32 4294901760, %v2061_v25  ;;  %v2579_v54 = vand.u32 4294901760, %v2063_v26  ;;  %p1795_p5 = por %p1794_p0, %p1793_p4 }
  0x67   : > { %v456_v57 = vand.u32 4294901760, %v455_v47  ;;  %v2111_v58 = vsub.f32 %v185_v24, %v228_v34  ;;  %v344_v59 = vand.u32 4294901760, %v343_v48  ;;  %v351_v60 = vand.u32 4294901760, %v350_v49 }
  0x68   : > { %v463_v61 = vand.u32 4294901760, %v462_v51  ;;  %v2113_v62 = vpack.c.bf16 %v282_v52, %v279_v50  ;;  %v2115_v63 = vsub.f32 %v202_v37, %v279_v50  ;;  %v469_v0 = vsub.f32 %v2061_v25, %v2580_v53  ;;  %p1796_p11 = pnand %p1795_p5, %p1789_p1 }
  0x69   : > { %1483 = vmatpush3.bf16.msra.mxu0 %v2089_v45  ;;  %v1506_v1 = vpack.c.bf16 %v351_v60, %v344_v59  ;;  %v476_v2 = vsub.f32 %v2063_v26, %v2579_v54  ;;  %v231_v3 = vand.u32 4294901760, %v186_v55  ;;  %v234_v4 = vand.u32 4294901760, %v187_v56 }
  0x6a   : > { %v1504_v7 = vpack.c.bf16 %v463_v61, %v456_v57  ;;  %1485 = vmatprep.subr.bf16.mxu0 %v2113_v62  ;;  %v470_v8 = vand.u32 4294901760, %v469_v0  ;;  %v2577_v9 = vand.u32 4294901760, %v2067_v28  ;;  %v2576_v10 = vand.u32 4294901760, %v2078_v38  ;;  %v206_v57 = vld [vmem:[%s2032_s24 + $0xd0] sm:$0xff] }
  0x6b   : > { %v2130_v12 = vsub.f32 %v203_v42, %v282_v52  ;;  %v477_v13 = vand.u32 4294901760, %v476_v2  ;;  %v2132_v16 = vpack.c.bf16 %v234_v4, %v231_v3  ;;  %v2134_v17 = vsub.f32 %v186_v55, %v231_v3 }
  0x6c   : > { %1505 = vmatprep.subr.bf16.mxu1 %v1504_v7  ;;  %v357_v18 = vsub.f32 %v2067_v28, %v2577_v9  ;;  %v364_v19 = vsub.f32 %v2078_v38, %v2576_v10  ;;  %v285_v23 = vand.u32 4294901760, %v204_v5  ;;  %v288_v24 = vand.u32 4294901760, %v205_v6  ;;  %v210_v9 = vld [vmem:[%s2032_s24 + $0xf0] sm:$0xff] }
  0x6d   : > { %1507 = vmatpush3.bf16.msra.mxu1 %v1506_v1  ;;  %v1508_v30 = vpack.c.bf16 %v477_v13, %v470_v8  ;;  %1487 = vmatpush3.bf16.msra.mxu0 %v2132_v16  ;;  %v2574_v33 = vand.u32 4294901760, %v2082_v40  ;;  %v2573_v34 = vand.u32 4294901760, %v2086_v43  ;;  %v237_v37 = vand.u32 4294901760, %v188_v11  ;;  %v190_v1 = vld [vmem:[%s2032_s24 + $0x50] sm:$0xff] }
  0x6e   : > { %v2146_v42 = vsub.f32 %v187_v56, %v234_v4  ;;  %v358_v47 = vand.u32 4294901760, %v357_v18  ;;  %v365_v48 = vand.u32 4294901760, %v364_v19  ;;  %v2148_v49 = vpack.c.bf16 %v288_v24, %v285_v23  ;;  %v207_v56 = vld [vmem:[%s2032_s24 + $0xd8] sm:$0xff] }
  0x6f   : > { %1509 = vmatprep.subr.bf16.mxu1 %v1508_v30  ;;  %v2150_v50 = vsub.f32 %v204_v5, %v285_v23  ;;  %v483_v51 = vsub.f32 %v2082_v40, %v2574_v33  ;;  %v490_v52 = vsub.f32 %v2086_v43, %v2573_v34  ;;  %v240_v55 = vand.u32 4294901760, %v189_v29  ;;  %v191_v18 = vld [vmem:[%s2032_s24 + $0x58] sm:$0xff] }
  0x70   : > { %v1510_v59 = vpack.c.bf16 %v365_v48, %v358_v47  ;;  %1489 = vmatprep.subr.bf16.mxu0 %v2148_v49  ;;  %v2161_v60 = vsub.f32 %v205_v6, %v288_v24  ;;  %v2570_v61 = vand.u32 4294901760, %v2091_v46  ;;  %v2569_v0 = vand.u32 4294901760, %v2111_v58 }
  0x71   : > { %v484_v2 = vand.u32 4294901760, %v483_v51  ;;  %v491_v3 = vand.u32 4294901760, %v490_v52  ;;  %v2166_v4 = vpack.c.bf16 %v240_v55, %v237_v37  ;;  %v2168_v5 = vsub.f32 %v188_v11, %v237_v37 }
  0x72   : > { %1511 = vmatpush3.bf16.msra.mxu1 %v1510_v59  ;;  %v371_v7 = vsub.f32 %v2091_v46, %v2570_v61  ;;  %v378_v6 = vsub.f32 %v2111_v58, %v2569_v0  ;;  %v291_v8 = vand.u32 4294901760, %v206_v57  ;;  %v294_v13 = vand.u32 4294901760, %v207_v56 }
  0x73   : > { %v1512_v19 = vpack.c.bf16 %v491_v3, %v484_v2  ;;  %1491 = vmatpush3.bf16.msra.mxu0 %v2166_v4  ;;  %v2568_v11 = vand.u32 4294901760, %v2115_v63  ;;  %v2571_v23 = vand.u32 4294901760, %v2130_v12  ;;  %v243_v24 = vand.u32 4294901760, %v190_v1  ;;  %v208_v3 = vld [vmem:[%s2032_s24 + $0xe0] sm:$0xff] }
  0x74   : > { %v2180_v30 = vsub.f32 %v189_v29, %v240_v55  ;;  %v372_v37 = vand.u32 4294901760, %v371_v7  ;;  %v379_v47 = vand.u32 4294901760, %v378_v6  ;;  %v2182_v48 = vpack.c.bf16 %v294_v13, %v291_v8  ;;  %v209_v29 = vld [vmem:[%s2032_s24 + $0xe8] sm:$0xff] }
  0x75   : > { %1513 = vmatprep.subr.bf16.mxu1 %v1512_v19  ;;  %v2184_v51 = vsub.f32 %v206_v57, %v291_v8  ;;  %v497_v52 = vsub.f32 %v2115_v63, %v2568_v11  ;;  %v504_v59 = vsub.f32 %v2130_v12, %v2571_v23  ;;  %v246_v2 = vand.u32 4294901760, %v191_v18  ;;  %v192_v8 = vld [vmem:[%s2032_s24 + $0x60] sm:$0xff]  ;;  %v193_v23 = vld [vmem:[%s2032_s24 + $0x68] sm:$0xff] }
  0x76   : > { %2631 = vst [vmem:[#allocation11_spill] sm:$0xff] %v2182_v48  ;;  %v1514_v55 = vpack.c.bf16 %v379_v47, %v372_v37  ;;  %1493 = vmatprep.subr.bf16.mxu0 %v2182_v48  ;;  %v2195_v7 = vsub.f32 %v207_v56, %v294_v13  ;;  %v2572_v57 = vand.u32 4294901760, %v2134_v17  ;;  %v2575_v6 = vand.u32 4294901760, %v2146_v42 }
  0x77   : > { %v498_v19 = vand.u32 4294901760, %v497_v52  ;;  %v505_v11 = vand.u32 4294901760, %v504_v59  ;;  %v2200_v0 = vpack.c.bf16 %v246_v2, %v243_v24  ;;  %v2202_v61 = vsub.f32 %v190_v1, %v243_v24 }
  0x78   : > { %1515 = vmatpush3.bf16.msra.mxu1 %v1514_v55  ;;  %v385_v37 = vsub.f32 %v2134_v17, %v2572_v57  ;;  %v392_v56 = vsub.f32 %v2146_v42, %v2575_v6  ;;  %v297_v13 = vand.u32 4294901760, %v208_v3  ;;  %v300_v47 = vand.u32 4294901760, %v209_v29 }
  0x79   : > { %2632 = vst [vmem:[#allocation12_spill] sm:$0xff] %v2200_v0  ;;  %v1516_v52 = vpack.c.bf16 %v505_v11, %v498_v19  ;;  %1495 = vmatpush3.bf16.msra.mxu0 %v2200_v0  ;;  %v2578_v1 = vand.u32 4294901760, %v2150_v50  ;;  %v2581_v24 = vand.u32 4294901760, %v2161_v60  ;;  %v249_v59 = vand.u32 4294901760, %v192_v8  ;;  %v179_v0 = vld [vmem:[#allocation2 + $0x18] sm:$0xff] }
  0x7a   : > { %v2214_v55 = vsub.f32 %v191_v18, %v246_v2  ;;  %v386_v57 = vand.u32 4294901760, %v385_v37  ;;  %v393_v34 = vand.u32 4294901760, %v392_v56  ;;  %v2216_v33 = vpack.c.bf16 %v300_v47, %v297_v13  ;;  %v211_v18 = vld [vmem:[%s2032_s24 + $0xf8] sm:$0xff] }
  0x7b   : > { %1517 = vmatprep.subr.bf16.mxu1 %v1516_v52  ;;  %v2218_v6 = vsub.f32 %v208_v3, %v297_v13  ;;  %v511_v11 = vsub.f32 %v2150_v50, %v2578_v1  ;;  %v518_v19 = vsub.f32 %v2161_v60, %v2581_v24  ;;  %v252_v10 = vand.u32 4294901760, %v193_v23  ;;  %v194_v13 = vld [vmem:[%s2032_s24 + $0x70] sm:$0xff]  ;;  %v195_v24 = vld [vmem:[%s2032_s24 + $0x78] sm:$0xff] }
  0x7c   : > { %2633 = vst [vmem:[#allocation13_spill] sm:$0xff] %v2216_v33  ;;  %v1518_v2 = vpack.c.bf16 %v393_v34, %v386_v57  ;;  %1497 = vmatprep.subr.bf16.mxu0 %v2216_v33  ;;  %v2229_v37 = vsub.f32 %v209_v29, %v300_v47  ;;  %v2584_v3 = vand.u32 4294901760, %v2168_v5  ;;  %v2586_v56 = vand.u32 4294901760, %v2180_v30 }
  0x7d   : > { %v512_v52 = vand.u32 4294901760, %v511_v11  ;;  %v519_v1 = vand.u32 4294901760, %v518_v19  ;;  %v2234_v54 = vpack.c.bf16 %v252_v10, %v249_v59  ;;  %v2236_v53 = vsub.f32 %v192_v8, %v249_v59 }
  0x7e   : > { %1519 = vmatpush3.bf16.msra.mxu1 %v1518_v2  ;;  %v399_v34 = vsub.f32 %v2168_v5, %v2584_v3  ;;  %v406_v29 = vsub.f32 %v2180_v30, %v2586_v56  ;;  %v303_v57 = vand.u32 4294901760, %v210_v9  ;;  %v306_v47 = vand.u32 4294901760, %v211_v18 }
  0x7f   : > { %2634 = vst [vmem:[#allocation14_spill] sm:$0xff] %v2234_v54  ;;  %v1520_v36 = vpack.c.bf16 %v519_v1, %v512_v52  ;;  %1499 = vmatpush3.bf16.msra.mxu0 %v2234_v54  ;;  %v2590_v11 = vand.u32 4294901760, %v2184_v51  ;;  %v2591_v8 = vand.u32 4294901760, %v2195_v7  ;;  %v255_v59 = vand.u32 4294901760, %v194_v13 }
  0x80   : > { %v2248_v19 = vsub.f32 %v193_v23, %v252_v10  ;;  %v400_v2 = vand.u32 4294901760, %v399_v34  ;;  %v407_v35 = vand.u32 4294901760, %v406_v29  ;;  %v2250_v3 = vpack.c.bf16 %v306_v47, %v303_v57 }
  0x81   : > { %1521 = vmatprep.subr.bf16.mxu1 %v1520_v36  ;;  %v2252_v44 = vsub.f32 %v210_v9, %v303_v57  ;;  %v525_v1 = vsub.f32 %v2184_v51, %v2590_v11  ;;  %v532_v52 = vsub.f32 %v2195_v7, %v2591_v8  ;;  %v258_v56 = vand.u32 4294901760, %v195_v24  ;;  %v176_v9 = vld [vmem:[#allocation2] sm:$0xff] }
  0x82   : > { %2635 = vst [vmem:[#allocation15_spill] sm:$0xff] %v2250_v3  ;;  %v1522_v54 = vpack.c.bf16 %v407_v35, %v400_v2  ;;  %1501 = vmatprep.subr.bf16.mxu0 %v2250_v3  ;;  %v2261_v10 = vsub.f32 %v211_v18, %v306_v47  ;;  %v2592_v23 = vand.u32 4294901760, %v2202_v61  ;;  %v2593_v36 = vand.u32 4294901760, %v2214_v55 }
  0x83   : > { %v526_v34 = vand.u32 4294901760, %v525_v1  ;;  %v533_v29 = vand.u32 4294901760, %v532_v52  ;;  %v2265_v57 = vpack.c.bf16 %v258_v56, %v255_v59  ;;  %v2267_v11 = vsub.f32 %v194_v13, %v255_v59 }
  0x84   : > { %1523 = vmatpush3.bf16.msra.mxu1 %v1522_v54  ;;  %v413_v35 = vsub.f32 %v2202_v61, %v2592_v23  ;;  %v420_v18 = vsub.f32 %v2214_v55, %v2593_v36  ;;  %v2275_v47 = vand.u32 4294901760, %v177_v41  ;;  %v2596_v2 = vand.u32 4294901760, %v2218_v6 }
  0x85   : > { %2636 = vst [vmem:[#allocation16_spill] sm:$0xff] %v2265_v57  ;;  %v1524_v8 = vpack.c.bf16 %v533_v29, %v526_v34  ;;  %1503 = vmatpush3.bf16.msra.mxu0 %v2265_v57  ;;  %v2602_v1 = vand.u32 4294901760, %v2229_v37  ;;  %v1536_v54 = vpack.c.bf16 %v2072_v32, %v2070_v31  ;;  %v2282_v13 = vand.u32 4294901760, %v176_v9 }
  0x86   : > { %2637 = vst [vmem:[#allocation17_spill] sm:$0xff] %v2275_v47  ;;  %v414_v59 = vand.u32 4294901760, %v413_v35  ;;  %v421_v52 = vand.u32 4294901760, %v420_v18  ;;  %v2285_v23 = vsub.f32 %v177_v41, %v2275_v47  ;;  %v539_v36 = vsub.f32 %v2218_v6, %v2596_v2  ;;  %564 = vmatprep.mubr.f32.mxu1 %v2275_v47 }
  0x87   : > { %1525 = vmatprep.subr.bf16.mxu1 %v1524_v8  ;;  %v546_v34 = vsub.f32 %v2229_v37, %v2602_v1  ;;  %1537 = vmatprep.subr.bf16.mxu0 %v1536_v54  ;;  %v2295_v29 = vsub.f32 %v176_v9, %v2282_v13  ;;  %v2601_v35 = vand.u32 4294901760, %v2236_v53  ;;  %v2603_v41 = vand.u32 4294901760, %v2248_v19 }
  0x88   : > { %v2299_v18 = vsub.f32 %v195_v24, %v258_v56  ;;  %v1526_v57 = vpack.c.bf16 %v421_v52, %v414_v59  ;;  %v2604_v2 = vand.u32 4294901760, %v2285_v23  ;;  %v540_v3 = vand.u32 4294901760, %v539_v36 }
  0x89   : > { %2638 = vst [vmem:[#allocation18_spill] sm:$0xff] %v2295_v29  ;;  %v547_v47 = vand.u32 4294901760, %v546_v34  ;;  %v2609_v8 = vand.u32 4294901760, %v2295_v29  ;;  %v427_v54 = vsub.f32 %v2236_v53, %v2601_v35  ;;  %v434_v9 = vsub.f32 %v2248_v19, %v2603_v41 }
  0x8a   : > { %1527 = vmatpush3.bf16.msra.mxu1 %v1526_v57  ;;  %v311_v24 = vsub.f32 %v2285_v23, %v2604_v2  ;;  %v1538_v56 = vpack.c.bf16 %v2054_v21, %v2048_v15  ;;  %v2610_v36 = vand.u32 4294901760, %v2252_v44  ;;  %v2611_v59 = vand.u32 4294901760, %v2261_v10 }
  0x8b   : > { %v1528_v52 = vpack.c.bf16 %v547_v47, %v540_v3  ;;  %v317_v34 = vsub.f32 %v2295_v29, %v2609_v8  ;;  %v428_v35 = vand.u32 4294901760, %v427_v54  ;;  %v435_v1 = vand.u32 4294901760, %v434_v9 }
  0x8c   : > { %v312_v41 = vand.u32 4294901760, %v311_v24  ;;  %v553_v57 = vsub.f32 %v2252_v44, %v2610_v36  ;;  %v560_v2 = vsub.f32 %v2261_v10, %v2611_v59  ;;  %v2613_v33 = vand.u32 4294901760, %v2267_v11 }
  0x8d   : > { %1529 = vmatprep.subr.bf16.mxu1 %v1528_v52  ;;  %v318_v3 = vand.u32 4294901760, %v317_v34  ;;  %v1530_v47 = vpack.c.bf16 %v435_v1, %v428_v35  ;;  %v1540_v8 = vpack.c.bf16 %v2063_v26, %v2061_v25  ;;  %v2612_v54 = vand.u32 4294901760, %v2299_v18  ;;  %v178_v1 = vld [vmem:[#allocation2 + $0x10] sm:$0xff] }
  0x8e   : > { %313 = vmatprep.mubr.f32.mxu0 %v312_v41  ;;  %v554_v9 = vand.u32 4294901760, %v553_v57  ;;  %v561_v24 = vand.u32 4294901760, %v560_v2  ;;  %v441_v36 = vsub.f32 %v2267_v11, %v2613_v33  ;;  %v2335_v34 = vand.u32 4294901760, %v179_v0 }
  0x8f   : > { %319 = vmatmul.mubr.f32.vlgmr.msra.gmra.mrb[0].mxu0 %v318_v3  ;;  %1531 = vmatpush3.bf16.msra.mxu1 %v1530_v47  ;;  %v448_v52 = vsub.f32 %v2299_v18, %v2612_v54  ;;  %v1542_v41 = vpack.c.bf16 %v2078_v38, %v2067_v28  ;;  %v1544_v57 = vpack.c.bf16 %v2086_v43, %v2082_v40  ;;  %v2344_v47 = vand.u32 4294901760, %v178_v1 }
  0x90   : > { %1539 = vmatpush3.bf16.msra.mxu0 %v1538_v56  ;;  %v1532_v35 = vpack.c.bf16 %v561_v24, %v554_v9  ;;  %v442_v59 = vand.u32 4294901760, %v441_v36  ;;  %v2342_v3 = vsub.f32 %v179_v0, %v2335_v34  ;;  %v1546_v56 = vpack.c.bf16 %v2111_v58, %v2091_v46 }
  0x91   : > { %1541 = vmatprep.subr.bf16.mxu0 %v1540_v8  ;;  %v449_v2 = vand.u32 4294901760, %v448_v52  ;;  %v1548_v36 = vpack.c.bf16 %v2130_v12, %v2115_v63  ;;  %v2639_v9 = vand.u32 4294901760, %v2070_v31  ;;  %v2640_v8 = vand.u32 4294901760, %v2072_v32 }
  0x92   : > { %1533 = vmatprep.subr.bf16.mxu1 %v1532_v35  ;;  %v325_v52 = vand.u32 4294901760, %v2342_v3  ;;  %v2356_v0 = vsub.f32 %v178_v1, %v2344_v47  ;;  %v2641_v35 = vand.u32 4294901760, %v2048_v15  ;;  %v2643_v33 = vand.u32 4294901760, %v2061_v25 }
  0x93   : > { %v1534_v54 = vpack.c.bf16 %v449_v2, %v442_v59  ;;  %v1600_v24 = vpack.c.bf16 %v2640_v8, %v2639_v9  ;;  %v2642_v59 = vand.u32 4294901760, %v2054_v21  ;;  %v2644_v29 = vand.u32 4294901760, %v2063_v26 }
  0x94   : > { %1543 = vmatpush3.bf16.msra.mxu0 %v1542_v41  ;;  %v2645_v31 = vand.u32 4294901760, %v2067_v28  ;;  %v2646_v32 = vand.u32 4294901760, %v2078_v38  ;;  %v2647_v1 = vand.u32 4294901760, %v2082_v40  ;;  %v2648_v9 = vand.u32 4294901760, %v2086_v43 }
  0x95   : > { %v1602_v2 = vpack.c.bf16 %v2642_v59, %v2641_v35  ;;  %v1604_v48 = vpack.c.bf16 %v2644_v29, %v2643_v33  ;;  %1535 = vmatpush3.bf16.msra.mxu1 %v1534_v54  ;;  %1545 = vmatprep.subr.bf16.mxu0 %v1544_v57  ;;  %v2649_v21 = vand.u32 4294901760, %v2091_v46  ;;  %v2650_v8 = vand.u32 4294901760, %v2111_v58 }
  0x96   : > { %v1606_v41 = vpack.c.bf16 %v2646_v32, %v2645_v31  ;;  %v1608_v15 = vpack.c.bf16 %v2648_v9, %v2647_v1  ;;  %1569 = vmatprep.subr.bf16.mxu1 %v2046_v14  ;;  %v326_v26 = vsub.f32 %v2342_v3, %v325_v52  ;;  %v331_v28 = vand.u32 4294901760, %v2356_v0 }
  0x97   : > { %v2378_v25 = vpack.c.bf16 %v2650_v8, %v2649_v21  ;;  %v2651_v38 = vand.u32 4294901760, %v2115_v63  ;;  %v2652_v40 = vand.u32 4294901760, %v2130_v12  ;;  %v2653_v33 = vand.u32 4294901760, %v2134_v17  ;;  %v2661_v21 = vld [vmem:[#allocation12_spill] sm:$0xff]  ;;  %v2662_v8 = vld [vmem:[#allocation13_spill] sm:$0xff] }
  0x98   : > { %v2654_v46 = vand.u32 4294901760, %v2146_v42  ;;  %v2655_v29 = vand.u32 4294901760, %v2150_v50  ;;  %v2656_v54 = vand.u32 4294901760, %v2161_v60  ;;  %v2657_v35 = vand.u32 4294901760, %v2168_v5  ;;  %566 = vmatmul.mubr.f32.vlgmr.msra.gmra.mrb[0].mxu1 %v2282_v13  ;;  %1547 = vmatpush3.bf16.msra.mxu0 %v1546_v56 }
  0x99   : > { %v1612_v43 = vpack.c.bf16 %v2652_v40, %v2651_v38  ;;  %v2658_v59 = vand.u32 4294901760, %v2180_v30  ;;  %v1550_v12 = vpack.c.bf16 %v2146_v42, %v2134_v17  ;;  %v327_v31 = vand.u32 4294901760, %v326_v26  ;;  %1571 = vmatpush3.bf16.msra.mxu1 %v2052_v20  ;;  %1549 = vmatprep.subr.bf16.mxu0 %v1548_v36  ;;  %v2660_v36 = vld [vmem:[#allocation11_spill] sm:$0xff]  ;;  %v2663_v26 = vld [vmem:[#allocation18_spill] sm:$0xff] }
  0x9a   : > { %v2393_v58 = vpack.c.bf16 %v2654_v46, %v2653_v33  ;;  %v2399_v57 = vpack.c.bf16 %v2656_v54, %v2655_v29  ;;  %v332_v32 = vsub.f32 %v2356_v0, %v331_v28  ;;  %v1552_v1 = vpack.c.bf16 %v2161_v60, %v2150_v50  ;;  %1573 = vmatprep.subr.bf16.mxu1 %v2056_v22  ;;  %v2664_v38 = vld [vmem:[#allocation14_spill] sm:$0xff]  ;;  %v2665_v40 = vld [vmem:[#allocation15_spill] sm:$0xff]  ;;  %v2666_v33 = vld [vmem:[#allocation17_spill] sm:$0xff] }
  0x9b   : > { %v2405_v63 = vpack.c.bf16 %v2658_v59, %v2657_v35  ;;  %328 = vmatprep.mubr.f32.mxu0 %v327_v31  ;;  %571 = vmatprep.mubr.f32.mxu1 %v2335_v34  ;;  %v1554_v17 = vpack.c.bf16 %v2180_v30, %v2168_v5  ;;  %v1556_v42 = vpack.c.bf16 %v2195_v7, %v2184_v51  ;;  %v2659_v50 = vand.u32 4294901760, %v2285_v23  ;;  %v2667_v46 = vld [vmem:[#allocation16_spill] sm:$0xff] }
  0x9c   : > { %v333_v9 = vand.u32 4294901760, %v332_v32  ;;  %1551 = vmatpush3.bf16.msra.mxu0 %v1550_v12  ;;  %573 = vmatmul.mubr.f32.gmra.mrb[2].mxu1 %v2344_v47  ;;  %v1558_v60 = vpack.c.bf16 %v2214_v55, %v2202_v61  ;;  %v1560_v5 = vpack.c.bf16 %v2229_v37, %v2218_v6  ;;  %v1562_v30 = vpack.c.bf16 %v2248_v19, %v2236_v53 }
  0x9d   : > { %1575 = vmatpush3.bf16.msra.mxu1 %v2065_v27  ;;  %1553 = vmatprep.subr.bf16.mxu0 %v1552_v1  ;;  %v1566_v56 = vpack.c.bf16 %v2299_v18, %v2267_v11 }
  0x9e   : > { %1577 = vmatprep.subr.bf16.mxu1 %v2080_v39  ;;  %334 = vmatmul.mubr.f32.gmra.mrb[2].mxu0 %v333_v9 }
  0x9f   : > { %708 = vmatprep.mubr.f32.mxu0 %v2285_v23  ;;  %824 = vmatprep.mubr.f32.mxu1 %v2659_v50  ;;  %v1564_v23 = vpack.c.bf16 %v2261_v10, %v2252_v44 }
  0xa0   : > { %1555 = vmatpush3.bf16.msra.mxu0 %v1554_v17 }
  0xa1   : > { %1579 = vmatpush3.bf16.msra.mxu1 %v2089_v45  ;;  %1557 = vmatprep.subr.bf16.mxu0 %v1556_v42 }
  0xa2   : > { %1581 = vmatprep.subr.bf16.mxu1 %v2113_v62 }
  0xa4   : > { %1559 = vmatpush3.bf16.msra.mxu0 %v1558_v60 }
  0xa5   : > { %1583 = vmatpush3.bf16.msra.mxu1 %v2132_v16  ;;  %1561 = vmatprep.subr.bf16.mxu0 %v1560_v5 }
  0xa6   : > { %1585 = vmatprep.subr.bf16.mxu1 %v2148_v49 }
  0xa8   : > { %1563 = vmatpush3.bf16.msra.mxu0 %v1562_v30 }
  0xa9   : > { %1587 = vmatpush3.bf16.msra.mxu1 %v2166_v4  ;;  %1565 = vmatprep.subr.bf16.mxu0 %v1564_v23 }
  0xaa   : > { %1589 = vmatprep.subr.bf16.mxu1 %v2660_v36 }
  0xac   : > { %1567 = vmatpush3.bf16.msra.mxu0 %v1566_v56 }
  0xad   : > { %1591 = vmatpush3.bf16.msra.mxu1 %v2661_v21  ;;  %1601 = vmatprep.subr.bf16.mxu0 %v1600_v24  ;;  %v2668_v24 = vand.u32 4294901760, %v2663_v26 }
  0xae   : > { %1593 = vmatprep.subr.bf16.mxu1 %v2662_v8 }
  0xaf   : > { %711 = vmatmul.mubr.f32.vlgmr.msra.gmra.mrb[4].mxu0 %v2663_v26 }
  0xb0   : > { %1603 = vmatpush3.bf16.msra.mxu0 %v1602_v2  ;;  %717 = vmatprep.mubr.f32.mxu0 %v2342_v3  ;;  %v2672_v3 = vand.u32 4294901760, %v2214_v55 }
  0xb1   : > { %1595 = vmatpush3.bf16.msra.mxu1 %v2664_v38  ;;  %1605 = vmatprep.subr.bf16.mxu0 %v1604_v48  ;;  %v2670_v48 = vand.u32 4294901760, %v2195_v7 }
  0xb2   : > { %1597 = vmatprep.subr.bf16.mxu1 %v2665_v40 }
  0xb3   : > { %720 = vmatmul.mubr.f32.gmra.mrb[6].mxu0 %v2356_v0  ;;  %v2676_v0 = vand.u32 4294901760, %v2248_v19 }
  0xb4   : > { %1607 = vmatpush3.bf16.msra.mxu0 %v1606_v41  ;;  %1005 = vmatprep.mubr.f32.mxu0 %v2666_v33 }
  0xb5   : > { %1599 = vmatpush3.bf16.msra.mxu1 %v2667_v46  ;;  %1609 = vmatprep.subr.bf16.mxu0 %v1608_v15 }
  0xb6   : > { %1633 = vmatprep.subr.bf16.mxu1 %v2046_v14  ;;  %v2669_v14 = vand.u32 4294901760, %v2184_v51  ;;  %v2674_v51 = vand.u32 4294901760, %v2229_v37 }
  0xb8   : > { %828 = vmatmul.mubr.f32.vlgmr.msra.gmra.mrb[4].mxu1 %v2668_v24  ;;  %1611 = vmatpush3.bf16.msra.mxu0 %v2378_v25 }
  0xb9   : > { %1635 = vmatpush3.bf16.msra.mxu1 %v2052_v20  ;;  %835 = vmatprep.mubr.f32.mxu1 %v325_v52  ;;  %v1620_v20 = vpack.c.bf16 %v2670_v48, %v2669_v14 }
  0xba   : > { %1613 = vmatprep.subr.bf16.mxu0 %v1612_v43  ;;  %1637 = vmatprep.subr.bf16.mxu1 %v2056_v22  ;;  %v2671_v22 = vand.u32 4294901760, %v2202_v61  ;;  %v2677_v61 = vand.u32 4294901760, %v2252_v44 }
  0xbc   : > { %839 = vmatmul.mubr.f32.gmra.mrb[6].mxu1 %v331_v28  ;;  %1615 = vmatpush3.bf16.msra.mxu0 %v2393_v58  ;;  %v1622_v52 = vpack.c.bf16 %v2672_v3, %v2671_v22 }
  0xbd   : > { %1639 = vmatpush3.bf16.msra.mxu1 %v2065_v27  ;;  %1617 = vmatprep.subr.bf16.mxu0 %v2399_v57  ;;  %v2673_v27 = vand.u32 4294901760, %v2218_v6  ;;  %v2679_v6 = vand.u32 4294901760, %v2267_v11 }
  0xbe   : > { %1641 = vmatprep.subr.bf16.mxu1 %v2080_v39  ;;  %1116 = vmatprep.mubr.f32.mxu1 %v2666_v33  ;;  %v2675_v39 = vand.u32 4294901760, %v2236_v53 }
  0xbf   : > { %v1624_v7 = vpack.c.bf16 %v2674_v51, %v2673_v27 }
  0xc0   : > { %1619 = vmatpush3.bf16.msra.mxu0 %v2405_v63  ;;  %v1626_v2 = vpack.c.bf16 %v2676_v0, %v2675_v39 }
  0xc1   : > { %1643 = vmatpush3.bf16.msra.mxu1 %v2089_v45  ;;  %1621 = vmatprep.subr.bf16.mxu0 %v1620_v20  ;;  %v2678_v45 = vand.u32 4294901760, %v2261_v10 }
  0xc2   : > { %1645 = vmatprep.subr.bf16.mxu1 %v2113_v62  ;;  %v2680_v62 = vand.u32 4294901760, %v2299_v18 }
  0xc3   : > { %v1628_v55 = vpack.c.bf16 %v2678_v45, %v2677_v61 }
  0xc4   : > { %1623 = vmatpush3.bf16.msra.mxu0 %v1622_v52  ;;  %v1630_v37 = vpack.c.bf16 %v2680_v62, %v2679_v6 }
  0xc5   : > { %1647 = vmatpush3.bf16.msra.mxu1 %v2132_v16  ;;  %1625 = vmatprep.subr.bf16.mxu0 %v1624_v7 }
  0xc6   : > { %1649 = vmatprep.subr.bf16.mxu1 %v2148_v49 }
  0xc8   : > { %1627 = vmatpush3.bf16.msra.mxu0 %v1626_v2 }
  0xc9   : > { %1651 = vmatpush3.bf16.msra.mxu1 %v2166_v4  ;;  %1629 = vmatprep.subr.bf16.mxu0 %v1628_v55 }
  0xca   : > { %1653 = vmatprep.subr.bf16.mxu1 %v2660_v36 }
  0xcc   : > { %1631 = vmatpush3.bf16.msra.mxu0 %v1630_v37 }
  0xcd   : > { %1655 = vmatpush3.bf16.msra.mxu1 %v2661_v21 }
  0xce   : > { %1657 = vmatprep.subr.bf16.mxu1 %v2662_v8 }
  0xcf   : > { %1007 = vmatmul.mubr.f32.vlgmr.msra.gmra.mrb[8].mxu0 %v2282_v13 }
  0xd0   : > { %1012 = vmatprep.mubr.f32.mxu0 %v2335_v34 }
  0xd1   : > { %1659 = vmatpush3.bf16.msra.mxu1 %v2664_v38 }
  0xd2   : > { %1661 = vmatprep.subr.bf16.mxu1 %v2665_v40 }
  0xd3   : > { %1014 = vmatmul.mubr.f32.gmra.mrb[10].mxu0 %v2344_v47 }
  0xd5   : > { %1663 = vmatpush3.bf16.msra.mxu1 %v2667_v46 }
  0xd8   : > { %1118 = vmatmul.mubr.f32.vlgmr.msra.gmra.mrb[8].mxu1 %v2282_v13 }
  0xd9   : > { %1123 = vmatprep.mubr.f32.mxu1 %v2335_v34 }
  0xdc   : > { %1125 = vmatmul.mubr.f32.gmra.mrb[10].mxu1 %v2344_v47 }
 0x162   : > { %v1276_v44 = vpop.f32.mrb[0].mxu0 }
 0x163   : > { %v1277_v53 = vpop.f32.mrb[1].mxu0 }
 0x164   : > { %v1278_v16 = vadd.f32 %v1277_v53, %v1276_v44 }
 0x16b   : > { %v1314_v49 = vpop.f32.mrb[0].mxu1 }
 0x16c   : > { %v1315_v4 = vpop.f32.mrb[1].mxu1 }
 0x16d   : > { %v1316_v11 = vadd.f32 %v1315_v4, %v1314_v49 }
 0x16f   : > { %v568_v19 = vadd.f32 %v1316_v11, %v1278_v16  ;;  %v1317_v10 = vpop.f32.mrb[2].mxu1 }
 0x170   : > { %v1318_v18 = vpop.f32.mrb[3].mxu1 }
 0x171   : > { %v1279_v41 = vpop.f32.mrb[2].mxu0  ;;  %v1319_v15 = vadd.f32 %v1318_v18, %v1317_v10 }
 0x172   : > { %v1280_v25 = vpop.f32.mrb[3].mxu0 }
 0x173   : > { %v1281_v28 = vadd.f32 %v1280_v25, %v1279_v41 }
 0x175   : > { %v575_v43 = vadd.f32 %v1319_v15, %v1281_v28 }
 0x182   : > { %v1352_v58 = vpop.f32.mrb[4].mxu0 }
 0x183   : > { %v1353_v13 = vpop.f32.mrb[5].mxu0 }
 0x184   : > { %v1354_v29 = vadd.f32 %v1353_v13, %v1352_v58 }
 0x186   : > { %v713_v34 = vadd.f32 %v1354_v29, %v568_v19  ;;  %v1355_v54 = vpop.f32.mrb[6].mxu0 }
 0x187   : > { %v1356_v47 = vpop.f32.mrb[7].mxu0 }
 0x188   : > { %v1357_v57 = vadd.f32 %v1356_v47, %v1355_v54 }
 0x18a   : > { %v722_v35 = vadd.f32 %v1357_v57, %v575_v43 }
 0x18b   : > { %v1390_v59 = vpop.f32.mrb[4].mxu1 }
 0x18c   : > { %v1391_v63 = vpop.f32.mrb[5].mxu1 }
 0x18d   : > { %v1392_v12 = vadd.f32 %v1391_v63, %v1390_v59 }
 0x18f   : > { %v830_v31 = vadd.f32 %v1392_v12, %v713_v34  ;;  %v1393_v32 = vpop.f32.mrb[6].mxu1 }
 0x190   : > { %v1394_v1 = vpop.f32.mrb[7].mxu1 }
 0x191   : > { %v1395_v9 = vadd.f32 %v1394_v1, %v1393_v32 }
 0x193   : > { %v841_v17 = vadd.f32 %v1395_v9, %v722_v35 }
 0x1a2   : > { %v1428_v42 = vpop.f32.mrb[8].mxu0 }
 0x1a3   : > { %v1429_v50 = vpop.f32.mrb[9].mxu0 }
 0x1a4   : > { %v1430_v60 = vadd.f32 %v1429_v50, %v1428_v42 }
 0x1a6   : > { %v1009_v5 = vadd.f32 %v1430_v60, %v830_v31  ;;  %v1431_v30 = vpop.f32.mrb[10].mxu0 }
 0x1a7   : > { %v1432_v23 = vpop.f32.mrb[11].mxu0 }
 0x1a8   : > { %v1433_v56 = vadd.f32 %v1432_v23, %v1431_v30 }
 0x1aa   : > { %v1016_v36 = vadd.f32 %v1433_v56, %v841_v17 }
 0x1ab   : > { %v1466_v21 = vpop.f32.mrb[8].mxu1 }
 0x1ac   : > { %v1467_v8 = vpop.f32.mrb[9].mxu1 }
 0x1ad   : > { %v1468_v26 = vadd.f32 %v1467_v8, %v1466_v21 }
 0x1af   : > { %v1120_v38 = vadd.f32 %v1468_v26, %v1009_v5  ;;  %v1469_v40 = vpop.f32.mrb[10].mxu1 }
 0x1b0   : > { %v1470_v33 = vpop.f32.mrb[11].mxu1 }
 0x1b1   : > { %1130 = vst [vmem:[%s175_s23] sm:$0xff] %v1120_v38  ;;  %v1471_v46 = vadd.f32 %v1470_v33, %v1469_v40 }
 0x1b3   : > { %v1127_v24 = vadd.f32 %v1471_v46, %v1016_v36 }
 0x1b5   : > { %1131 = vst [vmem:[%s175_s23 + $0x8] sm:$0xff] %v1127_v24 }
 0x1b6   : > { %1799 = shalt.err (!%p1796_p11)
}
 0x1b7   : > { %s1800_s29 = scalar_lea.hbm %s2517_s14, 256  ;;  %s1804_s25 = scalar_lea.hbm %s2563_s2, 512 }
 0x1b8   : > { %p1801_p13 = scmp.ne.s32.totalorder %s2517_s14, %s1800_s29  ;;  %p1805_p12 = scmp.lt.u32.totalorder %s2517_s14, %s2563_s2 }
 0x1b9   : > { %p1806_p7 = scmp.lt.u32.totalorder %s1804_s25, %s1800_s29  ;;  %p1808_p8 = scmp.lt.u32.totalorder %s1800_s29, %s2517_s14 }
 0x1ba   : > { %p1802_p2 = pnand %p1801_p13, %p2681_p9 }
 0x1bb   : > { %p1807_p3 = por %p1806_p7, %p1805_p12 }
 0x1bc   : > { %p1803_p6 = pneg %p1802_p2 }
 0x1bd   : > { %p1809_p10 = por %p1808_p8, %p1807_p3 }
 0x1bf   : > { %p1810_p1 = pnand %p1809_p10, %p1803_p6 }
 0x1c1   : > { %1813 = shalt.err (!%p1810_p1)
}
 0x1c2   : > { %s1865_s24 = smov 128   ;;  %s1866_s20 = smov 256  }
 0x1c3   : > { %s1867_s23 = smov 8  }
 0x1c4   : > { %1670 = dma.vmem_to_hbm [thread:$0]  (%p2681_p9), %s2512_s8, 256, %s2517_s14, %s1133_s16, %s1865_s24, %s1866_s20, %s1867_s23  }
 0x1c5 PF: > { %s1160_s26 = sand.u32 1, %s1844_s9   ;;  %p2682_p4 = scmp.ne.s32.totalorder %s2621_s22, 0 }
 0x1c6   : > { %p2683_p0 = scmp.ge.s32.totalorder %s1856_s12, 2  ;;  %s1161_s19 = scalar_lea.sflag [#allocation4], %s1160_s26 }
 0x1c8   : > { %p1681_p5 = pnand %p2683_p0, %p2682_p4 }
 0x1ca   : > { %1839 = dma.done.wait (!%p1681_p5), %s1161_s19, 256  }
 0x1cb   : > { %1841 = vsyncadd (!%p1681_p5), %s1161_s19, 4294967040  ;;  %p16_p11 = scmp.ge.s32.totalorder %s1908_s15, 4   ;;  %s2684_s9 = smov %s1848_s10 }
 0x1cc   : > { %s2685_s10 = smov %s1852_s11  ;;  %s2686_s11 = smov %s1920_s18 }
 0x1cd   : > { %s2687_s12 = smov %s1908_s15  ;;  %18 = sbr.rel (!%p16_p11) target bundleno = 6 (0x6), region = 78 }
 0x1d4   :  { %1166 = vsyncpa [#allocation3], 1 }
 0x1d5   :  { %1168 = vsyncpa [#allocation3 + $0x1], 1 }
 0x1d6   :  { %1169 = vsyncpa [#allocation6], 1 }
 0x1d7   :  { %1171 = vsyncpa [#allocation6 + $0x1], 1 }
 0x1d8   :  { %1172 = vsyncpa [#allocation4], 1 }
 0x1d9   :  { %1174 = vsyncpa [#allocation4 + $0x1], 1 }

// kernel: fegnn_forward.7
= control target key start
LH: loop header
LB: loop body
LE: loop exit
PB: predicated region body
PF: predicated region fallthrough
CT: control target
= control target key end

     0   :  { %10 = vsyncpa [#allocation3], 0  ;;  %s5401_s0 = inlined_call_operand.hbm [shape: f32[56,256], index: 0, kind: input, shape index: {}]   ;;  %s5402_s1 = inlined_call_operand.hbm [shape: f32[160,56], index: 1, kind: input, shape index: {}]   ;;  %s5403_s2 = inlined_call_operand.hbm [shape: f32[160,1], index: 2, kind: input, shape index: {}]   ;;  %s5404_s3 = inlined_call_operand.hbm [shape: f32[32,160], index: 3, kind: input, shape index: {}]   ;;  %s5405_s4 = inlined_call_operand.hbm [shape: f32[32,1], index: 4, kind: input, shape index: {}]   ;;  %s5406_s5 = inlined_call_operand.hbm [shape: f32[32,256], index: 5, kind: output, shape index: {}]  }
   0x1   :  { %12 = vsyncpa [#allocation3 + $0x1], 0 }
   0x2   :  { %13 = vsyncpa [#allocation6], 0 }
   0x3   :  { %14 = vsyncpa [#allocation9], 0 }
   0x4   :  { %15 = vsyncpa [#allocation4], 0 }
   0x5   :  { %17 = vsyncpa [#allocation4 + $0x1], 0  ;;  %s4143_s18 = smov 0   ;;  %s4145_s19 = smov 0  }
   0x6   :  { %s4147_s20 = smov 0   ;;  %s4149_s21 = smov 0  }
   0x7 LB: > { %s4164_s22 = sadd.s32 4294967295, %s4096_s21   ;;  %s2920_s23 = sadd.s32 4294967294, %s4096_s21   ;;  %s4096_s21 = sphi %s4149_s21, %s5640_s21   ;;  %s4092_s20 = sphi %s4147_s20, %s5639_s20   ;;  %s4088_s19 = sphi %s4145_s19, %s5638_s19   ;;  %s4084_s18 = sphi %s4143_s18, %s5637_s18  }
   0x8   : > { %p43_p0 = scmp.ne.s32.totalorder %s4088_s19, %s4084_s18  ;;  %p5407_p1 = scmp.eq.s32.totalorder %s4164_s22, 0 }
   0x9   : > { %p157_p3 = scmp.eq.s32.totalorder %s2920_s23, 1  ;;  %p2921_p5 = scmp.ge.s32.totalorder %s4096_s21, 1 }
   0xa   : > { %p4173_p4 = por %p5407_p1, %p43_p0  ;;  %p164_p7 = scmp.lt.s32.totalorder %s4096_s21, 3 }
   0xb   : > { %p4178_p6 = por %p157_p3, %p43_p0  ;;  %s4098_s27 = smov [#allocation5]  }
   0xc   : > { %s5502_s24 = scalar_select %p4173_p4, 1, 0 }
   0xd   : > { %s5503_s25 = scalar_select %p4178_p6, 1, 0 }
   0xe   : > { %p4183_p8 = pnand %p2921_p5, %p164_p7  ;;  %s176_s28 = sshll.u32 %s4098_s27, 4  ;;  %s4187_s28 = int_to_ptr.vmem [resolvable:$true] %s176_s28 }
   0xf   : > { %s4099_s30 = smov [#allocation8]   ;;  %s3880_s9 = scalar_lea.hbm %s5402_s1, 2560 }
  0x10   : > { %s5504_s26 = scalar_select %p4183_p8, 1, 0 }
  0x11   : > { %p3802_p9 = pneg %p4183_p8  ;;  %s202_s6 = sshll.u32 %s4099_s30, 4  ;;  %s4198_s6 = int_to_ptr.vmem [resolvable:$true] %s202_s6 }
  0x12   : > { %p3881_p12 = scmp.ne.s32.totalorder %s5402_s1, %s3880_s9  ;;  %p3887_p5 = scmp.lt.u32.totalorder %s3880_s9, %s5402_s1 }
  0x13   : > { %p4194_p11 = pnand %p3802_p9, %p5407_p1 }
  0x15   : > { %p4208_p13 = pneg %p4194_p11 }
  0x17   : > { %p3883_p0 = pnand %p4208_p13, %p3881_p12 }
  0x19   : > { %p3884_p3 = pneg %p3883_p0 }
  0x1b   : > { %p3889_p7 = pnand %p3887_p5, %p3884_p3 }
  0x1d   : > { %3892 = shalt.err (!%p3889_p7)
}
  0x1e   : > { %s3893_s15 = scalar_lea.vmem %s4187_s28, 2560  ;;  %p3901_p2 = scmp.lt.s32.totalorder %s4187_s28, %s4187_s28 }
  0x1f   : > { %p3894_p9 = scmp.ne.s32.totalorder %s4187_s28, %s3893_s15  ;;  %p3902_p6 = scmp.lt.s32.totalorder %s3893_s15, %s3893_s15 }
  0x21   : > { %p3896_p10 = pnand %p3894_p9, %p4208_p13  ;;  %p3903_p12 = por %p3902_p6, %p3901_p2 }
  0x23   : > { %p3897_p1 = pneg %p3896_p10 }
  0x25   : > { %p3904_p0 = pnand %p3903_p12, %p3897_p1 }
  0x27   : > { %3907 = shalt.err (!%p3904_p0)
}
  0x28   : > { %s5408_s16 = smov 128   ;;  %s5413_s17 = smov 8  }
  0x29   : > { %3805 = dma.hbm_to_vmem [thread:$0]  (!%p4194_p11), %s5402_s1, 2560, %s4187_s28, [#allocation6], %s5408_s16, %s5408_s16, %s5413_s17  }
  0x2a   : > { %s3908_s8 = scalar_lea.hbm %s5404_s3, 1024 }
  0x2b   : > { %p3909_p1 = scmp.ne.s32.totalorder %s5404_s3, %s3908_s8  ;;  %p3915_p10 = scmp.lt.u32.totalorder %s3908_s8, %s5404_s3 }
  0x2d   : > { %p3911_p2 = pnand %p3909_p1, %p4208_p13 }
  0x2f   : > { %p3912_p6 = pneg %p3911_p2 }
  0x31   : > { %p3917_p3 = pnand %p3915_p10, %p3912_p6 }
  0x33   : > { %3920 = shalt.err (!%p3917_p3)
}
  0x34   : > { %s3921_s28 = scalar_lea.vmem %s4198_s6, 1024  ;;  %p3929_p12 = scmp.lt.s32.totalorder %s4198_s6, %s4198_s6 }
  0x35   : > { %p3922_p5 = scmp.ne.s32.totalorder %s4198_s6, %s3921_s28  ;;  %p3930_p0 = scmp.lt.s32.totalorder %s3921_s28, %s3921_s28 }
  0x37   : > { %p3924_p7 = pnand %p3922_p5, %p4208_p13  ;;  %p3931_p1 = por %p3930_p0, %p3929_p12 }
  0x39   : > { %p3925_p9 = pneg %p3924_p7 }
  0x3b   : > { %p3932_p2 = pnand %p3931_p1, %p3925_p9 }
  0x3d   : > { %3935 = shalt.err (!%p3932_p2)
}
  0x3e   : > { %s5412_s14 = smov 256   ;;  %s4103_s15 = smov 16  }
  0x3f   : > { %3811 = dma.hbm_to_vmem [thread:$0]  (!%p4194_p11), %s5404_s3, 1024, %s4198_s6, [#allocation9], %s5412_s14, %s5412_s14, %s4103_s15  }
  0x40   : > { %s4104_s30 = smov [#allocation7]   ;;  %s4105_s8 = smov [#allocation10]  }
  0x41   : > { %s189_s7 = sshll.u32 %s4104_s30, 4  ;;  %s215_s9 = sshll.u32 %s4105_s8, 4  ;;  %s190_s7 = int_to_ptr.vmem [resolvable:$true] %s189_s7  ;;  %s4257_s9 = int_to_ptr.vmem [resolvable:$true] %s215_s9 }
  0x42   : > { %s3936_s13 = scalar_lea.hbm %s5403_s2, 2560 }
  0x43   : > { %p3937_p6 = scmp.ne.s32.totalorder %s5403_s2, %s3936_s13  ;;  %p3943_p5 = scmp.lt.u32.totalorder %s3936_s13, %s5403_s2 }
  0x45   : > { %p3939_p10 = pnand %p3937_p6, %p4208_p13 }
  0x47   : > { %p3940_p3 = pneg %p3939_p10 }
  0x49   : > { %p3945_p7 = pnand %p3943_p5, %p3940_p3 }
  0x4b   : > { %3948 = shalt.err (!%p3945_p7)
}
  0x4c   : > { %s3949_s15 = scalar_lea.vmem %s190_s7, 2560  ;;  %p3957_p1 = scmp.lt.s32.totalorder %s190_s7, %s190_s7 }
  0x4d   : > { %p3950_p9 = scmp.ne.s32.totalorder %s190_s7, %s3949_s15  ;;  %p3958_p2 = scmp.lt.s32.totalorder %s3949_s15, %s3949_s15 }
  0x4f   : > { %p3952_p12 = pnand %p3950_p9, %p4208_p13  ;;  %p3959_p4 = por %p3958_p2, %p3957_p1 }
  0x51   : > { %p3953_p0 = pneg %p3952_p12 }
  0x53   : > { %p3960_p8 = pnand %p3959_p4, %p3953_p0 }
  0x55   : > { %3963 = shalt.err (!%p3960_p8)
}
  0x56   : > { %s5507_s16 = smov 128   ;;  %s3964_s11 = scalar_lea.hbm %s5405_s4, 512 }
  0x57   : > { %3808 = dma.hbm_to_vmem [thread:$0]  (!%p4194_p11), %s5403_s2, 2560, %s190_s7, [#allocation6], %s5507_s16, %s5507_s16, %s5413_s17  }
  0x58   : > { %p3965_p6 = scmp.ne.s32.totalorder %s5405_s4, %s3964_s11  ;;  %p3971_p10 = scmp.lt.u32.totalorder %s3964_s11, %s5405_s4 }
  0x5a   : > { %p3967_p4 = pnand %p3965_p6, %p4208_p13 }
  0x5c   : > { %p3968_p8 = pneg %p3967_p4 }
  0x5e   : > { %p3973_p3 = pnand %p3971_p10, %p3968_p8 }
  0x60   : > { %3976 = shalt.err (!%p3973_p3)
}
  0x61   : > { %s3977_s7 = scalar_lea.vmem %s4257_s9, 512  ;;  %p3985_p12 = scmp.lt.s32.totalorder %s4257_s9, %s4257_s9 }
  0x62   : > { %p3978_p5 = scmp.ne.s32.totalorder %s4257_s9, %s3977_s7  ;;  %p3986_p0 = scmp.lt.s32.totalorder %s3977_s7, %s3977_s7 }
  0x64   : > { %p3980_p7 = pnand %p3978_p5, %p4208_p13  ;;  %p3987_p1 = por %p3986_p0, %p3985_p12 }
  0x66   : > { %p3981_p9 = pneg %p3980_p7 }
  0x68   : > { %p3988_p2 = pnand %p3987_p1, %p3981_p9 }
  0x6a   : > { %3991 = shalt.err (!%p3988_p2)
}
  0x6b   : > { %3814 = dma.hbm_to_vmem [thread:$0]  (!%p4194_p11), %s5405_s4, 512, %s4257_s9, [#allocation9], %s5507_s16, %s5507_s16, %s5413_s17  }
  0x6c   : > { %s4307_s29 = sadd.s32 1, %s4096_s21   ;;  %s30_s30 = sadd.s32 1, %s4092_s20 }
  0x6d   : > { %s27_s12 = ssub.s32 %s4096_s21, %s4307_s29  ;;  %p37_p6 = scmp.ne.s32.totalorder %s4092_s20, %s4088_s19 }
  0x6e   : > { %p28_p13 = scmp.eq.s32.totalorder %s27_s12, 0  ;;  %p38_p4 = scmp.eq.s32.totalorder %s4096_s21, 0 }
  0x6f   : > { %p5508_p10 = scmp.eq.s32.totalorder %s4164_s22, 1  ;;  %p3827_p5 = scmp.lt.s32.totalorder %s4096_s21, 2 }
  0x70   : > { %s4316_s8 = scalar_select %p28_p13, %s4092_s20, %s30_s30  }
  0x71   : > { %p39_p8 = por %p38_p4, %p37_p6  ;;  %p4320_p3 = por %p5508_p10, %p37_p6 }
  0x72   : > { %s229_s11 = sand.u32 1, %s4092_s20   ;;  %s2927_s9 = sshll.u32 %s4096_s21, 7 }
  0x73   : > { %s3780_s13 = smul.u32 56, %s229_s11  ;;  %p4327_p11 = pnand %p3827_p5, %p39_p8 }
  0x74   : > { %s4334_s7 = scalar_lea.hbm %s5401_s0, %s2927_s9  ;;  %s4338_s12 = scalar_lea.sflag [#allocation3], %s229_s11 }
  0x75   : > { %s233_s15 = scalar_lea.vmem [#allocation2], %s3780_s13  ;;  %s3992_s30 = scalar_lea.hbm %s4334_s7, 896 }
  0x76   : > { %s239_s27 = sshll.u32 %s233_s15, 4  ;;  %p3993_p7 = scmp.ne.s32.totalorder %s4334_s7, %s3992_s30  ;;  %s4336_s27 = int_to_ptr.vmem [resolvable:$true] %s239_s27 }
  0x77   : > { %p3994_p9 = pneg %p4327_p11  ;;  %s3997_s6 = scalar_lea.hbm %s5401_s0, 1792 }
  0x78   : > { %p3998_p1 = scmp.lt.u32.totalorder %s4334_s7, %s5401_s0  ;;  %p3999_p2 = scmp.lt.u32.totalorder %s3997_s6, %s3992_s30 }
  0x79   : > { %p3995_p12 = pnand %p3994_p9, %p3993_p7  ;;  %p4001_p6 = scmp.lt.u32.totalorder %s3992_s30, %s4334_s7 }
  0x7a   : > { %p4000_p13 = por %p3999_p2, %p3998_p1 }
  0x7b   : > { %p3996_p0 = pneg %p3995_p12 }
  0x7c   : > { %p4002_p4 = por %p4001_p6, %p4000_p13 }
  0x7e   : > { %p4003_p8 = pnand %p4002_p4, %p3996_p0 }
  0x80   : > { %4006 = shalt.err (!%p4003_p8)
}
  0x81   : > { %s4007_s11 = scalar_lea.vmem %s4336_s27, 896  ;;  %s4106_s13 = smov [#allocation2]  }
  0x82   : > { %p4008_p10 = scmp.ne.s32.totalorder %s4336_s27, %s4007_s11  ;;  %s4012_s15 = sshll.u32 %s4106_s13, 4  ;;  %s4013_s15 = int_to_ptr.vmem [resolvable:$false] %s4012_s15 }
  0x83   : > { %s4014_s17 = scalar_lea.vmem %s4013_s15, 1792  ;;  %p4015_p12 = scmp.lt.s32.totalorder %s4336_s27, %s4013_s15 }
  0x84   : > { %p4010_p5 = pnand %p4008_p10, %p3994_p9  ;;  %p4016_p1 = scmp.lt.s32.totalorder %s4014_s17, %s4007_s11 }
  0x86   : > { %p4011_p7 = pneg %p4010_p5  ;;  %p4017_p2 = por %p4016_p1, %p4015_p12 }
  0x88   : > { %p4018_p13 = pnand %p4017_p2, %p4011_p7 }
  0x8a   : > { %4021 = shalt.err (!%p4018_p13)
}
  0x8b   : > { %s5511_s14 = smov 8   ;;  %s5512_s30 = smov 256  }
  0x8c   : > { %3818 = dma.hbm_to_vmem [thread:$0]  (!%p4327_p11), %s4334_s7, 896, %s4336_s27, %s4338_s12, %s5512_s30, %s5507_s16, %s5511_s14  }
  0x8d   : > { %p5513_p9 = scmp.ne.s32.totalorder %s5504_s26, 0 }
  0x8f   : > { %251 = sbr.rel (%p5513_p9) target bundleno = 1085 (0x43d), region = 40 }
  0x96   : > { %s4372_s9 = sand.u32 1, %s4088_s19   ;;  %p5514_p0 = scmp.ne.s32.totalorder %s5502_s24, 0 }
  0x97   : > { %s3781_s23 = smul.u32 56, %s4372_s9  ;;  %s254_s6 = scalar_lea.sflag [#allocation3], %s4372_s9 }
  0x99   : > { %s257_s11 = scalar_lea.vmem [#allocation2], %s3781_s23 }
  0x9a   : > { %4067 = dma.done.wait (%p5514_p0), %s254_s6, 896  }
  0x9b   : > { %4069 = vsyncadd (%p5514_p0), %s254_s6, 4294966400  ;;  %p5515_p6 = scmp.eq.s32.totalorder %s4164_s22, 0 }
  0x9d   : > { %4071 = dma.done.wait (%p5515_p6), [#allocation6], 5120   ;;  %p5516_p11 = pmov %p5515_p6 }
  0x9e   : > { %p5517_p4 = pmov %p5515_p6 }
  0x9f   : > { %4073 = vsyncadd (%p5516_p11), [#allocation6], 4294962176 }
  0xa0   : > { %4075 = dma.done.wait (%p5517_p4), [#allocation9], 1536   ;;  %p5518_p8 = pmov %p5517_p4 }
  0xa1   : > { %v320_v0 = vld [vmem:[%s257_s11] sm:$0xff]  ;;  %v321_v1 = vld [vmem:[%s257_s11 + $0x8] sm:$0xff]  ;;  %v4388_v2 = vld [vmem:[%s257_s11 + $0x10] sm:$0xff]  ;;  %vm447_vm0 = vcmask 457728   ;;  %vm1901_vm1 = vcmask 261120   ;;  %s2933_s24 = sshll.u32 %s4372_s9, 5 }
  0xa2   : > { %4077 = vsyncadd (%p5518_p8), [#allocation9], 4294965760  ;;  %v509_v3 = vand.u32 4294901760, %v320_v0  ;;  %v512_v4 = vand.u32 4294901760, %v321_v1  ;;  %v4390_v5 = vld [vmem:[%s257_s11 + $0x18] sm:$0xff]  ;;  %v515_v6 = vand.u32 4294901760, %v4388_v2 }
  0xa3   : > { %v4393_v7 = vld [vmem:[%s257_s11 + $0x20] sm:$0xff]  ;;  %v4395_v8 = vld [vmem:[%s257_s11 + $0x28] sm:$0xff]  ;;  %v518_v9 = vand.u32 4294901760, %v4390_v5  ;;  %v4400_v12 = vld [vmem:[%s257_s11 + $0x30] sm:$0xff]  ;;  %s299_s26 = scalar_lea.vmem [#allocation11], %s2933_s24  ;;  %s2935_s28 = sshll.u32 %s4164_s22, 7 }
  0xa4   : > { %v521_v10 = vand.u32 4294901760, %v4393_v7  ;;  %v524_v11 = vand.u32 4294901760, %v4395_v8  ;;  %v300_v13 = vld [vmem:[#allocation5] sm:$0xff]  ;;  %v301_v14 = vld [vmem:[#allocation5 + $0x8] sm:$0xff]  ;;  %v4402_v15 = vpack.c.bf16 %v512_v4, %v509_v3  ;;  %v4405_v16 = vand.u32 4294901760, %v4400_v12  ;;  %v302_v19 = vld [vmem:[#allocation5 + $0x10] sm:$0xff]  ;;  %s5357_s12 = scalar_lea.hbm %s5406_s5, %s2935_s28 }
  0xa5   : > { %v449_v17 = vsel %vm447_vm0, %v300_v13, 0  ;;  %v452_v18 = vsel %vm447_vm0, %v301_v14, 0  ;;  %v303_v20 = vld [vmem:[#allocation5 + $0x18] sm:$0xff]  ;;  %v4411_v21 = vpack.c.bf16 %v518_v9, %v515_v6  ;;  %v304_v25 = vld [vmem:[#allocation5 + $0x20] sm:$0xff]  ;;  %v305_v26 = vld [vmem:[#allocation5 + $0x28] sm:$0xff]  ;;  %v4424_v27 = vsub.f32 %v320_v0, %v509_v3  ;;  %s2809_s16 = sshll.u32 %s299_s26, 4  ;;  %s5352_s16 = int_to_ptr.vmem [resolvable:$true] %s2809_s16 }
  0xa6   : > { %v4417_v22 = vpack.c.bf16 %v524_v11, %v521_v10  ;;  %v4419_v23 = vand.u32 4294901760, %v449_v17  ;;  %v4421_v24 = vand.u32 4294901760, %v452_v18  ;;  %3365 = vmatprep.subr.bf16.mxu0 %v4402_v15  ;;  %v4426_v28 = vsub.f32 %v321_v1, %v512_v4  ;;  %v306_v55 = vld [vmem:[#allocation5 + $0x30] sm:$0xff]  ;;  %v307_v0 = vld [vmem:[#allocation5 + $0x38] sm:$0xff]  ;;  %v308_v1 = vld [vmem:[#allocation5 + $0x40] sm:$0xff]  ;;  %s2797_s13 = scalar_lea.sflag [#allocation4], %s4372_s9 }
  0xa7   : > { %v455_v29 = vsel %vm447_vm0, %v302_v19, 0  ;;  %v458_v30 = vsel %vm447_vm0, %v303_v20, 0  ;;  %3367 = vmatpush3.bf16.msra.mxu0 %v4402_v15  ;;  %v5432_v35 = vand.u32 4294901760, %v4424_v27  ;;  %v461_v37 = vsel %vm447_vm0, %v304_v25, 0  ;;  %v309_v3 = vld [vmem:[#allocation5 + $0x48] sm:$0xff]  ;;  %s4022_s15 = scalar_lea.vmem %s5352_s16, 512 }
  0xa8   : > { %v4432_v31 = vsub.f32 %v449_v17, %v4419_v23  ;;  %v4435_v32 = vsub.f32 %v452_v18, %v4421_v24  ;;  %v4437_v33 = vand.u32 4294901760, %v455_v29  ;;  %v4439_v34 = vand.u32 4294901760, %v458_v30  ;;  %3369 = vmatprep.subr.bf16.mxu0 %v4411_v21  ;;  %p4023_p10 = scmp.ne.s32.totalorder %s5352_s16, %s4022_s15  ;;  %s4109_s22 = smov [#allocation11]  }
  0xa9   : > { %v5431_v36 = vand.u32 4294901760, %v4426_v28  ;;  %v464_v38 = vsel %vm447_vm0, %v305_v26, 0  ;;  %v784_v43 = vsub.f32 %v4424_v27, %v5432_v35  ;;  %v4460_v45 = vand.u32 4294901760, %v461_v37  ;;  %v310_v26 = vld [vmem:[#allocation5 + $0x50] sm:$0xff]  ;;  %s4026_s17 = sshll.u32 %s4109_s22, 4  ;;  %s4027_s17 = int_to_ptr.vmem [resolvable:$false] %s4026_s17 }
  0xaa   : > { %v5425_v39 = vand.u32 4294901760, %v4432_v31  ;;  %v5424_v40 = vand.u32 4294901760, %v4435_v32  ;;  %v4449_v41 = vsub.f32 %v455_v29, %v4437_v33  ;;  %v4452_v42 = vsub.f32 %v458_v30, %v4439_v34  ;;  %v311_v29 = vld [vmem:[#allocation5 + $0x58] sm:$0xff]  ;;  %p4024_p5 = pnand %p4023_p10, %p4320_p3  ;;  %s4028_s14 = scalar_lea.vmem %s4027_s17, 1024 }
  0xab   : > { %v791_v44 = vsub.f32 %v4426_v28, %v5431_v36  ;;  %v4462_v46 = vand.u32 4294901760, %v464_v38  ;;  %3371 = vmatpush3.bf16.msra.mxu0 %v4411_v21  ;;  %v785_v51 = vand.u32 4294901760, %v784_v43  ;;  %v4475_v53 = vsub.f32 %v461_v37, %v4460_v45  ;;  %p4029_p12 = scmp.lt.s32.totalorder %s5352_s16, %s4027_s17  ;;  %p4030_p1 = scmp.lt.s32.totalorder %s4028_s14, %s4022_s15 }
  0xac   : > { %v583_v47 = vsub.f32 %v4432_v31, %v5425_v39  ;;  %v593_v48 = vsub.f32 %v4435_v32, %v5424_v40  ;;  %v5421_v49 = vand.u32 4294901760, %v4449_v41  ;;  %v5420_v50 = vand.u32 4294901760, %v4452_v42  ;;  %3373 = vmatprep.subr.bf16.mxu0 %v4417_v22  ;;  %p4025_p7 = pneg %p4024_p5 }
  0xad   : > { %v792_v52 = vand.u32 4294901760, %v791_v44  ;;  %v4478_v54 = vsub.f32 %v464_v38, %v4462_v46  ;;  %v5419_v61 = vand.u32 4294901760, %v4475_v53  ;;  %v4489_v63 = vsub.f32 %v4388_v2, %v515_v6  ;;  %p4031_p2 = por %p4030_p1, %p4029_p12 }
  0xae   : > { %v584_v56 = vand.u32 4294901760, %v583_v47  ;;  %v594_v57 = vand.u32 4294901760, %v593_v48  ;;  %v603_v58 = vsub.f32 %v4449_v41, %v5421_v49  ;;  %v613_v59 = vsub.f32 %v4452_v42, %v5420_v50  ;;  %v317_v50 = vld [vmem:[#allocation5 + $0x88] sm:$0xff] }
  0xaf   : > { %v3376_v60 = vpack.c.bf16 %v792_v52, %v785_v51  ;;  %v5418_v62 = vand.u32 4294901760, %v4478_v54  ;;  %3375 = vmatpush3.bf16.msra.mxu0 %v4417_v22  ;;  %v4495_v14 = vsub.f32 %v4390_v5, %v518_v9  ;;  %v467_v17 = vsel %vm447_vm0, %v306_v55, 0  ;;  %p4032_p13 = pnand %p4031_p2, %p4025_p7 }
  0xb0   : > { %3114 = vmatprep.mubr.f32.mxu0 %v584_v56  ;;  %v604_v4 = vand.u32 4294901760, %v603_v58  ;;  %v614_v13 = vand.u32 4294901760, %v613_v59  ;;  %3112 = vmatprep.subr.mxu0 %v4405_v16  ;;  %v623_v2 = vsub.f32 %v4475_v53, %v5419_v61  ;;  %v5430_v18 = vand.u32 4294901760, %v4489_v63 }
  0xb1   : > { %v633_v6 = vsub.f32 %v4478_v54, %v5418_v62  ;;  %v4506_v19 = vand.u32 4294901760, %v467_v17  ;;  %v5428_v20 = vand.u32 4294901760, %v4495_v14  ;;  %v470_v5 = vsel %vm447_vm0, %v307_v0, 0 }
  0xb2   : > { %v473_v9 = vsel %vm447_vm0, %v308_v1, 0  ;;  %v476_v25 = vsel %vm447_vm0, %v309_v3, 0  ;;  %v624_v30 = vand.u32 4294901760, %v623_v2  ;;  %v798_v38 = vsub.f32 %v4489_v63, %v5430_v18  ;;  %v319_v18 = vld [vmem:[#allocation5 + $0x98] sm:$0xff] }
  0xb3   : > { %v634_v37 = vand.u32 4294901760, %v633_v6  ;;  %v4516_v43 = vsub.f32 %v467_v17, %v4506_v19  ;;  %3113 = vmatpush3.msra.mxu0 %v4405_v16  ;;  %v805_v44 = vsub.f32 %v4495_v14, %v5428_v20  ;;  %v4522_v47 = vand.u32 4294901760, %v470_v5 }
  0xb4   : > { %v4524_v48 = vand.u32 4294901760, %v473_v9  ;;  %v4526_v51 = vand.u32 4294901760, %v476_v25  ;;  %3115 = vmatmul.mubr.f32.vlgmr.msra.gmra.mrb[0].mxu0 %v594_v57  ;;  %3377 = vmatprep.subr.bf16.mxu0 %v3376_v60  ;;  %v799_v52 = vand.u32 4294901760, %v798_v38  ;;  %v479_v56 = vsel %vm447_vm0, %v310_v26, 0 }
  0xb5   : > { %v5417_v55 = vand.u32 4294901760, %v4516_v43  ;;  %v482_v58 = vsel %vm447_vm0, %v311_v29, 0  ;;  %3379 = vmatpush3.bf16.msra.mxu0 %v3376_v60  ;;  %3117 = vmatprep.mubr.f32.mxu0 %v604_v4  ;;  %v806_v59 = vand.u32 4294901760, %v805_v44  ;;  %v4532_v0 = vsub.f32 %v470_v5, %v4522_v47  ;;  %v312_v4 = vld [vmem:[#allocation5 + $0x60] sm:$0xff] }
  0xb6   : > { %v4535_v1 = vsub.f32 %v473_v9, %v4524_v48  ;;  %v4538_v3 = vsub.f32 %v476_v25, %v4526_v51  ;;  %v4543_v17 = vand.u32 4294901760, %v479_v56  ;;  %v4545_v2 = vand.u32 4294901760, %v482_v58 }
  0xb7   : > { %v643_v57 = vsub.f32 %v4516_v43, %v5417_v55  ;;  %v4550_v60 = vsub.f32 %v4393_v7, %v521_v10  ;;  %v3380_v6 = vpack.c.bf16 %v806_v59, %v799_v52  ;;  %v5415_v5 = vand.u32 4294901760, %v4532_v0 }
  0xb8   : > { %v5414_v9 = vand.u32 4294901760, %v4535_v1  ;;  %v5416_v25 = vand.u32 4294901760, %v4538_v3  ;;  %3118 = vmatmul.mubr.f32.gmra.mrb[2].mxu0 %v614_v13  ;;  %v4556_v29 = vsub.f32 %v479_v56, %v4543_v17  ;;  %v4559_v38 = vsub.f32 %v482_v58, %v4545_v2 }
  0xb9   : > { %v644_v26 = vand.u32 4294901760, %v643_v57  ;;  %v5427_v44 = vand.u32 4294901760, %v4550_v60  ;;  %3120 = vmatprep.mubr.f32.mxu0 %v624_v30  ;;  %3381 = vmatprep.subr.bf16.mxu0 %v3380_v6  ;;  %v653_v7 = vsub.f32 %v4532_v0, %v5415_v5  ;;  %v485_v52 = vsel %vm447_vm0, %v312_v4, 0  ;;  %v313_v57 = vld [vmem:[#allocation5 + $0x68] sm:$0xff]  ;;  %v315_v5 = vld [vmem:[#allocation5 + $0x78] sm:$0xff] }
  0xba   : > { %v663_v10 = vsub.f32 %v4535_v1, %v5414_v9  ;;  %v673_v13 = vsub.f32 %v4538_v3, %v5416_v25  ;;  %3383 = vmatpush3.bf16.msra.mxu0 %v3380_v6  ;;  %v5422_v56 = vand.u32 4294901760, %v4556_v29  ;;  %v5423_v30 = vand.u32 4294901760, %v4559_v38  ;;  %v314_v9 = vld [vmem:[#allocation5 + $0x70] sm:$0xff] }
  0xbb   : > { %v812_v58 = vsub.f32 %v4550_v60, %v5427_v44  ;;  %v4580_v59 = vsub.f32 %v4395_v8, %v524_v11  ;;  %v654_v25 = vand.u32 4294901760, %v653_v7  ;;  %v4582_v4 = vand.u32 4294901760, %v485_v52 }
  0xbc   : > { %v664_v55 = vand.u32 4294901760, %v663_v10  ;;  %3121 = vmatmul.mubr.f32.gmra.mrb[4].mxu0 %v634_v37  ;;  %v674_v6 = vand.u32 4294901760, %v673_v13  ;;  %v683_v62 = vsub.f32 %v4556_v29, %v5422_v56  ;;  %v693_v61 = vsub.f32 %v4559_v38, %v5423_v30  ;;  %v316_v13 = vld [vmem:[#allocation5 + $0x80] sm:$0xff] }
  0xbd   : > { %v5426_v8 = vand.u32 4294901760, %v4580_v59  ;;  %3123 = vmatprep.mubr.f32.mxu0 %v644_v26  ;;  %v4592_v11 = vsub.f32 %v485_v52, %v4582_v4  ;;  %v488_v7 = vsel %vm447_vm0, %v313_v57, 0  ;;  %v491_v10 = vsel %vm447_vm0, %v314_v9, 0 }
  0xbe   : > { %v494_v37 = vsel %vm447_vm0, %v315_v5, 0  ;;  %v684_v49 = vand.u32 4294901760, %v683_v62  ;;  %v813_v56 = vand.u32 4294901760, %v812_v58  ;;  %v4600_v40 = vand.u32 4294901760, %v488_v7 }
  0xbf   : > { %v819_v30 = vsub.f32 %v4580_v59, %v5426_v8  ;;  %v5429_v26 = vand.u32 4294901760, %v4592_v11  ;;  %v4603_v52 = vand.u32 4294901760, %v491_v10  ;;  %v4605_v39 = vand.u32 4294901760, %v494_v37 }
  0xc0   : > { %v4609_v9 = vsub.f32 %v4400_v12, %v4405_v16  ;;  %3124 = vmatmul.mubr.f32.gmra.mrb[6].mxu0 %v654_v25  ;;  %v4612_v62 = vsub.f32 %v488_v7, %v4600_v40  ;;  %v497_v58 = vsel %vm447_vm0, %v316_v13, 0  ;;  %v500_v57 = vsel %vm447_vm0, %v317_v50, 0 }
  0xc1   : > { %v820_v5 = vand.u32 4294901760, %v819_v30  ;;  %3126 = vmatprep.mubr.f32.mxu0 %v664_v55  ;;  %v703_v8 = vsub.f32 %v4592_v11, %v5429_v26  ;;  %v4620_v44 = vsub.f32 %v491_v10, %v4603_v52  ;;  %v4623_v12 = vsub.f32 %v494_v37, %v4605_v39  ;;  %v318_v30 = vld [vmem:[#allocation5 + $0x90] sm:$0xff] }
  0xc2   : > { %5519 = vst [vmem:[#allocation16_spill] sm:$0xff] %v4612_v62  ;;  %v4626_v25 = vand.u32 4294901760, %v4609_v9  ;;  %v5435_v13 = vand.u32 4294901760, %v4612_v62  ;;  %v4629_v20 = vand.u32 4294901760, %v497_v58  ;;  %v4631_v50 = vand.u32 4294901760, %v500_v57 }
  0xc3   : > { %5520 = vst [vmem:[#allocation17_spill] sm:$0xff] %v4623_v12  ;;  %v3384_v7 = vpack.c.bf16 %v820_v5, %v813_v56  ;;  %v694_v55 = vand.u32 4294901760, %v693_v61  ;;  %v5438_v26 = vand.u32 4294901760, %v4620_v44  ;;  %v503_v61 = vsel %vm447_vm0, %v318_v30, 0 }
  0xc4   : > { %5521 = vst [vmem:[#allocation18_spill] sm:$0xff] %v4626_v25  ;;  %v826_v37 = vsub.f32 %v4609_v9, %v4626_v25  ;;  %3127 = vmatmul.mubr.f32.gmra.mrb[8].mxu0 %v674_v6  ;;  %v713_v56 = vsub.f32 %v4612_v62, %v5435_v13  ;;  %v4641_v5 = vsub.f32 %v497_v58, %v4629_v20  ;;  %v704_v35 = vand.u32 4294901760, %v703_v8 }
  0xc5   : > { %3385 = vmatprep.subr.bf16.mxu0 %v3384_v7  ;;  %v4644_v36 = vsub.f32 %v500_v57, %v4631_v50  ;;  %3129 = vmatprep.mubr.f32.mxu0 %v684_v49  ;;  %v723_v6 = vsub.f32 %v4620_v44, %v5438_v26  ;;  %v4650_v25 = vand.u32 4294901760, %v503_v61  ;;  %v506_v58 = vsel %vm447_vm0, %v319_v18, 0 }
  0xc6   : > { %5522 = vst [vmem:[#allocation19_spill] sm:$0xff] %v4641_v5  ;;  %3387 = vmatpush3.bf16.msra.mxu0 %v3384_v7  ;;  %v827_v10 = vand.u32 4294901760, %v826_v37  ;;  %v5441_v13 = vand.u32 4294901760, %v4641_v5  ;;  %v5523_v62 = vand.u32 4294901760, %v4623_v12  ;;  %v4660_v8 = vand.u32 4294901760, %v506_v58 }
  0xc7   : > { %v4658_v49 = vsub.f32 %v503_v61, %v4650_v25  ;;  %v714_v30 = vand.u32 4294901760, %v713_v56  ;;  %v724_v7 = vand.u32 4294901760, %v723_v6  ;;  %v3388_v26 = vpack.c.bf16 %v4426_v28, %v4424_v27 }
  0xc8   : > { %v733_v57 = vsub.f32 %v4623_v12, %v5523_v62  ;;  %3156 = vmatprep.subr.mxu0 %v827_v10  ;;  %3130 = vmatmul.mubr.f32.gmra.mrb[10].mxu0 %v694_v55  ;;  %v743_v18 = vsub.f32 %v4641_v5, %v5441_v13  ;;  %v4670_v61 = vsub.f32 %v506_v58, %v4660_v8  ;;  %v5524_v55 = vand.u32 4294901760, %v4424_v27 }
  0xc9   : > { %3132 = vmatprep.mubr.f32.mxu0 %v704_v35  ;;  %v5525_v56 = vand.u32 4294901760, %v4426_v28  ;;  %v5526_v37 = vand.u32 4294901760, %v4489_v63  ;;  %v5527_v35 = vand.u32 4294901760, %v4495_v14  ;;  %v5529_v13 = vand.u32 4294901760, %v4580_v59 }
  0xca   : > { %3157 = vmatpush3.msra.mxu0 %v827_v10  ;;  %v5528_v10 = vand.u32 4294901760, %v4550_v60  ;;  %v734_v58 = vand.u32 4294901760, %v733_v57  ;;  %v5530_v27 = vand.u32 4294901760, %v4644_v36  ;;  %v5531_v5 = vand.u32 4294901760, %v4658_v49 }
  0xcb   : > { %v4676_v6 = vpack.c.bf16 %v5525_v56, %v5524_v55  ;;  %3389 = vmatprep.subr.bf16.mxu0 %v3388_v26  ;;  %v4682_v12 = vpack.c.bf16 %v5527_v35, %v5526_v37  ;;  %v772_v55 = vand.u32 4294901760, %v4670_v61  ;;  %v744_v56 = vand.u32 4294901760, %v743_v18  ;;  %v328_v18 = vld [vmem:[#allocation7 + $0x8] sm:$0xff] }
  0xcc   : > { %v4688_v62 = vpack.c.bf16 %v5529_v13, %v5528_v10  ;;  %3133 = vmatmul.mubr.f32.gmra.mrb[12].mxu0 %v714_v30  ;;  %v753_v28 = vsub.f32 %v4644_v36, %v5530_v27  ;;  %v763_v37 = vsub.f32 %v4658_v49, %v5531_v5  ;;  %v3396_v5 = vpack.c.bf16 %v4580_v59, %v4550_v60  ;;  %v327_v59 = vld [vmem:[#allocation7] sm:$0xff]  ;;  %v330_v10 = vld [vmem:[#allocation7 + $0x18] sm:$0xff]  ;;  %v332_v27 = vld [vmem:[#allocation7 + $0x28] sm:$0xff] }
  0xcd   : > { %3135 = vmatprep.mubr.f32.mxu0 %v724_v7  ;;  %v773_v13 = vsub.f32 %v4670_v61, %v772_v55  ;;  %v3392_v7 = vpack.c.bf16 %v4495_v14, %v4489_v63  ;;  %v5532_v63 = vld [vmem:[#allocation16_spill] sm:$0xff]  ;;  %v5533_v14 = vld [vmem:[#allocation17_spill] sm:$0xff]  ;;  %v4107_v60 = vmov 0  }
  0xce   : > { %v754_v35 = vand.u32 4294901760, %v753_v28  ;;  %v764_v57 = vand.u32 4294901760, %v763_v37  ;;  %3878 = vset.pattern.permute.xlu0 %v4107_v60  ;;  %3879 = vset.pattern.permute.xlu1 %v4107_v60  ;;  %v5535_v28 = vand.u32 4294901760, %v4432_v31  ;;  %v5536_v37 = vand.u32 4294901760, %v4435_v32  ;;  %v340_v60 = vld [vmem:[#allocation7 + $0x68] sm:$0xff] }
  0xcf   : > { %v774_v30 = vand.u32 4294901760, %v773_v13  ;;  %349 = vperm.xlu0 %3878, %v327_v59   ;;  %v5537_v13 = vand.u32 4294901760, %v4449_v41  ;;  %v5544_v59 = vand.u32 4294901760, %v4535_v1 }
  0xd0   : > { %3136 = vmatmul.mubr.f32.gmra.mrb[14].mxu0 %v734_v58  ;;  %v331_v58 = vld [vmem:[#allocation7 + $0x20] sm:$0xff] }
  0xd1   : > { %3138 = vmatprep.mubr.f32.mxu0 %v744_v56  ;;  %v333_v56 = vld [vmem:[#allocation7 + $0x30] sm:$0xff] }
  0xd3   : > { %354 = vperm.xlu0 %3878, %v328_v18   ;;  %v344_v18 = vld [vmem:[#allocation7 + $0x88] sm:$0xff] }
  0xd4   : > { %3139 = vmatmul.mubr.f32.gmra.mrb[16].mxu0 %v754_v35  ;;  %v334_v35 = vld [vmem:[#allocation7 + $0x38] sm:$0xff] }
  0xd5   : > { %3141 = vmatprep.mubr.f32.mxu0 %v764_v57  ;;  %v335_v57 = vld [vmem:[#allocation7 + $0x40] sm:$0xff] }
  0xd7   : > { %369 = vperm.xlu0 %3878, %v331_v58   ;;  %v345_v58 = vld [vmem:[#allocation7 + $0x90] sm:$0xff] }
  0xd8   : > { %3142 = vmatmul.mubr.f32.gmra.mrb[18].mxu0 %v774_v30  ;;  %v336_v30 = vld [vmem:[#allocation7 + $0x48] sm:$0xff] }
  0xd9   : > { %3158 = vmatprep.mubr.f32.mxu0 %v4419_v23 }
  0xdb   : > { %379 = vperm.xlu0 %3878, %v333_v56   ;;  %v1878_v56 = vld [vmem:[#allocation10 + $0x8] sm:$0xff] }
  0xdc   : > { %3159 = vmatmul.mubr.f32.vlgmr.msra.gmra.mrb[0].mxu0 %v4421_v24 }
  0xdd   : > { %3391 = vmatpush3.bf16.msra.mxu0 %v3388_v26  ;;  %3161 = vmatprep.mubr.f32.mxu0 %v4437_v33  ;;  %v329_v26 = vld [vmem:[#allocation7 + $0x10] sm:$0xff] }
  0xde   : > { %3393 = vmatprep.subr.bf16.mxu0 %v3392_v7  ;;  %359 = vperm.xlu1 %3879, %v329_v26   ;;  %v5546_v26 = vand.u32 4294901760, %v4556_v29 }
  0xdf   : > { %389 = vperm.xlu0 %3878, %v335_v57  }
  0xe0   : > { %3162 = vmatmul.mubr.f32.gmra.mrb[2].mxu0 %v4439_v34 }
  0xe1   : > { %3164 = vmatprep.mubr.f32.mxu0 %v4460_v45  ;;  %3395 = vmatpush3.bf16.msra.mxu0 %v3392_v7  ;;  %v5539_v7 = vand.u32 4294901760, %v4475_v53 }
  0xe2   : > { %3397 = vmatprep.subr.bf16.mxu0 %v3396_v5  ;;  %364 = vperm.xlu1 %3879, %v330_v10   ;;  %v5548_v10 = vand.u32 4294901760, %v4592_v11 }
  0xe4   : > { %3165 = vmatmul.mubr.f32.gmra.mrb[4].mxu0 %v4462_v46 }
  0xe5   : > { %3167 = vmatprep.mubr.f32.mxu0 %v4506_v19  ;;  %3399 = vmatpush3.bf16.msra.mxu0 %v3396_v5  ;;  %v5541_v5 = vand.u32 4294901760, %v4516_v43 }
  0xe6   : > { %3200 = vmatprep.subr.mxu0 %v4609_v9  ;;  %374 = vperm.xlu1 %3879, %v332_v27   ;;  %v346_v27 = vld [vmem:[#allocation7 + $0x98] sm:$0xff] }
  0xe8   : > { %3168 = vmatmul.mubr.f32.gmra.mrb[6].mxu0 %v4522_v47 }
  0xe9   : > { %3170 = vmatprep.mubr.f32.mxu0 %v4524_v48  ;;  %3201 = vmatpush3.msra.mxu0 %v4609_v9  ;;  %v5534_v9 = vld [vmem:[#allocation19_spill] sm:$0xff] }
  0xea   : > { %3401 = vmatprep.subr.bf16.mxu0 %v4402_v15  ;;  %384 = vperm.xlu1 %3879, %v334_v35   ;;  %v1880_v35 = vld [vmem:[#allocation10 + $0x18] sm:$0xff] }
  0xec   : > { %3171 = vmatmul.mubr.f32.gmra.mrb[8].mxu0 %v4526_v51 }
  0xed   : > { %3173 = vmatprep.mubr.f32.mxu0 %v4543_v17 }
  0xee   : > { %394 = vperm.xlu1 %3879, %v336_v30  }
  0xf0   : > { %3174 = vmatmul.mubr.f32.gmra.mrb[10].mxu0 %v4545_v2 }
  0xf1   : > { %3176 = vmatprep.mubr.f32.mxu0 %v4582_v4 }
  0xf4   : > { %3177 = vmatmul.mubr.f32.gmra.mrb[12].mxu0 %v4600_v40 }
  0xf5   : > { %3179 = vmatprep.mubr.f32.mxu0 %v4603_v52 }
  0xf8   : > { %3180 = vmatmul.mubr.f32.gmra.mrb[14].mxu0 %v4605_v39 }
  0xf9   : > { %3182 = vmatprep.mubr.f32.mxu0 %v4629_v20 }
  0xfc   : > { %3183 = vmatmul.mubr.f32.gmra.mrb[16].mxu0 %v4631_v50 }
  0xfd   : > { %3185 = vmatprep.mubr.f32.mxu0 %v4650_v25 }
 0x100   : > { %3186 = vmatmul.mubr.f32.gmra.mrb[18].mxu0 %v4660_v8 }
 0x101   : > { %3202 = vmatprep.mubr.f32.mxu0 %v4432_v31  ;;  %v5538_v31 = vand.u32 4294901760, %v4452_v42 }
 0x104   : > { %3203 = vmatmul.mubr.f32.vlgmr.msra.gmra.mrb[0].mxu0 %v4435_v32  ;;  %v337_v32 = vld [vmem:[#allocation7 + $0x50] sm:$0xff] }
 0x105   : > { %3403 = vmatpush3.bf16.msra.mxu0 %v4402_v15  ;;  %3205 = vmatprep.mubr.f32.mxu0 %v4449_v41  ;;  %v5540_v41 = vand.u32 4294901760, %v4478_v54 }
 0x106   : > { %3405 = vmatprep.subr.bf16.mxu0 %v4411_v21  ;;  %399 = vperm.xlu0 %3878, %v337_v32   ;;  %v1875_v32 = vld [vmem:[#allocation8 + $0x30] sm:$0xff] }
 0x108   : > { %3206 = vmatmul.mubr.f32.gmra.mrb[2].mxu0 %v4452_v42  ;;  %v5542_v42 = vld [vmem:[#allocation18_spill] sm:$0xff] }
 0x109   : > { %3208 = vmatprep.mubr.f32.mxu0 %v4475_v53  ;;  %3407 = vmatpush3.bf16.msra.mxu0 %v4411_v21  ;;  %v339_v53 = vld [vmem:[#allocation7 + $0x60] sm:$0xff] }
 0x10a   : > { %3409 = vmatprep.subr.bf16.mxu0 %v4417_v22  ;;  %409 = vperm.xlu0 %3878, %v339_v53  }
 0x10c   : > { %3209 = vmatmul.mubr.f32.gmra.mrb[4].mxu0 %v4478_v54  ;;  %v341_v54 = vld [vmem:[#allocation7 + $0x70] sm:$0xff] }
 0x10d   : > { %3211 = vmatprep.mubr.f32.mxu0 %v4516_v43  ;;  %3411 = vmatpush3.bf16.msra.mxu0 %v4417_v22  ;;  %v5545_v43 = vand.u32 4294901760, %v4538_v3 }
 0x10e   : > { %3244 = vmatprep.subr.mxu0 %v4405_v16  ;;  %419 = vperm.xlu0 %3878, %v341_v54  }
 0x110   : > { %3212 = vmatmul.mubr.f32.gmra.mrb[6].mxu0 %v4532_v0 }
 0x111   : > { %3214 = vmatprep.mubr.f32.mxu0 %v4535_v1  ;;  %3245 = vmatpush3.msra.mxu0 %v4405_v16  ;;  %v5547_v1 = vand.u32 4294901760, %v4559_v38 }
 0x112   : > { %3413 = vmatprep.subr.bf16.mxu0 %v4676_v6 }
 0x114   : > { %3215 = vmatmul.mubr.f32.gmra.mrb[8].mxu0 %v4538_v3  ;;  %v5549_v3 = vand.u32 4294901760, %v5532_v63 }
 0x115   : > { %3217 = vmatprep.mubr.f32.mxu0 %v4556_v29  ;;  %v5550_v29 = vand.u32 4294901760, %v4620_v44 }
 0x118   : > { %3218 = vmatmul.mubr.f32.gmra.mrb[10].mxu0 %v4559_v38  ;;  %v5551_v38 = vand.u32 4294901760, %v5533_v14 }
 0x119   : > { %3220 = vmatprep.mubr.f32.mxu0 %v4592_v11  ;;  %v5552_v11 = vand.u32 4294901760, %v5534_v9 }
 0x11c   : > { %3221 = vmatmul.mubr.f32.gmra.mrb[12].mxu0 %v5532_v63  ;;  %v5553_v63 = vand.u32 4294901760, %v4644_v36 }
 0x11d   : > { %3223 = vmatprep.mubr.f32.mxu0 %v4620_v44  ;;  %v5554_v44 = vand.u32 4294901760, %v4658_v49 }
 0x120   : > { %3224 = vmatmul.mubr.f32.gmra.mrb[14].mxu0 %v5533_v14 }
 0x121   : > { %3226 = vmatprep.mubr.f32.mxu0 %v5534_v9 }
 0x124   : > { %3227 = vmatmul.mubr.f32.gmra.mrb[16].mxu0 %v4644_v36 }
 0x125   : > { %3229 = vmatprep.mubr.f32.mxu0 %v4658_v49  ;;  %v1876_v49 = vld [vmem:[#allocation8 + $0x38] sm:$0xff] }
 0x126   : > { %v1912_v57 = vsel %vm1901_vm1, %v1876_v49, 0 }
 0x128   : > { %3230 = vmatmul.mubr.f32.gmra.mrb[18].mxu0 %v4670_v61 }
 0x129   : > { %3246 = vmatprep.mubr.f32.mxu0 %v5535_v28  ;;  %v1877_v28 = vld [vmem:[#allocation10] sm:$0xff] }
 0x12c   : > { %3247 = vmatmul.mubr.f32.vlgmr.msra.gmra.mrb[0].mxu0 %v5536_v37  ;;  %v1879_v37 = vld [vmem:[#allocation10 + $0x10] sm:$0xff] }
 0x12d   : > { %3415 = vmatpush3.bf16.msra.mxu0 %v4676_v6  ;;  %3249 = vmatprep.mubr.f32.mxu0 %v5537_v13  ;;  %v338_v6 = vld [vmem:[#allocation7 + $0x58] sm:$0xff] }
 0x12e   : > { %3417 = vmatprep.subr.bf16.mxu0 %v4682_v12  ;;  %404 = vperm.xlu1 %3879, %v338_v6   ;;  %v4892_v6 = vand.u32 4294901760, %v1912_v57 }
 0x130   : > { %3250 = vmatmul.mubr.f32.gmra.mrb[2].mxu0 %v5538_v31 }
 0x131   : > { %3252 = vmatprep.mubr.f32.mxu0 %v5539_v7  ;;  %3419 = vmatpush3.bf16.msra.mxu0 %v4682_v12  ;;  %v5543_v12 = vand.u32 4294901760, %v4532_v0  ;;  %v343_v0 = vld [vmem:[#allocation7 + $0x80] sm:$0xff] }
 0x132   : > { %3421 = vmatprep.subr.bf16.mxu0 %v4688_v62  ;;  %414 = vperm.xlu1 %3879, %v340_v60  }
 0x133   : > { %429 = vperm.xlu0 %3878, %v343_v0  }
 0x134   : > { %3253 = vmatmul.mubr.f32.gmra.mrb[4].mxu0 %v5540_v41 }
 0x135   : > { %3255 = vmatprep.mubr.f32.mxu0 %v5541_v5  ;;  %3423 = vmatpush3.bf16.msra.mxu0 %v4688_v62  ;;  %v342_v62 = vld [vmem:[#allocation7 + $0x78] sm:$0xff] }
 0x136   : > { %3288 = vmatprep.subr.mxu0 %v5542_v42  ;;  %424 = vperm.xlu1 %3879, %v342_v62  }
 0x137   : > { %439 = vperm.xlu0 %3878, %v345_v58  }
 0x138   : > { %3256 = vmatmul.mubr.f32.gmra.mrb[6].mxu0 %v5543_v12 }
 0x139   : > { %3258 = vmatprep.mubr.f32.mxu0 %v5544_v59  ;;  %3289 = vmatpush3.msra.mxu0 %v5542_v42 }
 0x13a   : > { %3425 = vmatprep.subr.bf16.mxu0 %v4402_v15  ;;  %434 = vperm.xlu1 %3879, %v344_v18  }
 0x13b   : > { %1883 = vperm.xlu0 %3878, %v1877_v28  }
 0x13c   : > { %3259 = vmatmul.mubr.f32.gmra.mrb[8].mxu0 %v5545_v43  ;;  %v4902_v43 = vand.u32 4294901760, %v1875_v32 }
 0x13d   : > { %3261 = vmatprep.mubr.f32.mxu0 %v5546_v26 }
 0x13e   : > { %444 = vperm.xlu1 %3879, %v346_v27  }
 0x13f   : > { %1893 = vperm.xlu0 %3878, %v1879_v37  }
 0x140   : > { %3262 = vmatmul.mubr.f32.gmra.mrb[10].mxu0 %v5547_v1 }
 0x141   : > { %3264 = vmatprep.mubr.f32.mxu0 %v5548_v10  ;;  %v4916_v10 = vsub.f32 %v1912_v57, %v4892_v6 }
 0x142   : > { %1888 = vperm.xlu1 %3879, %v1878_v56  }
 0x143   : > { %5560 = vst [vmem:[#allocation21_spill] sm:$0xff] %v4916_v10 }
 0x144   : > { %3265 = vmatmul.mubr.f32.gmra.mrb[12].mxu0 %v5549_v3 }
 0x145   : > { %3267 = vmatprep.mubr.f32.mxu0 %v5550_v29 }
 0x146   : > { %1898 = vperm.xlu1 %3879, %v1880_v35  }
 0x148   : > { %3268 = vmatmul.mubr.f32.gmra.mrb[14].mxu0 %v5551_v38 }
 0x149   : > { %3270 = vmatprep.mubr.f32.mxu0 %v5552_v11  ;;  %v4925_v11 = vsub.f32 %v1875_v32, %v4902_v43 }
 0x14c   : > { %3271 = vmatmul.mubr.f32.gmra.mrb[16].mxu0 %v5553_v63 }
 0x14d   : > { %3273 = vmatprep.mubr.f32.mxu0 %v5554_v44 }
 0x150   : > { %3274 = vmatmul.mubr.f32.gmra.mrb[18].mxu0 %v772_v55 }
 0x151   : > { %3290 = vmatprep.mubr.f32.mxu0 %v4419_v23 }
 0x154   : > { %3291 = vmatmul.mubr.f32.vlgmr.msra.gmra.mrb[0].mxu0 %v4421_v24 }
 0x155   : > { %3427 = vmatpush3.bf16.msra.mxu0 %v4402_v15  ;;  %3293 = vmatprep.mubr.f32.mxu0 %v4437_v33  ;;  %v5458_v15 = vmov 0.0|0.0  }
 0x156   : > { %3429 = vmatprep.subr.bf16.mxu0 %v4411_v21  ;;  %3436 = vmatprep.subr.bf16.mxu1 %v5458_v15 }
 0x158   : > { %3294 = vmatmul.mubr.f32.gmra.mrb[2].mxu0 %v4439_v34 }
 0x159   : > { %3296 = vmatprep.mubr.f32.mxu0 %v4460_v45  ;;  %3431 = vmatpush3.bf16.msra.mxu0 %v4411_v21 }
 0x15a   : > { %3433 = vmatprep.subr.bf16.mxu0 %v4417_v22 }
 0x15c   : > { %3297 = vmatmul.mubr.f32.gmra.mrb[4].mxu0 %v4462_v46 }
 0x15d   : > { %3299 = vmatprep.mubr.f32.mxu0 %v4506_v19  ;;  %3435 = vmatpush3.bf16.msra.mxu0 %v4417_v22  ;;  %v360_v36 = vpop.permute.xlu1 %359 }
 0x15e   : > { %3332 = vmatprep.subr.mxu0 %v4405_v16 }
 0x160   : > { %3300 = vmatmul.mubr.f32.gmra.mrb[6].mxu0 %v4522_v47 }
 0x161   : > { %3302 = vmatprep.mubr.f32.mxu0 %v4524_v48  ;;  %3333 = vmatpush3.msra.mxu0 %v4405_v16  ;;  %v1870_v16 = vld [vmem:[#allocation8 + $0x8] sm:$0xff] }
 0x162   : > { %v1903_v21 = vsel %vm1901_vm1, %v1870_v16, 0 }
 0x163   : > { %v4852_v22 = vand.u32 4294901760, %v1903_v21 }
 0x164   : > { %3303 = vmatmul.mubr.f32.gmra.mrb[8].mxu0 %v4526_v51 }
 0x165   : > { %3305 = vmatprep.mubr.f32.mxu0 %v4543_v17 }
 0x168   : > { %3306 = vmatmul.mubr.f32.gmra.mrb[10].mxu0 %v4545_v2 }
 0x169   : > { %3308 = vmatprep.mubr.f32.mxu0 %v4582_v4 }
 0x16c   : > { %3309 = vmatmul.mubr.f32.gmra.mrb[12].mxu0 %v4600_v40 }
 0x16d   : > { %3311 = vmatprep.mubr.f32.mxu0 %v4603_v52 }
 0x170   : > { %3312 = vmatmul.mubr.f32.gmra.mrb[14].mxu0 %v4605_v39 }
 0x171   : > { %3314 = vmatprep.mubr.f32.mxu0 %v4629_v20 }
 0x174   : > { %3315 = vmatmul.mubr.f32.gmra.mrb[16].mxu0 %v4631_v50 }
 0x175   : > { %3317 = vmatprep.mubr.f32.mxu0 %v4650_v25 }
 0x178   : > { %3318 = vmatmul.mubr.f32.gmra.mrb[18].mxu0 %v4660_v8 }
 0x179   : > { %3334 = vmatprep.mubr.f32.mxu0 %v4419_v23  ;;  %v4855_v23 = vsub.f32 %v1903_v21, %v4852_v22 }
 0x17c   : > { %3335 = vmatmul.mubr.f32.vlgmr.msra.gmra.mrb[0].mxu0 %v4421_v24  ;;  %v5450_v24 = vand.u32 4294901760, %v4855_v23 }
 0x17d   : > { %3337 = vmatprep.mubr.f32.mxu0 %v4437_v33 }
 0x17e   : > { %v2001_v33 = vsub.f32 %v4855_v23, %v5450_v24 }
 0x180   : > { %3338 = vmatmul.mubr.f32.gmra.mrb[2].mxu0 %v4439_v34  ;;  %v2002_v34 = vand.u32 4294901760, %v2001_v33 }
 0x181   : > { %3340 = vmatprep.mubr.f32.mxu0 %v4460_v45  ;;  %v1869_v45 = vld [vmem:[#allocation8] sm:$0xff] }
 0x182   : > { %2003 = vmatprep.mubr.f32.mxu1 %v2002_v34 }
 0x184   : > { %3341 = vmatmul.mubr.f32.gmra.mrb[4].mxu0 %v4462_v46  ;;  %v1874_v46 = vld [vmem:[#allocation8 + $0x28] sm:$0xff] }
 0x185   : > { %3343 = vmatprep.mubr.f32.mxu0 %v4506_v19 }
 0x188   : > { %3344 = vmatmul.mubr.f32.gmra.mrb[6].mxu0 %v4522_v47  ;;  %v365_v47 = vpop.permute.xlu1 %364 }
 0x189   : > { %3346 = vmatprep.mubr.f32.mxu0 %v4524_v48 }
 0x18c   : > { %3347 = vmatmul.mubr.f32.gmra.mrb[8].mxu0 %v4526_v51  ;;  %v4862_v51 = vand.u32 4294901760, %v1869_v45 }
 0x18d   : > { %3349 = vmatprep.mubr.f32.mxu0 %v4543_v17  ;;  %v1909_v17 = vsel %vm1901_vm1, %v1874_v46, 0 }
 0x190   : > { %3350 = vmatmul.mubr.f32.gmra.mrb[10].mxu0 %v4545_v2 }
 0x191   : > { %3352 = vmatprep.mubr.f32.mxu0 %v4582_v4 }
 0x194   : > { %3353 = vmatmul.mubr.f32.gmra.mrb[12].mxu0 %v4600_v40  ;;  %v1872_v40 = vld [vmem:[#allocation8 + $0x18] sm:$0xff] }
 0x195   : > { %3355 = vmatprep.mubr.f32.mxu0 %v4603_v52  ;;  %v1906_v19 = vsel %vm1901_vm1, %v1872_v40, 0  ;;  %v4869_v52 = vand.u32 4294901760, %v1909_v17  ;;  %v5444_v40 = vand.u32 4294901760, %v4916_v10 }
 0x196   : > { %v4865_v2 = vand.u32 4294901760, %v1906_v19 }
 0x197   : > { %v4883_v13 = vsub.f32 %v1909_v17, %v4869_v52 }
 0x198   : > { %3356 = vmatmul.mubr.f32.gmra.mrb[14].mxu0 %v4605_v39  ;;  %v350_v39 = vpop.permute.xlu0 %349  ;;  %v4875_v61 = vsub.f32 %v1906_v19, %v4865_v2 }
 0x199   : > { %3358 = vmatprep.mubr.f32.mxu0 %v4629_v20  ;;  %v1871_v20 = vld [vmem:[#allocation8 + $0x10] sm:$0xff]  ;;  %5558 = vst [vmem:[#allocation18_spill] sm:$0xff] %v4883_v13  ;;  %v5446_v53 = vand.u32 4294901760, %v4883_v13 }
 0x19a   : > { %v4867_v4 = vand.u32 4294901760, %v1871_v20  ;;  %5556 = vst [vmem:[#allocation17_spill] sm:$0xff] %v4875_v61  ;;  %v5448_v30 = vand.u32 4294901760, %v4875_v61 }
 0x19b   : > { %v4921_v27 = vsub.f32 %v4883_v13, %v5446_v53 }
 0x19c   : > { %3359 = vmatmul.mubr.f32.gmra.mrb[16].mxu0 %v4631_v50  ;;  %v355_v48 = vpop.permute.xlu0 %354  ;;  %v4872_v50 = vsub.f32 %v1869_v45, %v4862_v51  ;;  %v4878_v55 = vsub.f32 %v1871_v20, %v4867_v4  ;;  %v4907_v26 = vsub.f32 %v4875_v61, %v5448_v30 }
 0x19d   : > { %3361 = vmatprep.mubr.f32.mxu0 %v4650_v25  ;;  %v1873_v25 = vld [vmem:[#allocation8 + $0x20] sm:$0xff] }
 0x19e   : > { %5555 = vst [vmem:[#allocation16_spill] sm:$0xff] %v4872_v50  ;;  %5557 = vst [vmem:[#allocation19_spill] sm:$0xff] %v4878_v55  ;;  %v4880_v9 = vand.u32 4294901760, %v1873_v25  ;;  %v5449_v31 = vand.u32 4294901760, %v4872_v50  ;;  %v5447_v7 = vand.u32 4294901760, %v4878_v55 }
 0x1a0   : > { %3362 = vmatmul.mubr.f32.gmra.mrb[18].mxu0 %v4660_v8  ;;  %v375_v8 = vpop.permute.xlu1 %374  ;;  %v370_v14 = vpop.permute.xlu0 %369  ;;  %v4890_v41 = vsub.f32 %v1873_v25, %v4880_v9  ;;  %v4900_v54 = vsub.f32 %v4872_v50, %v5449_v31  ;;  %v4912_v0 = vsub.f32 %v4878_v55, %v5447_v7 }
 0x1a2   : > { %5559 = vst [vmem:[#allocation20_spill] sm:$0xff] %v4890_v41  ;;  %v5445_v18 = vand.u32 4294901760, %v4890_v41 }
 0x1a4   : > { %v385_v5 = vpop.permute.xlu1 %384  ;;  %v4895_v12 = vpop.permute.xlu0 %379 }
 0x1a8   : > { %v395_v37 = vpop.permute.xlu1 %394  ;;  %v390_v21 = vpop.permute.xlu0 %389 }
 0x24f   : > { %v3336_v42 = vpop.f32.mrb[0].mxu0 }
 0x250   : > { %v3616_v60 = vadd.f32 %v3336_v42, %v355_v48  ;;  %v1731_v59 = vpop.f32.mrb[1].mxu0 }
 0x251   : > { %v3617_v62 = vadd.f32 %v1731_v59, %v350_v39  ;;  %v4934_v39 = vsub.f32 %v4890_v41, %v5445_v18 }
 0x252   : > { %v1850_v1 = vmax.f32 %v3616_v60, 0.0 }
 0x253   : > { %v1849_v58 = vmax.f32 %v3617_v62, 0.0  ;;  %v3339_v3 = vpop.f32.mrb[2].mxu0 }
 0x254   : > { %v1918_v29 = vand.u32 4294901760, %v1850_v1  ;;  %v3618_v28 = vadd.f32 %v3339_v3, %v365_v47  ;;  %v1743_v38 = vpop.f32.mrb[3].mxu0 }
 0x255   : > { %v1915_v63 = vand.u32 4294901760, %v1849_v58  ;;  %v3619_v35 = vadd.f32 %v1743_v38, %v360_v36 }
 0x256   : > { %v4929_v33 = vsub.f32 %v1850_v1, %v1918_v29  ;;  %v1852_v34 = vmax.f32 %v3618_v28, 0.0 }
 0x257   : > { %v4937_v45 = vsub.f32 %v1849_v58, %v1915_v63  ;;  %v1851_v46 = vmax.f32 %v3619_v35, 0.0  ;;  %v3342_v19 = vpop.f32.mrb[4].mxu0  ;;  %v4939_v36 = vpack.c.bf16 %v1918_v29, %v1915_v63  ;;  %v400_v63 = vpop.permute.xlu0 %399 }
 0x258   : > { %v5456_v47 = vand.u32 4294901760, %v4929_v33  ;;  %v1924_v48 = vand.u32 4294901760, %v1852_v34  ;;  %v3620_v17 = vadd.f32 %v3342_v19, %v375_v8  ;;  %v1755_v25 = vpop.f32.mrb[5].mxu0  ;;  %v4957_v8 = vsub.f32 %v4916_v10, %v5444_v40 }
 0x259   : > { %5561 = vst [vmem:[#allocation22_spill] sm:$0xff] %v4939_v36  ;;  %v5457_v57 = vand.u32 4294901760, %v4937_v45  ;;  %v1921_v32 = vand.u32 4294901760, %v1851_v46  ;;  %v3621_v42 = vadd.f32 %v1755_v25, %v370_v14  ;;  %3438 = vmatpush1.bf16.msra.mxu1 %v4939_v36  ;;  %v405_v14 = vpop.permute.xlu1 %404 }
 0x25a   : > { %v2070_v59 = vsub.f32 %v4929_v33, %v5456_v47  ;;  %v4951_v62 = vsub.f32 %v1852_v34, %v1924_v48  ;;  %v1854_v1 = vmax.f32 %v3620_v17, 0.0  ;;  %3439 = vmatprep.subr.bf16.mxu1 %v5458_v15 }
 0x25b   : > { %v2063_v58 = vsub.f32 %v4937_v45, %v5457_v57  ;;  %v4962_v3 = vsub.f32 %v1851_v46, %v1921_v32  ;;  %v1853_v29 = vmax.f32 %v3621_v42, 0.0  ;;  %v3345_v28 = vpop.f32.mrb[6].mxu0  ;;  %v4964_v38 = vpack.c.bf16 %v1924_v48, %v1921_v32 }
 0x25c   : > { %v2071_v35 = vand.u32 4294901760, %v2070_v59  ;;  %v5452_v34 = vand.u32 4294901760, %v4951_v62  ;;  %v1930_v19 = vand.u32 4294901760, %v1854_v1  ;;  %v3622_v17 = vadd.f32 %v3345_v28, %v385_v5  ;;  %v1767_v25 = vpop.f32.mrb[7].mxu0 }
 0x25d   : > { %5562 = vst [vmem:[#allocation23_spill] sm:$0xff] %v4964_v38  ;;  %v2064_v40 = vand.u32 4294901760, %v2063_v58  ;;  %v5455_v18 = vand.u32 4294901760, %v4962_v3  ;;  %v1927_v53 = vand.u32 4294901760, %v1853_v29  ;;  %v3623_v7 = vadd.f32 %v1767_v25, %v4895_v12  ;;  %3441 = vmatpush1.bf16.msra.mxu1 %v4964_v38  ;;  %v415_v24 = vpop.permute.xlu1 %414 }
 0x25e   : > { %v2084_v46 = vsub.f32 %v4951_v62, %v5452_v34  ;;  %v4973_v48 = vsub.f32 %v1854_v1, %v1930_v19  ;;  %v1856_v32 = vmax.f32 %v3622_v17, 0.0  ;;  %3442 = vmatprep.subr.bf16.mxu1 %v5458_v15 }
 0x25f   : > { %v2077_v42 = vsub.f32 %v4962_v3, %v5455_v18  ;;  %v4981_v59 = vsub.f32 %v1853_v29, %v1927_v53  ;;  %v1855_v12 = vmax.f32 %v3623_v7, 0.0  ;;  %v3348_v58 = vpop.f32.mrb[8].mxu0  ;;  %v4983_v28 = vpack.c.bf16 %v1930_v19, %v1927_v53  ;;  %v410_v29 = vpop.permute.xlu0 %409 }
 0x260   : > { %v2085_v25 = vand.u32 4294901760, %v2084_v46  ;;  %v5451_v1 = vand.u32 4294901760, %v4973_v48  ;;  %v1936_v30 = vand.u32 4294901760, %v1856_v32  ;;  %v3624_v17 = vadd.f32 %v3348_v58, %v395_v37  ;;  %v1779_v31 = vpop.f32.mrb[9].mxu0 }
 0x261   : > { %5563 = vst [vmem:[#allocation24_spill] sm:$0xff] %v4983_v28  ;;  %v2078_v60 = vand.u32 4294901760, %v2077_v42  ;;  %v5453_v5 = vand.u32 4294901760, %v4981_v59  ;;  %v1933_v20 = vand.u32 4294901760, %v1855_v12  ;;  %v3625_v49 = vadd.f32 %v1779_v31, %v390_v21  ;;  %3444 = vmatpush1.bf16.msra.mxu1 %v4983_v28 }
 0x262   : > { %v2098_v7 = vsub.f32 %v4973_v48, %v5451_v1  ;;  %v4991_v53 = vsub.f32 %v1856_v32, %v1936_v30  ;;  %v1858_v19 = vmax.f32 %v3624_v17, 0.0  ;;  %3445 = vmatprep.subr.bf16.mxu1 %v5458_v15  ;;  %v4994_v37 = vpack.c.bf16 %v2071_v35, %v2064_v40 }
 0x263   : > { %v2091_v46 = vsub.f32 %v4981_v59, %v5453_v5  ;;  %v4999_v42 = vsub.f32 %v1855_v12, %v1933_v20  ;;  %v1857_v31 = vmax.f32 %v3625_v49, 0.0  ;;  %v3351_v21 = vpop.f32.mrb[10].mxu0  ;;  %v5001_v58 = vpack.c.bf16 %v1936_v30, %v1933_v20  ;;  %v420_v5 = vpop.permute.xlu0 %419 }
 0x264   : > { %v2099_v16 = vand.u32 4294901760, %v2098_v7  ;;  %v5454_v44 = vand.u32 4294901760, %v4991_v53  ;;  %v1942_v32 = vand.u32 4294901760, %v1858_v19  ;;  %v3626_v56 = vadd.f32 %v3351_v21, %v405_v14  ;;  %v1791_v17 = vpop.f32.mrb[11].mxu0  ;;  %v425_v14 = vpop.permute.xlu1 %424 }
 0x265   : > { %5564 = vst [vmem:[#allocation25_spill] sm:$0xff] %v5001_v58  ;;  %v2092_v1 = vand.u32 4294901760, %v2091_v46  ;;  %v5460_v40 = vand.u32 4294901760, %v4999_v42  ;;  %v1939_v35 = vand.u32 4294901760, %v1857_v31  ;;  %v3627_v34 = vadd.f32 %v1791_v17, %v400_v63  ;;  %3447 = vmatpush1.bf16.msra.mxu1 %v5001_v58 }
 0x266   : > { %v2112_v49 = vsub.f32 %v4991_v53, %v5454_v44  ;;  %v5009_v12 = vsub.f32 %v1858_v19, %v1942_v32  ;;  %v1860_v30 = vmax.f32 %v3626_v56, 0.0  ;;  %3448 = vmatprep.subr.bf16.mxu1 %v5458_v15  ;;  %v5012_v20 = vpack.c.bf16 %v2085_v25, %v2078_v60 }
 0x267   : > { %v2105_v7 = vsub.f32 %v4999_v42, %v5460_v40  ;;  %v5017_v46 = vsub.f32 %v1857_v31, %v1939_v35  ;;  %v1859_v63 = vmax.f32 %v3627_v34, 0.0  ;;  %v3354_v21 = vpop.f32.mrb[12].mxu0  ;;  %v5019_v17 = vpack.c.bf16 %v1942_v32, %v1939_v35 }
 0x268   : > { %v2113_v44 = vand.u32 4294901760, %v2112_v49  ;;  %v5461_v19 = vand.u32 4294901760, %v5009_v12  ;;  %v1948_v56 = vand.u32 4294901760, %v1860_v30  ;;  %v3628_v18 = vadd.f32 %v3354_v21, %v415_v24  ;;  %v1803_v47 = vpop.f32.mrb[13].mxu0  ;;  %v435_v58 = vpop.permute.xlu1 %434 }
 0x269   : > { %5565 = vst [vmem:[#allocation26_spill] sm:$0xff] %v5019_v17  ;;  %v2106_v60 = vand.u32 4294901760, %v2105_v7  ;;  %v5470_v25 = vand.u32 4294901760, %v5017_v46  ;;  %v1945_v57 = vand.u32 4294901760, %v1859_v63  ;;  %v3629_v15 = vadd.f32 %v1803_v47, %v410_v29  ;;  %3450 = vmatpush1.bf16.msra.mxu1 %v5019_v17 }
 0x26a   : > { %v2126_v34 = vsub.f32 %v5009_v12, %v5461_v19  ;;  %v5027_v31 = vsub.f32 %v1860_v30, %v1948_v56  ;;  %v1862_v32 = vmax.f32 %v3628_v18, 0.0  ;;  %v5566_v35 = vmov 0.0|0.0  }
 0x26b   : > { %3451 = vmatprep.subr.bf16.mxu1 %v5566_v35  ;;  %v5030_v49 = vpack.c.bf16 %v2099_v16, %v2092_v1  ;;  %v2119_v24 = vsub.f32 %v5017_v46, %v5470_v25  ;;  %v5035_v7 = vsub.f32 %v1859_v63, %v1945_v57  ;;  %v1861_v47 = vmax.f32 %v3629_v15, 0.0  ;;  %v3357_v29 = vpop.f32.mrb[14].mxu0  ;;  %v430_v63 = vpop.permute.xlu0 %429 }
 0x26c   : > { %v5037_v21 = vpack.c.bf16 %v1948_v56, %v1945_v57  ;;  %v2127_v40 = vand.u32 4294901760, %v2126_v34  ;;  %v5471_v19 = vand.u32 4294901760, %v5027_v31  ;;  %v1954_v30 = vand.u32 4294901760, %v1862_v32  ;;  %v1815_v18 = vpop.f32.mrb[15].mxu0 }
 0x26d   : > { %v3630_v17 = vadd.f32 %v3357_v29, %v425_v14  ;;  %v2120_v10 = vand.u32 4294901760, %v2119_v24  ;;  %v5478_v16 = vand.u32 4294901760, %v5035_v7  ;;  %v1951_v1 = vand.u32 4294901760, %v1861_v47 }
 0x26e   : > { %5567 = vst [vmem:[#allocation27_spill] sm:$0xff] %v5037_v21  ;;  %v3631_v28 = vadd.f32 %v1815_v18, %v420_v5  ;;  %3453 = vmatpush1.bf16.msra.mxu1 %v5037_v21  ;;  %v2140_v15 = vsub.f32 %v5027_v31, %v5471_v19  ;;  %v5045_v57 = vsub.f32 %v1862_v32, %v1954_v30 }
 0x26f   : > { %v1864_v56 = vmax.f32 %v3630_v17, 0.0  ;;  %3454 = vmatprep.subr.bf16.mxu1 %v5566_v35  ;;  %v5048_v14 = vpack.c.bf16 %v2113_v44, %v2106_v60  ;;  %v2133_v34 = vsub.f32 %v5035_v7, %v5478_v16  ;;  %v5053_v24 = vsub.f32 %v1861_v47, %v1951_v1  ;;  %v3360_v29 = vpop.f32.mrb[16].mxu0  ;;  %v440_v16 = vpop.permute.xlu0 %439 }
 0x270   : > { %v1863_v5 = vmax.f32 %v3631_v28, 0.0  ;;  %v5055_v18 = vpack.c.bf16 %v1954_v30, %v1951_v1  ;;  %v2141_v25 = vand.u32 4294901760, %v2140_v15  ;;  %v5479_v19 = vand.u32 4294901760, %v5045_v57  ;;  %v1827_v17 = vpop.f32.mrb[17].mxu0 }
 0x271   : > { %v1960_v32 = vand.u32 4294901760, %v1864_v56  ;;  %v3632_v21 = vadd.f32 %v3360_v29, %v435_v58  ;;  %v2134_v41 = vand.u32 4294901760, %v2133_v34  ;;  %v5488_v44 = vand.u32 4294901760, %v5053_v24  ;;  %v445_v58 = vpop.permute.xlu1 %444 }
 0x272   : > { %5568 = vst [vmem:[#allocation28_spill] sm:$0xff] %v5055_v18  ;;  %v1957_v60 = vand.u32 4294901760, %v1863_v5  ;;  %v3633_v13 = vadd.f32 %v1827_v17, %v430_v63  ;;  %3456 = vmatpush1.bf16.msra.mxu1 %v5055_v18  ;;  %v2154_v28 = vsub.f32 %v5045_v57, %v5479_v19  ;;  %v5066_v1 = vpack.c.bf16 %v2127_v40, %v2120_v10 }
 0x273   : > { %v5063_v47 = vsub.f32 %v1864_v56, %v1960_v32  ;;  %v1866_v30 = vmax.f32 %v3632_v21, 0.0  ;;  %3457 = vmatprep.subr.bf16.mxu1 %v5566_v35  ;;  %v2147_v15 = vsub.f32 %v5053_v24, %v5488_v44  ;;  %v3363_v29 = vpop.f32.mrb[18].mxu0 }
 0x274   : > { %v5071_v34 = vsub.f32 %v1863_v5, %v1957_v60  ;;  %v1865_v63 = vmax.f32 %v3633_v13, 0.0  ;;  %v5073_v17 = vpack.c.bf16 %v1960_v32, %v1957_v60  ;;  %v2155_v19 = vand.u32 4294901760, %v2154_v28  ;;  %v1839_v38 = vpop.f32.mrb[19].mxu0 }
 0x275   : > { %v2167_v56 = vand.u32 4294901760, %v5063_v47  ;;  %v1966_v21 = vand.u32 4294901760, %v1866_v30  ;;  %v3634_v18 = vadd.f32 %v3363_v29, %v445_v58  ;;  %v2148_v10 = vand.u32 4294901760, %v2147_v15 }
 0x276   : > { %5569 = vst [vmem:[#allocation29_spill] sm:$0xff] %v5073_v17  ;;  %v2160_v40 = vand.u32 4294901760, %v5071_v34  ;;  %v1963_v55 = vand.u32 4294901760, %v1865_v63  ;;  %v3635_v61 = vadd.f32 %v1839_v38, %v440_v16  ;;  %3459 = vmatpush1.bf16.msra.mxu1 %v5073_v17  ;;  %v5082_v60 = vpack.c.bf16 %v2141_v25, %v2134_v41 }
 0x277   : > { %v2168_v5 = vsub.f32 %v5063_v47, %v2167_v56  ;;  %v5079_v13 = vsub.f32 %v1866_v30, %v1966_v21  ;;  %v1868_v32 = vmax.f32 %v3634_v18, 0.0  ;;  %3460 = vmatprep.subr.bf16.mxu1 %v5566_v35  ;;  %v5090_v17 = vpack.c.bf16 %v2155_v19, %v2148_v10 }
 0x278   : > { %v2161_v28 = vsub.f32 %v5071_v34, %v2160_v40  ;;  %v5085_v58 = vsub.f32 %v1865_v63, %v1963_v55  ;;  %v1867_v15 = vmax.f32 %v3635_v61, 0.0  ;;  %v5087_v29 = vpack.c.bf16 %v1966_v21, %v1963_v55 }
 0x279   : > { %5570 = vst [vmem:[#allocation30_spill] sm:$0xff] %v5079_v13  ;;  %v2169_v44 = vand.u32 4294901760, %v2168_v5  ;;  %v2181_v38 = vand.u32 4294901760, %v5079_v13  ;;  %v1972_v16 = vand.u32 4294901760, %v1868_v32 }
 0x27a   : > { %5571 = vst [vmem:[#allocation31_spill] sm:$0xff] %v5085_v58  ;;  %5572 = vst [vmem:[#allocation32_spill] sm:$0xff] %v5087_v29  ;;  %v2162_v30 = vand.u32 4294901760, %v2161_v28  ;;  %v2174_v18 = vand.u32 4294901760, %v5085_v58  ;;  %v1969_v36 = vand.u32 4294901760, %v1867_v15  ;;  %3462 = vmatpush1.bf16.msra.mxu1 %v5087_v29  ;;  %v5578_v29 = vand.u32 4294901760, %v4962_v3 }
 0x27b   : > { %v2182_v25 = vsub.f32 %v5079_v13, %v2181_v38  ;;  %v5097_v61 = vsub.f32 %v1868_v32, %v1972_v16  ;;  %3463 = vmatprep.subr.bf16.mxu1 %v5566_v35  ;;  %v5585_v13 = vand.u32 4294901760, %v4900_v54 }
 0x27c   : > { %v2175_v63 = vsub.f32 %v5085_v58, %v2174_v18  ;;  %v5105_v21 = vsub.f32 %v1867_v15, %v1969_v36  ;;  %v5107_v10 = vpack.c.bf16 %v1972_v16, %v1969_v36  ;;  %v3488_v5 = vpack.c.bf16 %v2169_v44, %v2162_v30 }
 0x27d   : > { %5573 = vst [vmem:[#allocation33_spill] sm:$0xff] %v5097_v61  ;;  %v2183_v28 = vand.u32 4294901760, %v2182_v25  ;;  %v2195_v41 = vand.u32 4294901760, %v5097_v61  ;;  %v5575_v30 = vand.u32 4294901760, %v4937_v45  ;;  %v5576_v25 = vand.u32 4294901760, %v4929_v33 }
 0x27e   : > { %5574 = vst [vmem:[#allocation34_spill] sm:$0xff] %v5107_v10  ;;  %v2176_v55 = vand.u32 4294901760, %v2175_v63  ;;  %v2188_v50 = vand.u32 4294901760, %v5105_v21  ;;  %3465 = vmatpush1.bf16.msra.mxu1 %v5107_v10  ;;  %v5579_v15 = vand.u32 4294901760, %v4951_v62  ;;  %v5580_v10 = vand.u32 4294901760, %v4981_v59 }
 0x27f   : > { %v2196_v44 = vsub.f32 %v5097_v61, %v2195_v41  ;;  %3466 = vmatprep.subr.bf16.mxu1 %v5566_v35  ;;  %v5128_v63 = vpack.c.bf16 %v5576_v25, %v5575_v30  ;;  %v5581_v58 = vand.u32 4294901760, %v4973_v48  ;;  %v5583_v61 = vand.u32 4294901760, %v4999_v42 }
 0x280   : > { %v5134_v32 = vpack.c.bf16 %v5579_v15, %v5578_v29  ;;  %v2189_v36 = vsub.f32 %v5105_v21, %v2188_v50  ;;  %v3491_v19 = vpack.c.bf16 %v2183_v28, %v2176_v55  ;;  %v5584_v30 = vand.u32 4294901760, %v4991_v53 }
 0x281   : > { %5577 = vst [vmem:[#allocation35_spill] sm:$0xff] %v5128_v63  ;;  %v5141_v16 = vpack.c.bf16 %v5581_v58, %v5580_v10  ;;  %v2197_v63 = vand.u32 4294901760, %v2196_v44  ;;  %2009 = vmatmul.mubr.f32.vlgmr.msra.gmra.mrb[0].mxu1 %v5585_v13  ;;  %v5586_v29 = vand.u32 4294901760, %v5017_v46  ;;  %v5587_v55 = vand.u32 4294901760, %v5009_v12 }
 0x282   : > { %v5147_v25 = vpack.c.bf16 %v5584_v30, %v5583_v61  ;;  %v5588_v15 = vand.u32 4294901760, %v5035_v7  ;;  %v5589_v58 = vand.u32 4294901760, %v5027_v31  ;;  %v5591_v61 = vand.u32 4294901760, %v5045_v57  ;;  %3468 = vmatpush1.bf16.msra.mxu1 %v4994_v37 }
 0x283   : > { %5582 = vst [vmem:[#allocation36_spill] sm:$0xff] %v5141_v16  ;;  %v5155_v28 = vpack.c.bf16 %v5587_v55, %v5586_v29  ;;  %v5590_v16 = vand.u32 4294901760, %v5053_v24  ;;  %v2190_v54 = vand.u32 4294901760, %v2189_v36  ;;  %v5592_v13 = vand.u32 4294901760, %v4907_v26  ;;  %3469 = vmatprep.subr.bf16.mxu1 %v5566_v35 }
 0x284   : > { %v5161_v10 = vpack.c.bf16 %v5589_v58, %v5588_v15  ;;  %v5172_v30 = vpack.c.bf16 %v2167_v56, %v2160_v40  ;;  %v5174_v29 = vpack.c.bf16 %v2181_v38, %v2174_v18  ;;  %v5176_v55 = vpack.c.bf16 %v2195_v41, %v2188_v50  ;;  %v5621_v40 = vld [vmem:[#allocation27_spill] sm:$0xff]  ;;  %v5623_v38 = vld [vmem:[#allocation29_spill] sm:$0xff] }
 0x285   : > { %v5167_v44 = vpack.c.bf16 %v5591_v61, %v5590_v16  ;;  %2018 = vmatprep.mubr.f32.mxu1 %v5592_v13  ;;  %v3494_v15 = vpack.c.bf16 %v2197_v63, %v2190_v54  ;;  %v5593_v58 = vand.u32 4294901760, %v4912_v0  ;;  %v2038_v16 = vand.u32 4294901760, %v4934_v39  ;;  %v5625_v18 = vld [vmem:[#allocation34_spill] sm:$0xff] }
 0x286   : > { %v5594_v36 = vand.u32 4294901760, %v4925_v11  ;;  %3471 = vmatpush1.bf16.msra.mxu1 %v5012_v20  ;;  %v5595_v26 = vand.u32 4294901760, %v4921_v27  ;;  %v2047_v50 = vand.u32 4294901760, %v4957_v8  ;;  %v5596_v0 = vpack.c.bf16 %v4929_v33, %v4937_v45  ;;  %v5609_v20 = vld [vmem:[#allocation16_spill] sm:$0xff] }
 0x287   : > { %2024 = vmatmul.mubr.f32.gmra.mrb[2].mxu1 %v5593_v58  ;;  %3472 = vmatprep.subr.bf16.mxu1 %v5566_v35  ;;  %v5597_v27 = vpack.c.bf16 %v4951_v62, %v4962_v3  ;;  %v5598_v33 = vpack.c.bf16 %v4973_v48, %v4981_v59  ;;  %v5599_v39 = vpack.c.bf16 %v4991_v53, %v4999_v42  ;;  %v5604_v48 = vld [vmem:[#allocation30_spill] sm:$0xff]  ;;  %v5605_v59 = vld [vmem:[#allocation31_spill] sm:$0xff]  ;;  %v5607_v42 = vld [vmem:[#allocation33_spill] sm:$0xff]  ;;  %v5626_v41 = vand.u32 4294901760, %v5609_v20 }
 0x288   : > { %v2052_v37 = vsub.f32 %v4925_v11, %v5594_v36  ;;  %2033 = vmatprep.mubr.f32.mxu1 %v5595_v26  ;;  %v5600_v45 = vpack.c.bf16 %v5009_v12, %v5017_v46  ;;  %v5601_v62 = vpack.c.bf16 %v5027_v31, %v5035_v7  ;;  %v5602_v8 = vpack.c.bf16 %v5045_v57, %v5053_v24  ;;  %v5610_v46 = vld [vmem:[#allocation22_spill] sm:$0xff]  ;;  %v5611_v31 = vld [vmem:[#allocation17_spill] sm:$0xff]  ;;  %v5613_v7 = vld [vmem:[#allocation23_spill] sm:$0xff] }
 0x289   : > { %v5603_v3 = vpack.c.bf16 %v5063_v47, %v5071_v34  ;;  %v5606_v53 = vpack.c.bf16 %v5604_v48, %v5605_v59  ;;  %v5608_v12 = vpack.c.bf16 %v5607_v42, %v5105_v21  ;;  %v5614_v57 = vld [vmem:[#allocation18_spill] sm:$0xff]  ;;  %v5616_v24 = vld [vmem:[#allocation24_spill] sm:$0xff]  ;;  %v5617_v47 = vld [vmem:[#allocation21_spill] sm:$0xff]  ;;  %v5619_v34 = vand.u32 4294901760, %v4855_v23 }
 0x28a   : > { %v2053_v56 = vand.u32 4294901760, %v2052_v37  ;;  %3474 = vmatpush1.bf16.msra.mxu1 %v5030_v49  ;;  %v5612_v49 = vld [vmem:[#allocation19_spill] sm:$0xff]  ;;  %v5628_v21 = vand.u32 4294901760, %v5611_v31  ;;  %v5630_v63 = vand.u32 4294901760, %v5614_v57  ;;  %v5632_v54 = vld [vmem:[#allocation36_spill] sm:$0xff]  ;;  %v5633_v13 = vand.u32 4294901760, %v5617_v47 }
 0x28b   : > { %2039 = vmatmul.mubr.f32.gmra.mrb[4].mxu1 %v2038_v16  ;;  %3475 = vmatprep.subr.bf16.mxu1 %v5566_v35 }
 0x28c   : > { %2048 = vmatprep.mubr.f32.mxu1 %v2047_v50 }
 0x28e   : > { %3477 = vmatpush1.bf16.msra.mxu1 %v5048_v14  ;;  %v5615_v14 = vld [vmem:[#allocation20_spill] sm:$0xff] }
 0x28f   : > { %2054 = vmatmul.mubr.f32.gmra.mrb[6].mxu1 %v2053_v56  ;;  %3478 = vmatprep.subr.bf16.mxu1 %v5566_v35  ;;  %v5631_v61 = vand.u32 4294901760, %v5615_v14 }
 0x290   : > { %2224 = vmatprep.mubr.f32.mxu1 %v4852_v22 }
 0x292   : > { %3480 = vmatpush1.bf16.msra.mxu1 %v5066_v1  ;;  %v5618_v1 = vld [vmem:[#allocation25_spill] sm:$0xff] }
 0x293   : > { %3481 = vmatprep.subr.bf16.mxu1 %v5566_v35 }
 0x296   : > { %3483 = vmatpush1.bf16.msra.mxu1 %v5082_v60  ;;  %v5622_v60 = vld [vmem:[#allocation28_spill] sm:$0xff] }
 0x297   : > { %3484 = vmatprep.subr.bf16.mxu1 %v5566_v35 }
 0x29a   : > { %3486 = vmatpush1.bf16.msra.mxu1 %v5090_v17  ;;  %v5620_v17 = vld [vmem:[#allocation26_spill] sm:$0xff] }
 0x29b   : > { %3487 = vmatprep.subr.bf16.mxu1 %v5566_v35 }
 0x29e   : > { %3489 = vmatpush1.bf16.msra.mxu1 %v3488_v5  ;;  %v5629_v5 = vand.u32 4294901760, %v5612_v49 }
 0x29f   : > { %3490 = vmatprep.subr.bf16.mxu1 %v5566_v35 }
 0x2a2   : > { %3492 = vmatpush1.bf16.msra.mxu1 %v3491_v19  ;;  %v5627_v19 = vld [vmem:[#allocation35_spill] sm:$0xff] }
 0x2a3   : > { %3493 = vmatprep.subr.bf16.mxu1 %v5566_v35 }
 0x2a6   : > { %3495 = vmatpush1.bf16.msra.mxu1 %v3494_v15  ;;  %v5634_v15 = vmov %v5594_v36 }
 0x2a7   : > { %3496 = vmatprep.subr.bf16.mxu1 %v5566_v35 }
 0x2a9   : > { %2226 = vmatmul.mubr.f32.vlgmr.msra.gmra.mrb[0].mxu1 %v4862_v51 }
 0x2aa   : > { %3498 = vmatpush1.bf16.msra.mxu1 %v5596_v0  ;;  %2231 = vmatprep.mubr.f32.mxu1 %v4865_v2 }
 0x2ab   : > { %3499 = vmatprep.subr.bf16.mxu1 %v5566_v35 }
 0x2ad   : > { %2233 = vmatmul.mubr.f32.gmra.mrb[2].mxu1 %v4867_v4 }
 0x2ae   : > { %3501 = vmatpush1.bf16.msra.mxu1 %v5597_v27  ;;  %2238 = vmatprep.mubr.f32.mxu1 %v4869_v52 }
 0x2af   : > { %3502 = vmatprep.subr.bf16.mxu1 %v5566_v35 }
 0x2b1   : > { %2240 = vmatmul.mubr.f32.gmra.mrb[4].mxu1 %v4880_v9 }
 0x2b2   : > { %3504 = vmatpush1.bf16.msra.mxu1 %v5598_v33  ;;  %2245 = vmatprep.mubr.f32.mxu1 %v4892_v6 }
 0x2b3   : > { %3505 = vmatprep.subr.bf16.mxu1 %v5566_v35 }
 0x2b5   : > { %2247 = vmatmul.mubr.f32.gmra.mrb[6].mxu1 %v4902_v43 }
 0x2b6   : > { %3507 = vmatpush1.bf16.msra.mxu1 %v5599_v39  ;;  %2358 = vmatprep.mubr.f32.mxu1 %v4855_v23  ;;  %v5624_v23 = vld [vmem:[#allocation32_spill] sm:$0xff] }
 0x2b7   : > { %3508 = vmatprep.subr.bf16.mxu1 %v5566_v35 }
 0x2ba   : > { %3510 = vmatpush1.bf16.msra.mxu1 %v5600_v45 }
 0x2bb   : > { %3511 = vmatprep.subr.bf16.mxu1 %v5566_v35 }
 0x2be   : > { %3513 = vmatpush1.bf16.msra.mxu1 %v5601_v62 }
 0x2bf   : > { %3514 = vmatprep.subr.bf16.mxu1 %v5566_v35 }
 0x2c2   : > { %3516 = vmatpush1.bf16.msra.mxu1 %v5602_v8 }
 0x2c3   : > { %3517 = vmatprep.subr.bf16.mxu1 %v5566_v35 }
 0x2c6   : > { %3519 = vmatpush1.bf16.msra.mxu1 %v5603_v3 }
 0x2c7   : > { %3520 = vmatprep.subr.bf16.mxu1 %v5566_v35 }
 0x2ca   : > { %3522 = vmatpush1.bf16.msra.mxu1 %v5606_v53 }
 0x2cb   : > { %3523 = vmatprep.subr.bf16.mxu1 %v5566_v35 }
 0x2ce   : > { %3525 = vmatpush1.bf16.msra.mxu1 %v5608_v12 }
 0x2cf   : > { %3526 = vmatprep.subr.bf16.mxu1 %v5566_v35 }
 0x2d1   : > { %2361 = vmatmul.mubr.f32.vlgmr.msra.gmra.mrb[0].mxu1 %v5609_v20 }
 0x2d2   : > { %3528 = vmatpush1.bf16.msra.mxu1 %v5610_v46  ;;  %2367 = vmatprep.mubr.f32.mxu1 %v5611_v31 }
 0x2d3   : > { %3529 = vmatprep.subr.bf16.mxu1 %v5566_v35 }
 0x2d5   : > { %2370 = vmatmul.mubr.f32.gmra.mrb[2].mxu1 %v5612_v49 }
 0x2d6   : > { %3531 = vmatpush1.bf16.msra.mxu1 %v5613_v7  ;;  %2376 = vmatprep.mubr.f32.mxu1 %v5614_v57 }
 0x2d7   : > { %3532 = vmatprep.subr.bf16.mxu1 %v5566_v35 }
 0x2d9   : > { %2379 = vmatmul.mubr.f32.gmra.mrb[4].mxu1 %v5615_v14 }
 0x2da   : > { %3534 = vmatpush1.bf16.msra.mxu1 %v5616_v24  ;;  %2385 = vmatprep.mubr.f32.mxu1 %v5617_v47 }
 0x2db   : > { %3535 = vmatprep.subr.bf16.mxu1 %v5566_v35 }
 0x2dd   : > { %2388 = vmatmul.mubr.f32.gmra.mrb[6].mxu1 %v4925_v11 }
 0x2de   : > { %3537 = vmatpush1.bf16.msra.mxu1 %v5618_v1  ;;  %2480 = vmatprep.mubr.f32.mxu1 %v5619_v34 }
 0x2df   : > { %3538 = vmatprep.subr.bf16.mxu1 %v5566_v35 }
 0x2e2   : > { %3540 = vmatpush1.bf16.msra.mxu1 %v5620_v17 }
 0x2e3   : > { %3541 = vmatprep.subr.bf16.mxu1 %v5566_v35 }
 0x2e6   : > { %3543 = vmatpush1.bf16.msra.mxu1 %v5621_v40 }
 0x2e7   : > { %3544 = vmatprep.subr.bf16.mxu1 %v5566_v35 }
 0x2ea   : > { %3546 = vmatpush1.bf16.msra.mxu1 %v5622_v60 }
 0x2eb   : > { %3547 = vmatprep.subr.bf16.mxu1 %v5566_v35 }
 0x2ee   : > { %3549 = vmatpush1.bf16.msra.mxu1 %v5623_v38 }
 0x2ef   : > { %3550 = vmatprep.subr.bf16.mxu1 %v5566_v35 }
 0x2f2   : > { %3552 = vmatpush1.bf16.msra.mxu1 %v5624_v23 }
 0x2f3   : > { %3553 = vmatprep.subr.bf16.mxu1 %v5566_v35 }
 0x2f6   : > { %3555 = vmatpush1.bf16.msra.mxu1 %v5625_v18 }
 0x2f7   : > { %3556 = vmatprep.subr.bf16.mxu1 %v5566_v35 }
 0x2f9   : > { %2484 = vmatmul.mubr.f32.vlgmr.msra.gmra.mrb[0].mxu1 %v5626_v41 }
 0x2fa   : > { %3558 = vmatpush1.bf16.msra.mxu1 %v5627_v19  ;;  %2491 = vmatprep.mubr.f32.mxu1 %v5628_v21 }
 0x2fb   : > { %3559 = vmatprep.subr.bf16.mxu1 %v5566_v35 }
 0x2fd   : > { %2495 = vmatmul.mubr.f32.gmra.mrb[2].mxu1 %v5629_v5 }
 0x2fe   : > { %3561 = vmatpush1.bf16.msra.mxu1 %v5134_v32  ;;  %2502 = vmatprep.mubr.f32.mxu1 %v5630_v63 }
 0x2ff   : > { %3562 = vmatprep.subr.bf16.mxu1 %v5566_v35 }
 0x301   : > { %2506 = vmatmul.mubr.f32.gmra.mrb[4].mxu1 %v5631_v61 }
 0x302   : > { %3564 = vmatpush1.bf16.msra.mxu1 %v5632_v54  ;;  %2513 = vmatprep.mubr.f32.mxu1 %v5633_v13 }
 0x303   : > { %3565 = vmatprep.subr.bf16.mxu1 %v5566_v35 }
 0x305   : > { %2517 = vmatmul.mubr.f32.gmra.mrb[6].mxu1 %v5634_v15 }
 0x306   : > { %3567 = vmatpush1.bf16.msra.mxu1 %v5147_v25  ;;  %2647 = vmatprep.mubr.f32.mxu1 %v4852_v22 }
 0x307   : > { %3568 = vmatprep.subr.bf16.mxu1 %v5566_v35 }
 0x30a   : > { %3570 = vmatpush1.bf16.msra.mxu1 %v5155_v28 }
 0x30b   : > { %3571 = vmatprep.subr.bf16.mxu1 %v5566_v35 }
 0x30e   : > { %3573 = vmatpush1.bf16.msra.mxu1 %v5161_v10 }
 0x30f   : > { %3574 = vmatprep.subr.bf16.mxu1 %v5566_v35 }
 0x312   : > { %3576 = vmatpush1.bf16.msra.mxu1 %v5167_v44 }
 0x313   : > { %3577 = vmatprep.subr.bf16.mxu1 %v5566_v35 }
 0x316   : > { %3579 = vmatpush1.bf16.msra.mxu1 %v5172_v30 }
 0x317   : > { %3580 = vmatprep.subr.bf16.mxu1 %v5566_v35 }
 0x31a   : > { %3582 = vmatpush1.bf16.msra.mxu1 %v5174_v29 }
 0x31b   : > { %3583 = vmatprep.subr.bf16.mxu1 %v5566_v35 }
 0x31e   : > { %3585 = vmatpush1.bf16.msra.mxu1 %v5176_v55 }
 0x31f   : > { %3586 = vmatprep.subr.bf16.mxu1 %v5566_v35 }
 0x321   : > { %2649 = vmatmul.mubr.f32.vlgmr.msra.gmra.mrb[0].mxu1 %v4862_v51 }
 0x322   : > { %3588 = vmatpush1.bf16.msra.mxu1 %v5610_v46  ;;  %2654 = vmatprep.mubr.f32.mxu1 %v4865_v2 }
 0x323   : > { %3589 = vmatprep.subr.bf16.mxu1 %v5566_v35 }
 0x325   : > { %2656 = vmatmul.mubr.f32.gmra.mrb[2].mxu1 %v4867_v4 }
 0x326   : > { %3591 = vmatpush1.bf16.msra.mxu1 %v5613_v7  ;;  %2661 = vmatprep.mubr.f32.mxu1 %v4869_v52 }
 0x327   : > { %3592 = vmatprep.subr.bf16.mxu1 %v5566_v35 }
 0x329   : > { %2663 = vmatmul.mubr.f32.gmra.mrb[4].mxu1 %v4880_v9 }
 0x32a   : > { %3594 = vmatpush1.bf16.msra.mxu1 %v5616_v24  ;;  %2668 = vmatprep.mubr.f32.mxu1 %v4892_v6 }
 0x32b   : > { %3595 = vmatprep.subr.bf16.mxu1 %v5566_v35 }
 0x32d   : > { %2670 = vmatmul.mubr.f32.gmra.mrb[6].mxu1 %v4902_v43 }
 0x32e   : > { %3597 = vmatpush1.bf16.msra.mxu1 %v5618_v1  ;;  %2760 = vmatprep.mubr.f32.mxu1 %v4852_v22  ;;  %v1884_v22 = vpop.permute.xlu0 %1883 }
 0x32f   : > { %3598 = vmatprep.subr.bf16.mxu1 %v5566_v35 }
 0x332   : > { %3600 = vmatpush1.bf16.msra.mxu1 %v5620_v17  ;;  %v1894_v10 = vpop.permute.xlu0 %1893 }
 0x333   : > { %3601 = vmatprep.subr.bf16.mxu1 %v5566_v35 }
 0x336   : > { %3603 = vmatpush1.bf16.msra.mxu1 %v5621_v40 }
 0x337   : > { %3604 = vmatprep.subr.bf16.mxu1 %v5566_v35 }
 0x33a   : > { %3606 = vmatpush1.bf16.msra.mxu1 %v5622_v60 }
 0x33b   : > { %3607 = vmatprep.subr.bf16.mxu1 %v5566_v35 }
 0x33e   : > { %3609 = vmatpush1.bf16.msra.mxu1 %v5623_v38 }
 0x33f   : > { %3610 = vmatprep.subr.bf16.mxu1 %v5566_v35 }
 0x342   : > { %3612 = vmatpush1.bf16.msra.mxu1 %v5624_v23 }
 0x343   : > { %3613 = vmatprep.subr.bf16.mxu1 %v5566_v35 }
 0x346   : > { %3615 = vmatpush1.bf16.msra.mxu1 %v5625_v18 }
 0x349   : > { %2762 = vmatmul.mubr.f32.vlgmr.msra.gmra.mrb[0].mxu1 %v4862_v51  ;;  %v1889_v51 = vpop.permute.xlu1 %1888 }
 0x34a   : > { %2767 = vmatprep.mubr.f32.mxu1 %v4865_v2 }
 0x34d   : > { %2769 = vmatmul.mubr.f32.gmra.mrb[2].mxu1 %v4867_v4  ;;  %v1899_v30 = vpop.permute.xlu1 %1898 }
 0x34e   : > { %2774 = vmatprep.mubr.f32.mxu1 %v4869_v52 }
 0x351   : > { %2776 = vmatmul.mubr.f32.gmra.mrb[4].mxu1 %v4880_v9 }
 0x352   : > { %2781 = vmatprep.mubr.f32.mxu1 %v4892_v6 }
 0x355   : > { %2783 = vmatmul.mubr.f32.gmra.mrb[6].mxu1 %v4902_v43 }
 0x41c   : > { %v2763_v11 = vpop.f32.mrb[0].mxu1 }
 0x41d   : > { %v3636_v35 = vadd.f32 %v2763_v11, %v1884_v22  ;;  %v2765_v32 = vpop.f32.mrb[1].mxu1 }
 0x41f   : > { %v2788_v25 = vmax.f32 %v3636_v35, 0.0 }
 0x420   : > { %v2770_v28 = vpop.f32.mrb[2].mxu1 }
 0x421   : > { %2792 = vst [vmem:[%s299_s26] sm:$0xff] %v2788_v25  ;;  %v3637_v2 = vadd.f32 %v2770_v28, %v1889_v51  ;;  %v2772_v4 = vpop.f32.mrb[3].mxu1 }
 0x423   : > { %v2789_v52 = vmax.f32 %v3637_v2, 0.0 }
 0x424   : > { %v2777_v9 = vpop.f32.mrb[4].mxu1 }
 0x425   : > { %2793 = vst [vmem:[%s299_s26 + $0x8] sm:$0xff] %v2789_v52  ;;  %v3638_v6 = vadd.f32 %v2777_v9, %v1894_v10  ;;  %v2779_v43 = vpop.f32.mrb[5].mxu1 }
 0x427   : > { %v2790_v44 = vmax.f32 %v3638_v6, 0.0 }
 0x428   : > { %v2784_v29 = vpop.f32.mrb[6].mxu1 }
 0x429   : > { %2794 = vst [vmem:[%s299_s26 + $0x10] sm:$0xff] %v2790_v44  ;;  %v3639_v55 = vadd.f32 %v2784_v29, %v1899_v30  ;;  %v2786_v58 = vpop.f32.mrb[7].mxu1 }
 0x42b   : > { %v2791_v16 = vmax.f32 %v3639_v55, 0.0 }
 0x42d   : > { %2795 = vst [vmem:[%s299_s26 + $0x18] sm:$0xff] %v2791_v16 }
 0x42e   : > { %4035 = shalt.err (!%p4032_p13)
}
 0x42f   : > { %s4036_s30 = scalar_lea.hbm %s5357_s12, 512  ;;  %s4040_s11 = scalar_lea.hbm %s5406_s5, 1024 }
 0x430   : > { %p4037_p9 = scmp.ne.s32.totalorder %s5357_s12, %s4036_s30  ;;  %p4041_p11 = scmp.lt.u32.totalorder %s5357_s12, %s5406_s5 }
 0x431   : > { %p4042_p4 = scmp.lt.u32.totalorder %s4040_s11, %s4036_s30  ;;  %p4044_p10 = scmp.lt.u32.totalorder %s4036_s30, %s5357_s12 }
 0x432   : > { %p4038_p0 = pnand %p4037_p9, %p4320_p3 }
 0x433   : > { %p4043_p8 = por %p4042_p4, %p4041_p11 }
 0x434   : > { %p4039_p6 = pneg %p4038_p0 }
 0x435   : > { %p4045_p5 = por %p4044_p10, %p4043_p8 }
 0x437   : > { %p4046_p7 = pnand %p4045_p5, %p4039_p6 }
 0x439   : > { %4049 = shalt.err (!%p4046_p7)
}
 0x43a   : > { %s4110_s28 = smov 128   ;;  %s4111_s7 = smov 256  }
 0x43b   : > { %s4112_s27 = smov 8  }
 0x43c   : > { %3800 = dma.vmem_to_hbm [thread:$0]  (%p4320_p3), %s5352_s16, 512, %s5357_s12, %s2797_s13, %s4110_s28, %s4111_s7, %s4112_s27  }
 0x43d PF: > { %s2824_s15 = sand.u32 1, %s4084_s18   ;;  %p5635_p12 = scmp.ne.s32.totalorder %s5503_s25, 0 }
 0x43e   : > { %p5636_p1 = scmp.ge.s32.totalorder %s4096_s21, 2  ;;  %s2825_s22 = scalar_lea.sflag [#allocation4], %s2824_s15 }
 0x440   : > { %p3820_p2 = pnand %p5636_p1, %p5635_p12 }
 0x442   : > { %4079 = dma.done.wait (!%p3820_p2), %s2825_s22, 512  }
 0x443   : > { %4081 = vsyncadd (!%p3820_p2), %s2825_s22, 4294966784  ;;  %p20_p13 = scmp.ge.s32.totalorder %s4307_s29, 4   ;;  %s5637_s18 = smov %s4088_s19 }
 0x444   : > { %s5638_s19 = smov %s4092_s20  ;;  %s5639_s20 = smov %s4316_s8 }
 0x445   : > { %s5640_s21 = smov %s4307_s29  ;;  %22 = sbr.rel (!%p20_p13) target bundleno = 7 (0x7), region = 101 }
 0x44c   :  { %2830 = vsyncpa [#allocation3], 1 }
 0x44d   :  { %2832 = vsyncpa [#allocation3 + $0x1], 1 }
 0x44e   :  { %2833 = vsyncpa [#allocation6], 1 }
 0x44f   :  { %2834 = vsyncpa [#allocation9], 1 }
 0x450   :  { %2835 = vsyncpa [#allocation4], 1 }
 0x451   :  { %2837 = vsyncpa [#allocation4 + $0x1], 1 }

</bundles_post_ra>
